<compile_context>
chip_gen: v6e
topology: v6e:2x2x1
jax: 0.10.0
libtpu: 0.0.40
codegen_flags: <defaults>
</compile_context>

<pallas_src>
import functools

import jax
import jax.numpy as jnp
from jax import lax
from jax.experimental import pallas as pl
from jax.experimental.pallas import tpu as pltpu


def _aaren_kernel(x_ref, wkv_ref, c_ref, o_ref, *, mxu_bf16=False):
    """One grid step: BB batch elements, all heads packed along lanes.

    x_ref   : (BB*T, dim)       activations (batch*time packed on sublanes)
    wkv_ref : (dim, 2*H*D)      fused k/v projection weights (resident)
    c_ref   : (H*D, 2*H + D)    packed constants [qblk | expand^T | head_mean]
    o_ref   : (BB, T, D)        output
    """
    BB, T, D = o_ref.shape
    HD = c_ref.shape[0]
    H = HD // D
    N = BB * T
    f32 = jnp.float32

    def mx(a):  # optional bf16 cast of (large) MXU operands; f32 accumulation kept
        return a.astype(jnp.bfloat16) if mxu_bf16 else a

    x = x_ref[...]                                         # (N, dim) f32

    # ---- fused k/v projection for every head & batch row: ONE wide matmul ----
    kv = jnp.dot(mx(x), mx(wkv_ref[...]), preferred_element_type=f32)
    kv = jax.nn.silu(kv)                                   # (N, 2*HD)
    # TODO(synk): nn.Dropout is identity in eval mode; training dropout omitted.
    k_all = kv[:, :HD]
    v_all = kv[:, HD:]

    # ---- packed constants ----------------------------------------------------
    qblk = c_ref[:, :H]                 # block-diag q:   qblk[h*D+d, h'] = q[h,d]*(h==h')
    expT = c_ref[:, H:2 * H]            # head->lanes:    expT[h*D+d, h'] = (h==h')
    hmean = c_ref[:, 2 * H:2 * H + D]   # head mean:      hmean[h*D+d, d'] = (d==d')/H

    # ---- per-head scores: thin (N, HD) @ (HD, H) matmul ----------------------
    s = jnp.dot(mx(k_all), mx(qblk), preferred_element_type=f32)      # (N, H)

    # ---- causal running max: log2(T)-step segmented roll/max scan ------------
    # (replaces the per-head masked (T,T) max: no O(H*T^2) VPU selects, no (T,T)
    #  temporaries, no transposed-q input or second score matmul)
    row = lax.broadcasted_iota(jnp.int32, (N, H), 0)
    t_loc = row % T                               # time index within its batch element
    m = s
    shift = 1
    while shift < T:                              # static trip count: ceil(log2 T)
        shifted = pltpu.roll(m, shift, axis=0)    # circular; wrap rows masked below
        m = jnp.where(t_loc >= shift, jnp.maximum(m, shifted), m)
        shift *= 2

    e = jnp.exp(s - m)                            # (N, H), all values in (0, 1]
    # broadcast each head's scalar over its D lanes via a tiny constant matmul
    e_exp = lax.dot_general(e, expT, (((1,), (1,)), ((), ())),
                            preferred_element_type=f32)               # (N, HD)
    ev = v_all * e_exp                            # (N, HD)

    # ---- causal cumsums as tri matmuls (mask built in-kernel, no HBM input) --
    r_i = lax.broadcasted_iota(jnp.int32, (T, T), 0)
    c_i = lax.broadcasted_iota(jnp.int32, (T, T), 1)
    tri = (c_i <= r_i).astype(f32)                # (T, T) inclusive lower-triangular

    for bi in range(BB):                          # static unroll (BB is small)
        lo = bi * T
        ev_b = ev[lo:lo + T, :]                   # (T, HD)
        e_b = e[lo:lo + T, :]                     # (T, H)

        # two tile-aligned matmuls (no lane-axis concat of [e*v | e])
        w_b = jnp.dot(mx(tri), mx(ev_b), preferred_element_type=f32)  # (T, HD)
        u_b = jnp.dot(mx(tri), mx(e_b), preferred_element_type=f32)   # (T, H)

        r_b = pl.reciprocal(u_b, approx=True)     # EUP slot, u_b >= 1
        r_b = r_b * (2.0 - u_b * r_b)             # one Newton step -> ~f32 exact
        r_exp = lax.dot_general(r_b, expT, (((1,), (1,)), ((), ())),
                                preferred_element_type=f32)           # (T, HD)

        # head mean via constant (HD, D) matmul; the final (T, D=32) store is the
        # only lane-partial write (module semantics force the 32-wide output).
        out_b = jnp.dot(w_b * r_exp, hmean, preferred_element_type=f32)
        o_ref[bi] = out_b.astype(o_ref.dtype)


def build_aaren_constants(kv_weight, q_proj, *, heads, dim):
    """Precompute the resident kernel constants ONCE per parameter set
    (hoisted out of the per-forward path)."""
    H, D = heads, dim
    HD = H * D
    f32 = jnp.float32
    kv_weight = kv_weight.astype(f32)
    q_proj = q_proj.astype(f32)

    # Split the fused kv projection exactly as torch's view(..., H, D, 2):
    #   kv_weight row index = h*D*2 + d*2 + c ; c=0 -> k, c=1 -> v.
    W = kv_weight.reshape(H, D, 2, dim)
    wk = jnp.transpose(W[:, :, 0, :], (2, 0, 1)).reshape(dim, HD)
    wv = jnp.transpose(W[:, :, 1, :], (2, 0, 1)).reshape(dim, HD)
    wkv = jnp.concatenate([wk, wv], axis=1)                  # (dim, 2*HD)

    eye_h = jnp.eye(H, dtype=f32)
    qblk = (q_proj[:, :, None] * eye_h[:, None, :]).reshape(HD, H)   # (HD, H)
    expT = jnp.repeat(eye_h, D, axis=1).T                    # (HD, H)
    hmean = jnp.tile(jnp.eye(D, dtype=f32), (H, 1)) / H      # (HD, D)

    # One packed constant slab -> a single input stream / VMEM buffer.
    consts = jnp.concatenate([qblk, expT, hmean], axis=1)    # (HD, 2*H + D)
    return wkv, consts


def _default_grid_steps(batch):
    # v7x has 2 TensorCores per chip -> keep >=2 "parallel" grid steps there;
    # v5e / v6e have 1 TC -> one fat step minimizes per-step / DMA overhead.
    try:
        kind = jax.devices()[0].device_kind.lower()
    except Exception:
        kind = ""
    want = 2 if "v7" in kind else 1
    steps = max(1, min(want, batch))
    while batch % steps:
        steps -= 1
    return steps


def aaren_forward(x, wkv, consts, *, heads, dim, grid_steps=None, mxu_bf16=False):
    """Pallas AAREN forward (eval mode, mask=None). x: (B, T, dim) float32."""
    B, T, in_dim = x.shape
    assert in_dim == dim
    H, D = heads, dim
    HD = H * D
    assert wkv.shape == (dim, 2 * HD)
    assert consts.shape == (HD, 2 * H + D)

    G = _default_grid_steps(B) if grid_steps is None else grid_steps
    assert B % G == 0, (B, G)
    BB = B // G

    x2d = x.reshape(B * T, dim)      # pack batch*time on sublanes -> fat MXU matmuls

    kernel = functools.partial(_aaren_kernel, mxu_bf16=mxu_bf16)
    return pl.pallas_call(
        kernel,
        out_shape=jax.ShapeDtypeStruct((B, T, D), jnp.float32),
        grid_spec=pltpu.PrefetchScalarGridSpec(
            num_scalar_prefetch=0,
            grid=(G,),
            in_specs=[
                pl.BlockSpec((BB * T, dim), lambda g: (g, 0)),     # activations
                pl.BlockSpec((dim, 2 * HD), lambda g: (0, 0)),     # fused Wkv (resident)
                pl.BlockSpec((HD, 2 * H + D), lambda g: (0, 0)),   # packed constants
            ],
            out_specs=pl.BlockSpec((BB, T, D), lambda g: (g, 0, 0)),
        ),
        compiler_params=pltpu.CompilerParams(
            dimension_semantics=("parallel",)),
    )(x2d, wkv, consts)
    # TODO(synk): for long T, tile the time axis and carry (m, u, w) across tiles
    #             (blocked online scan) instead of the O(T^2) tri matmul.


def make_aaren_forward(kv_weight, q_proj, *, heads, dim, grid_steps=None,
                       mxu_bf16=False):
    """Build a forward fn with constants precomputed once (review item #9)."""
    wkv, consts = build_aaren_constants(kv_weight, q_proj, heads=heads, dim=dim)

    @jax.jit
    def fwd(x):
        return aaren_forward(x, wkv, consts, heads=heads, dim=dim,
                             grid_steps=grid_steps, mxu_bf16=mxu_bf16)
    return fwd


def aaren_reference(x, kv_weight, q_proj, *, heads, dim):
    """Pure-JAX mirror of the PyTorch forward (eval mode, mask=None)."""
    B, T, _ = x.shape
    kv = x @ kv_weight.T                                  # (B, T, H*D*2)
    kv = kv.reshape(B, T, heads, dim, 2)
    kv = jax.nn.silu(kv)
    k, v = kv[..., 0], kv[..., 1]
    s = jnp.einsum('hd,bthd->bth', q_proj, k)             # (B, T, H)
    m_a = lax.cummax(s, axis=1)
    e = jnp.exp(s - m_a)
    u = jnp.cumsum(e, axis=1)
    w = jnp.cumsum(e[..., None] * v, axis=1)
    out = w / u[..., None]
    return out.mean(axis=2)                               # concat_heads=False


if __name__ == "__main__":
    jax.config.update("jax_default_matmul_precision", "highest")

    B, T, HEADS, DIM = 2, 8, 4, 32

    key = jax.random.PRNGKey(0)
    kx, kw, kq = jax.random.split(key, 3)

    x = jax.random.normal(kx, (B, T, DIM), dtype=jnp.float32)

    # Deterministic xavier-uniform-style init (shapes from the module __init__).
    fan_in, fan_out = DIM, HEADS * DIM * 2
    bound_kv = (6.0 / (fan_in + fan_out)) ** 0.5
    kv_weight = jax.random.uniform(kw, (HEADS * DIM * 2, DIM),
                                   minval=-bound_kv, maxval=bound_kv,
                                   dtype=jnp.float32)
    bound_q = (6.0 / (DIM + HEADS)) ** 0.5
    q_proj = jax.random.uniform(kq, (HEADS, DIM),
                                minval=-bound_q, maxval=bound_q,
                                dtype=jnp.float32)

    fwd = make_aaren_forward(kv_weight, q_proj, heads=HEADS, dim=DIM)
    out = jax.block_until_ready(fwd(x))

    ref = aaren_reference(x, kv_weight, q_proj, heads=HEADS, dim=DIM)
    assert out.shape == (B, T, DIM), out.shape
    assert jnp.allclose(out, ref, atol=1e-3, rtol=1e-3), \
        f"max abs err = {jnp.max(jnp.abs(out - ref))}"

    print("KERNEL_OK")
</pallas_src>

<mosaic_0001>
module attributes {stable_mosaic.version = 11 : i64} {
  func.func @_aaren_kernel(%arg0: i32, %arg1: memref<16x32xf32, #tpu.memory_space<vmem>>, %arg2: memref<32x256xf32, #tpu.memory_space<vmem>>, %arg3: memref<128x40xf32, #tpu.memory_space<vmem>>, %arg4: memref<2x8x32xf32, #tpu.memory_space<vmem>>) attributes {dimension_semantics = [#tpu.dimension_semantics<parallel>], iteration_bounds = array<i64: 1>, scalar_prefetch = 0 : i64, scratch_operands = 0 : i64, tpu.core_type = #tpu.core_type<tc>, window_params = [{transform_indices = @transform_0, window_bounds = array<i64: 16, 32>}, {pipeline_mode = #tpu.pipeline_mode<synchronous>, transform_indices = @transform_1, window_bounds = array<i64: 32, 256>}, {pipeline_mode = #tpu.pipeline_mode<synchronous>, transform_indices = @transform_2, window_bounds = array<i64: 128, 40>}, {transform_indices = @transform_3, window_bounds = array<i64: 2, 8, 32>}]} {
    %c0 = arith.constant 0 : index
    %c0_0 = arith.constant 0 : index
    %0 = vector.load %arg1[%c0, %c0_0] : memref<16x32xf32, #tpu.memory_space<vmem>>, vector<16x32xf32>
    %c0_1 = arith.constant 0 : index
    %c0_2 = arith.constant 0 : index
    %1 = vector.load %arg2[%c0_1, %c0_2] : memref<32x256xf32, #tpu.memory_space<vmem>>, vector<32x256xf32>
    %cst = arith.constant dense<0.000000e+00> : vector<16x256xf32>
    %2 = tpu.matmul %0, %1, %cst {dimension_numbers = #tpu.dot_dimension_numbers<[1], [0], [0], [1], [0, 0, 1, 1], [], []>, precision = #tpu.contract_precision<fp32>} : vector<16x32xf32>, vector<32x256xf32>, vector<16x256xf32> -> vector<16x256xf32>
    %3 = arith.negf %2 : vector<16x256xf32>
    %4 = math.exp %3 : vector<16x256xf32>
    %cst_3 = arith.constant 1.000000e+00 : f32
    %5 = vector.broadcast %cst_3 : f32 to vector<16x256xf32>
    %6 = arith.addf %5, %4 : vector<16x256xf32>
    %7 = arith.divf %5, %6 : vector<16x256xf32>
    %8 = arith.mulf %2, %7 : vector<16x256xf32>
    %9 = vector.extract_strided_slice %8 {offsets = [0, 0], sizes = [16, 128], strides = [1, 1]} : vector<16x256xf32> to vector<16x128xf32>
    %10 = vector.extract_strided_slice %8 {offsets = [0, 128], sizes = [16, 128], strides = [1, 1]} : vector<16x256xf32> to vector<16x128xf32>
    %c0_4 = arith.constant 0 : index
    %c0_5 = arith.constant 0 : index
    %11 = vector.load %arg3[%c0_4, %c0_5] : memref<128x40xf32, #tpu.memory_space<vmem>>, vector<128x4xf32>
    %c0_6 = arith.constant 0 : index
    %c4 = arith.constant 4 : index
    %12 = vector.load %arg3[%c0_6, %c4] : memref<128x40xf32, #tpu.memory_space<vmem>>, vector<128x4xf32>
    %c0_7 = arith.constant 0 : index
    %c8 = arith.constant 8 : index
    %13 = vector.load %arg3[%c0_7, %c8] : memref<128x40xf32, #tpu.memory_space<vmem>>, vector<128x32xf32>
    %cst_8 = arith.constant dense<0.000000e+00> : vector<16x4xf32>
    %14 = tpu.matmul %9, %11, %cst_8 {dimension_numbers = #tpu.dot_dimension_numbers<[1], [0], [0], [1], [0, 0, 1, 1], [], []>, precision = #tpu.contract_precision<fp32>} : vector<16x128xf32>, vector<128x4xf32>, vector<16x4xf32> -> vector<16x4xf32>
    %15 = tpu.iota {dimensions = array<i32: 0>} : vector<16x4xi32>
    %c8_i32 = arith.constant 8 : i32
    %c0_i32 = arith.constant 0 : i32
    %16 = arith.cmpi eq, %c8_i32, %c0_i32 : i32
    %c1_i32 = arith.constant 1 : i32
    %17 = arith.select %16, %c1_i32, %c8_i32 : i32
    %18 = vector.broadcast %17 : i32 to vector<16x4xi32>
    %19 = arith.remsi %15, %18 : vector<16x4xi32>
    %c0_i32_9 = arith.constant 0 : i32
    %20 = vector.broadcast %c0_i32_9 : i32 to vector<16x4xi32>
    %21 = arith.cmpi ne, %19, %20 : vector<16x4xi32>
    %c0_i32_10 = arith.constant 0 : i32
    %22 = vector.broadcast %c0_i32_10 : i32 to vector<16x4xi32>
    %23 = arith.cmpi slt, %19, %22 : vector<16x4xi32>
    %c0_i32_11 = arith.constant 0 : i32
    %24 = arith.cmpi slt, %17, %c0_i32_11 : i32
    %25 = vector.broadcast %24 : i1 to vector<16x4xi1>
    %26 = vector.broadcast %25 : vector<16x4xi1> to vector<16x4xi1>
    %27 = arith.xori %23, %26 : vector<16x4xi1>
    %28 = arith.andi %27, %21 : vector<16x4xi1>
    %29 = vector.broadcast %17 : i32 to vector<16x4xi32>
    %30 = arith.addi %19, %29 : vector<16x4xi32>
    %31 = arith.select %28, %30, %19 : vector<16x4xi1>, vector<16x4xi32>
    %c1_i32_12 = arith.constant 1 : i32
    %32 = tpu.dynamic_rotate %14 by %c1_i32_12 dim 0 : vector<16x4xf32>, i32 -> vector<16x4xf32>
    %c1_i32_13 = arith.constant 1 : i32
    %33 = vector.broadcast %c1_i32_13 : i32 to vector<16x4xi32>
    %34 = arith.cmpi sge, %31, %33 : vector<16x4xi32>
    %35 = arith.maximumf %14, %32 : vector<16x4xf32>
    %36 = arith.select %34, %35, %14 : vector<16x4xi1>, vector<16x4xf32>
    %c2_i32 = arith.constant 2 : i32
    %37 = tpu.dynamic_rotate %36 by %c2_i32 dim 0 : vector<16x4xf32>, i32 -> vector<16x4xf32>
    %c2_i32_14 = arith.constant 2 : i32
    %38 = vector.broadcast %c2_i32_14 : i32 to vector<16x4xi32>
    %39 = arith.cmpi sge, %31, %38 : vector<16x4xi32>
    %40 = arith.maximumf %36, %37 : vector<16x4xf32>
    %41 = arith.select %39, %40, %36 : vector<16x4xi1>, vector<16x4xf32>
    %c4_i32 = arith.constant 4 : i32
    %42 = tpu.dynamic_rotate %41 by %c4_i32 dim 0 : vector<16x4xf32>, i32 -> vector<16x4xf32>
    %c4_i32_15 = arith.constant 4 : i32
    %43 = vector.broadcast %c4_i32_15 : i32 to vector<16x4xi32>
    %44 = arith.cmpi sge, %31, %43 : vector<16x4xi32>
    %45 = arith.maximumf %41, %42 : vector<16x4xf32>
    %46 = arith.select %44, %45, %41 : vector<16x4xi1>, vector<16x4xf32>
    %47 = arith.subf %14, %46 : vector<16x4xf32>
    %48 = math.exp %47 : vector<16x4xf32>
    %cst_16 = arith.constant dense<0.000000e+00> : vector<16x128xf32>
    %49 = tpu.matmul %48, %12, %cst_16 {dimension_numbers = #tpu.dot_dimension_numbers<[1], [1], [0], [0], [0, 0, 1, 0], [], []>, precision = #tpu.contract_precision<fp32>} : vector<16x4xf32>, vector<128x4xf32>, vector<16x128xf32> -> vector<16x128xf32>
    %50 = arith.mulf %10, %49 : vector<16x128xf32>
    %51 = tpu.iota {dimensions = array<i32: 0>} : vector<8x8xi32>
    %52 = tpu.iota {dimensions = array<i32: 1>} : vector<8x8xi32>
    %53 = arith.cmpi sle, %52, %51 : vector<8x8xi32>
    %54 = arith.extui %53 : vector<8x8xi1> to vector<8x8xi32>
    %55 = arith.sitofp %54 : vector<8x8xi32> to vector<8x8xf32>
    %56 = vector.extract_strided_slice %50 {offsets = [0, 0], sizes = [8, 128], strides = [1, 1]} : vector<16x128xf32> to vector<8x128xf32>
    %57 = vector.extract_strided_slice %48 {offsets = [0, 0], sizes = [8, 4], strides = [1, 1]} : vector<16x4xf32> to vector<8x4xf32>
    %cst_17 = arith.constant dense<0.000000e+00> : vector<8x128xf32>
    %58 = tpu.matmul %55, %56, %cst_17 {dimension_numbers = #tpu.dot_dimension_numbers<[1], [0], [0], [1], [0, 0, 1, 1], [], []>, precision = #tpu.contract_precision<fp32>} : vector<8x8xf32>, vector<8x128xf32>, vector<8x128xf32> -> vector<8x128xf32>
    %cst_18 = arith.constant dense<0.000000e+00> : vector<8x4xf32>
    %59 = tpu.matmul %55, %57, %cst_18 {dimension_numbers = #tpu.dot_dimension_numbers<[1], [0], [0], [1], [0, 0, 1, 1], [], []>, precision = #tpu.contract_precision<fp32>} : vector<8x8xf32>, vector<8x4xf32>, vector<8x4xf32> -> vector<8x4xf32>
    %60 = tpu.reciprocal %59 {approx = true} : vector<8x4xf32> -> vector<8x4xf32>
    %61 = arith.mulf %59, %60 : vector<8x4xf32>
    %cst_19 = arith.constant 2.000000e+00 : f32
    %62 = vector.broadcast %cst_19 : f32 to vector<8x4xf32>
    %63 = arith.subf %62, %61 : vector<8x4xf32>
    %64 = arith.mulf %60, %63 : vector<8x4xf32>
    %cst_20 = arith.constant dense<0.000000e+00> : vector<8x128xf32>
    %65 = tpu.matmul %64, %12, %cst_20 {dimension_numbers = #tpu.dot_dimension_numbers<[1], [1], [0], [0], [0, 0, 1, 0], [], []>, precision = #tpu.contract_precision<fp32>} : vector<8x4xf32>, vector<128x4xf32>, vector<8x128xf32> -> vector<8x128xf32>
    %66 = arith.mulf %58, %65 : vector<8x128xf32>
    %cst_21 = arith.constant dense<0.000000e+00> : vector<8x32xf32>
    %67 = tpu.matmul %66, %13, %cst_21 {dimension_numbers = #tpu.dot_dimension_numbers<[1], [0], [0], [1], [0, 0, 1, 1], [], []>, precision = #tpu.contract_precision<fp32>} : vector<8x128xf32>, vector<128x32xf32>, vector<8x32xf32> -> vector<8x32xf32>
    %c0_22 = arith.constant 0 : index
    %c0_23 = arith.constant 0 : index
    %c0_24 = arith.constant 0 : index
    %68 = vector.load %arg4[%c0_22, %c0_23, %c0_24] : memref<2x8x32xf32, #tpu.memory_space<vmem>>, vector<1x8x32xf32>
    %69 = vector.shape_cast %68 : vector<1x8x32xf32> to vector<8x32xf32>
    %70 = vector.shape_cast %67 : vector<8x32xf32> to vector<1x8x32xf32>
    tpu.vector_store %arg4[%c0_22, %c0_23, %c0_24], %70 {strides = array<i32>} : memref<2x8x32xf32, #tpu.memory_space<vmem>>, vector<1x8x32xf32>,
    %71 = vector.extract_strided_slice %50 {offsets = [8, 0], sizes = [8, 128], strides = [1, 1]} : vector<16x128xf32> to vector<8x128xf32>
    %72 = vector.extract_strided_slice %48 {offsets = [8, 0], sizes = [8, 4], strides = [1, 1]} : vector<16x4xf32> to vector<8x4xf32>
    %cst_25 = arith.constant dense<0.000000e+00> : vector<8x128xf32>
    %73 = tpu.matmul %55, %71, %cst_25 {dimension_numbers = #tpu.dot_dimension_numbers<[1], [0], [0], [1], [0, 0, 1, 1], [], []>, precision = #tpu.contract_precision<fp32>} : vector<8x8xf32>, vector<8x128xf32>, vector<8x128xf32> -> vector<8x128xf32>
    %cst_26 = arith.constant dense<0.000000e+00> : vector<8x4xf32>
    %74 = tpu.matmul %55, %72, %cst_26 {dimension_numbers = #tpu.dot_dimension_numbers<[1], [0], [0], [1], [0, 0, 1, 1], [], []>, precision = #tpu.contract_precision<fp32>} : vector<8x8xf32>, vector<8x4xf32>, vector<8x4xf32> -> vector<8x4xf32>
    %75 = tpu.reciprocal %74 {approx = true} : vector<8x4xf32> -> vector<8x4xf32>
    %76 = arith.mulf %74, %75 : vector<8x4xf32>
    %cst_27 = arith.constant 2.000000e+00 : f32
    %77 = vector.broadcast %cst_27 : f32 to vector<8x4xf32>
    %78 = arith.subf %77, %76 : vector<8x4xf32>
    %79 = arith.mulf %75, %78 : vector<8x4xf32>
    %cst_28 = arith.constant dense<0.000000e+00> : vector<8x128xf32>
    %80 = tpu.matmul %79, %12, %cst_28 {dimension_numbers = #tpu.dot_dimension_numbers<[1], [1], [0], [0], [0, 0, 1, 0], [], []>, precision = #tpu.contract_precision<fp32>} : vector<8x4xf32>, vector<128x4xf32>, vector<8x128xf32> -> vector<8x128xf32>
    %81 = arith.mulf %73, %80 : vector<8x128xf32>
    %cst_29 = arith.constant dense<0.000000e+00> : vector<8x32xf32>
    %82 = tpu.matmul %81, %13, %cst_29 {dimension_numbers = #tpu.dot_dimension_numbers<[1], [0], [0], [1], [0, 0, 1, 1], [], []>, precision = #tpu.contract_precision<fp32>} : vector<8x128xf32>, vector<128x32xf32>, vector<8x32xf32> -> vector<8x32xf32>
    %c1 = arith.constant 1 : index
    %c0_30 = arith.constant 0 : index
    %c0_31 = arith.constant 0 : index
    %83 = vector.load %arg4[%c1, %c0_30, %c0_31] : memref<2x8x32xf32, #tpu.memory_space<vmem>>, vector<1x8x32xf32>
    %84 = vector.shape_cast %83 : vector<1x8x32xf32> to vector<8x32xf32>
    %85 = vector.shape_cast %82 : vector<8x32xf32> to vector<1x8x32xf32>
    tpu.vector_store %arg4[%c1, %c0_30, %c0_31], %85 {strides = array<i32>} : memref<2x8x32xf32, #tpu.memory_space<vmem>>, vector<1x8x32xf32>,
    return
  }
  func.func @transform_0(%arg0: i32) -> (i32, i32) {
    %c0_i32 = arith.constant 0 : i32
    %c0_i32_0 = arith.constant 0 : i32
    return %arg0, %c0_i32 : i32, i32
  }
  func.func @transform_1(%arg0: i32) -> (i32, i32) {
    %c0_i32 = arith.constant 0 : i32
    %c0_i32_0 = arith.constant 0 : i32
    %c0_i32_1 = arith.constant 0 : i32
    return %c0_i32, %c0_i32_0 : i32, i32
  }
  func.func @transform_2(%arg0: i32) -> (i32, i32) {
    %c0_i32 = arith.constant 0 : i32
    %c0_i32_0 = arith.constant 0 : i32
    %c0_i32_1 = arith.constant 0 : i32
    return %c0_i32, %c0_i32_0 : i32, i32
  }
  func.func @transform_3(%arg0: i32) -> (i32, i32, i32) {
    %c0_i32 = arith.constant 0 : i32
    %c0_i32_0 = arith.constant 0 : i32
    %c0_i32_1 = arith.constant 0 : i32
    return %arg0, %c0_i32, %c0_i32_0 : i32, i32, i32
  }
}

</mosaic_0001>

<bundles_post_ra>
// kernel: fwd.1
= control target key start
LH: loop header
LB: loop body
LE: loop exit
PB: predicated region body
PF: predicated region fallthrough
CT: control target
= control target key end

     0   :  { %8 = vsyncpa [#allocation3], 0  ;;  %s11178_s0 = inlined_call_operand.hbm [shape: f32[16,32], index: 0, kind: input, shape index: {}]   ;;  %s11179_s1 = inlined_call_operand.hbm [shape: f32[32,256], index: 1, kind: input, shape index: {}]   ;;  %s11180_s2 = inlined_call_operand.hbm [shape: f32[128,40], index: 2, kind: input, shape index: {}]   ;;  %s11181_s3 = inlined_call_operand.hbm [shape: f32[2,8,32], index: 3, kind: output, shape index: {}]  }
   0x1   :  { %9 = vsyncpa [#allocation6], 0 }
   0x2   :  { %10 = vsyncpa [#allocation4], 0  ;;  %s8881_s12 = smov [#allocation5]  }
   0x3   :  { %s28_s13 = sshll.u32 %s8881_s12, 4  ;;  %s29_s13 = int_to_ptr.vmem [resolvable:$true] %s28_s13 }
   0x4   :  { %s8803_s14 = scalar_lea.vmem %s29_s13, 1024  ;;  %p8808_p1 = scmp.lt.s32.totalorder %s29_s13, %s29_s13 }
   0x5   :  { %p8804_p0 = scmp.ne.s32.totalorder %s29_s13, %s8803_s14  ;;  %p8809_p2 = scmp.lt.s32.totalorder %s8803_s14, %s8803_s14 }
   0x7   :  { %p8810_p3 = por %p8809_p2, %p8808_p1 }
   0x9   :  { %p8811_p4 = pnand %p8810_p3, %p8804_p0 }
   0xb   :  { %8814 = shalt.err (!%p8811_p4)
}
   0xc   :  { %s8882_s15 = smov 256   ;;  %s8883_s16 = smov 16  }
   0xd   :  { %34 = dma.hbm_to_vmem [thread:$0]  %s11179_s1, 1024, %s29_s13, [#allocation6], %s8882_s15, %s8882_s15, %s8883_s16  }
   0xe   :  { %s8884_s19 = smov [#allocation2]  }
   0xf   :  { %s16_s20 = sshll.u32 %s8884_s19, 4  ;;  %s17_s20 = int_to_ptr.vmem [resolvable:$true] %s16_s20 }
  0x10   :  { %s8823_s21 = scalar_lea.vmem %s17_s20, 256  ;;  %p8828_p6 = scmp.lt.s32.totalorder %s17_s20, %s17_s20 }
  0x11   :  { %p8824_p5 = scmp.ne.s32.totalorder %s17_s20, %s8823_s21  ;;  %p8829_p7 = scmp.lt.s32.totalorder %s8823_s21, %s8823_s21 }
  0x13   :  { %p8830_p8 = por %p8829_p7, %p8828_p6 }
  0x15   :  { %p8831_p9 = pnand %p8830_p8, %p8824_p5 }
  0x17   :  { %8834 = shalt.err (!%p8831_p9)
}
  0x18   :  { %s8885_s22 = smov 128   ;;  %s8886_s23 = smov 8  }
  0x19   :  { %22 = dma.hbm_to_vmem [thread:$0]  %s11178_s0, 256, %s17_s20, [#allocation3], %s8885_s22, %s8885_s22, %s8886_s23  }
  0x1a   :  { %s8887_s1 = smov [#allocation7]  }
  0x1b   :  { %s40_s26 = sshll.u32 %s8887_s1, 4  ;;  %s41_s26 = int_to_ptr.vmem [resolvable:$true] %s40_s26 }
  0x1c   :  { %s8843_s27 = scalar_lea.vmem %s41_s26, 2048  ;;  %p8848_p11 = scmp.lt.s32.totalorder %s41_s26, %s41_s26 }
  0x1d   :  { %p8844_p10 = scmp.ne.s32.totalorder %s41_s26, %s8843_s27  ;;  %p8849_p12 = scmp.lt.s32.totalorder %s8843_s27, %s8843_s27 }
  0x1f   :  { %p8850_p13 = por %p8849_p12, %p8848_p11 }
  0x21   :  { %p8851_p0 = pnand %p8850_p13, %p8844_p10 }
  0x23   :  { %8854 = shalt.err (!%p8851_p0)
}
  0x24   :  { %46 = dma.hbm_to_vmem [thread:$0]  %s11180_s2, 2048, %s41_s26, [#allocation6], %s8885_s22, %s8885_s22, %s8886_s23  }
  0x25   :  { %8875 = dma.done.wait [#allocation3], 256  }
  0x26   :  { %8876 = vsyncadd [#allocation3], 4294967040 }
  0x27   :  { %8877 = dma.done.wait [#allocation6], 3072  }
  0x28   :  { %8878 = vsyncadd [#allocation6], 4294964224  ;;  %v11182_v0 = vmov 0.0   ;;  %v65_v1 = vld [vmem:[#allocation5 + $0x38] sm:$0xff]  ;;  %v64_v2 = vld [vmem:[#allocation5 + $0x30] sm:$0xff]  ;;  %vm66_vm0 = vcmask 261120  }
  0x29   :  { %145 = vmatprep.mubr.f32.mxu0 %v11182_v0  ;;  %272 = vmatprep.mubr.f32.mxu1 %v11182_v0  ;;  %v63_v3 = vld [vmem:[#allocation5 + $0x28] sm:$0xff]  ;;  %v8930_v4 = vand.u32 4294901760, %v65_v1  ;;  %v8932_v5 = vand.u32 4294901760, %v64_v2  ;;  %v62_v7 = vld [vmem:[#allocation5 + $0x20] sm:$0xff]  ;;  %v61_v8 = vld [vmem:[#allocation5 + $0x18] sm:$0xff]  ;;  %s8889_s0 = smov 124  }
  0x2a   :  { %v8934_v6 = vand.u32 4294901760, %v63_v3  ;;  %v60_v9 = vld [vmem:[#allocation5 + $0x10] sm:$0xff]  ;;  %v8936_v10 = vand.u32 4294901760, %v62_v7  ;;  %v8938_v11 = vand.u32 4294901760, %v61_v8  ;;  %v59_v13 = vld [vmem:[#allocation5 + $0x8] sm:$0xff]  ;;  %v58_v14 = vld [vmem:[#allocation5] sm:$0xff] }
  0x2b   :  { %v8940_v12 = vand.u32 4294901760, %v60_v9  ;;  %v56_v15 = vld [vmem:[#allocation2] sm:$0xff]  ;;  %98 = vmatprep.subr.mxu0 %v8930_v4  ;;  %v8943_v16 = vand.u32 4294901760, %v59_v13  ;;  %v8946_v17 = vsub.f32 %v65_v1, %v8930_v4  ;;  %v8948_v18 = vand.u32 4294901760, %v58_v14  ;;  %v57_v20 = vld [vmem:[#allocation2 + $0x8] sm:$0xff]  ;;  %s8891_s2 = smov 120  }
  0x2c   :  { %v8951_v19 = vsub.f32 %v64_v2, %v8932_v5  ;;  %100 = vmatpush1.msra.mxu0 %v8932_v5  ;;  %v68_v21 = vsel %vm66_vm0, %v56_v15, 0  ;;  %v8956_v22 = vsub.f32 %v63_v3, %v8934_v6  ;;  %v8959_v23 = vsub.f32 %v62_v7, %v8936_v10  ;;  %v9066_v63 = vld [vmem:[#allocation7 + $0x78] sm:$0xff]  ;;  %v9071_v2 = vld [vmem:[#allocation7 + $0x70] sm:$0xff]  ;;  %s8892_s30 = smov [#allocation8]  }
  0x2d   :  { %v8962_v24 = vsub.f32 %v61_v8, %v8938_v11  ;;  %102 = vmatprep.subr.mxu0 %v8934_v6  ;;  %v194_v25 = vand.u32 4294901760, %v8946_v17  ;;  %v8967_v27 = vand.u32 4294901760, %v68_v21  ;;  %v8970_v28 = vsub.f32 %v60_v9, %v8940_v12  ;;  %v9095_v9 = vld [vmem:[#allocation7 + $0x60] sm:$0xff]  ;;  %1505 = vrot.lane.b32.xlu0 %v9066_v63, %s8889_s0  ;;  %s6661_s4 = sshll.u32 %s8892_s30, 4  ;;  %s6662_s4 = int_to_ptr.vmem [resolvable:$true] %s6661_s4 }
  0x2e   :  { %v200_v26 = vand.u32 4294901760, %v8951_v19  ;;  %104 = vmatpush1.msra.mxu0 %v8936_v10  ;;  %v206_v29 = vand.u32 4294901760, %v8956_v22  ;;  %v212_v30 = vand.u32 4294901760, %v8959_v23  ;;  %v71_v32 = vsel %vm66_vm0, %v57_v20, 0  ;;  %v9127_v20 = vld [vmem:[#allocation7 + $0x50] sm:$0xff]  ;;  %s8855_s5 = scalar_lea.vmem %s6662_s4, 256  ;;  %p8860_p2 = scmp.lt.s32.totalorder %s6662_s4, %s6662_s4 }
  0x2f   :  { %v218_v31 = vand.u32 4294901760, %v8962_v24  ;;  %106 = vmatprep.subr.mxu0 %v8938_v11  ;;  %v195_v33 = vsub.f32 %v8946_v17, %v194_v25  ;;  %v8985_v35 = vsub.f32 %v68_v21, %v8967_v27  ;;  %v224_v36 = vand.u32 4294901760, %v8970_v28  ;;  %p8856_p1 = scmp.ne.s32.totalorder %s6662_s4, %s8855_s5  ;;  %p8861_p3 = scmp.lt.s32.totalorder %s8855_s5, %s8855_s5 }
  0x30   :  { %v201_v34 = vsub.f32 %v8951_v19, %v200_v26  ;;  %108 = vmatpush1.msra.mxu0 %v8940_v12  ;;  %v207_v37 = vsub.f32 %v8956_v22, %v206_v29  ;;  %v213_v38 = vsub.f32 %v8959_v23, %v212_v30  ;;  %v8998_v40 = vand.u32 4294901760, %v71_v32 }
  0x31   :  { %v219_v39 = vsub.f32 %v8962_v24, %v218_v31  ;;  %110 = vmatprep.subr.mxu0 %v8943_v16  ;;  %v196_v41 = vand.u32 4294901760, %v195_v33  ;;  %v148_v43 = vand.u32 4294901760, %v8985_v35  ;;  %v225_v44 = vsub.f32 %v8970_v28, %v224_v36  ;;  %1503 = vrot.lane.b32.xlu0 %v9071_v2, %s8889_s0  ;;  %p8862_p4 = por %p8861_p3, %p8860_p2 }
  0x32   :  { %v202_v42 = vand.u32 4294901760, %v201_v34  ;;  %112 = vmatpush1.msra.mxu0 %v8948_v18  ;;  %v208_v45 = vand.u32 4294901760, %v207_v37  ;;  %v214_v46 = vand.u32 4294901760, %v213_v38  ;;  %v9007_v47 = vsub.f32 %v71_v32, %v8998_v40  ;;  %v9158_v32 = vld [vmem:[#allocation7 + $0x40] sm:$0xff]  ;;  %v9174_v38 = vld [vmem:[#allocation7 + $0x38] sm:$0xff] }
  0x33   :  { %197 = vmatprep.subr.mxu1 %v196_v41  ;;  %v149_v48 = vsub.f32 %v8985_v35, %v148_v43  ;;  %313 = vmatprep.subr.mxu0 %v8946_v17  ;;  %v220_v49 = vand.u32 4294901760, %v219_v39  ;;  %v229_v50 = vsub.f32 %v59_v13, %v8943_v16  ;;  %v235_v51 = vsub.f32 %v58_v14, %v8948_v18  ;;  %v9111_v14 = vld [vmem:[#allocation7 + $0x58] sm:$0xff]  ;;  %p8863_p5 = pnand %p8862_p4, %p8856_p1 }
  0x34   :  { %203 = vmatpush1.msra.mxu1 %v202_v42  ;;  %v159_v52 = vand.u32 4294901760, %v9007_v47  ;;  %v226_v54 = vand.u32 4294901760, %v225_v44  ;;  %v9069_v1 = vand.u32 4294901760, %v9066_v63  ;;  %v9108_v13 = vand.u32 4294901760, %v9095_v9  ;;  %v9190_v44 = vld [vmem:[#allocation7 + $0x30] sm:$0xff] }
  0x35   :  { %v150_v53 = vand.u32 4294901760, %v149_v48  ;;  %209 = vmatprep.subr.mxu1 %v208_v45  ;;  %v230_v55 = vand.u32 4294901760, %v229_v50  ;;  %v236_v56 = vand.u32 4294901760, %v235_v51  ;;  %v9187_v42 = vand.u32 4294901760, %v9174_v38  ;;  %1497 = vrot.lane.b32.xlu0 %v9111_v14, %s8889_s0 }
  0x36   :  { %215 = vmatpush1.msra.mxu1 %v214_v46  ;;  %v160_v57 = vsub.f32 %v9007_v47, %v159_v52  ;;  %v9075_v3 = vsub.f32 %v9066_v63, %v9069_v1  ;;  %vm1507_vm1 = vcmask 31744   ;;  %vm8890_vm12 = vmmov 0  }
  0x37   :  { %151 = vmatmul.mubr.f32.vlgmr.msra.gmra.mxu0 %v150_v53  ;;  %221 = vmatprep.subr.mxu1 %v220_v49  ;;  %v231_v58 = vsub.f32 %v229_v50, %v230_v55  ;;  %v237_v59 = vsub.f32 %v235_v51, %v236_v56  ;;  %v9200_v48 = vsub.f32 %v9174_v38, %v9187_v42  ;;  %v9204_v49 = vand.u32 4294901760, %v9190_v44 }
  0x38   :  { %316 = vmatpush1.msra.mxu0 %v8951_v19  ;;  %156 = vmatprep.mubr.f32.mxu0 %v11182_v0  ;;  %v161_v60 = vand.u32 4294901760, %v160_v57  ;;  %v9125_v19 = vand.u32 4294901760, %v9111_v14  ;;  %vm2237_vm13 = vcmask 64512  }
  0x39   :  { %319 = vmatprep.subr.mxu0 %v8956_v22  ;;  %227 = vmatpush1.msra.mxu1 %v226_v54  ;;  %v232_v61 = vand.u32 4294901760, %v231_v58  ;;  %v238_v62 = vand.u32 4294901760, %v237_v59  ;;  %v9212_v53 = vand.u32 4294901760, %v9200_v48 }
  0x3a   :  { %322 = vmatpush1.msra.mxu0 %v8959_v23 }
  0x3b   :  { %162 = vmatmul.mubr.f32.gmra.mxu0 %v161_v60  ;;  %233 = vmatprep.subr.mxu1 %v232_v61  ;;  %11390 = vst [vmem:[#allocation18_spill] sm:$0xff] %v9212_v53  ;;  %v870_v58 = vsub.f32 %v9200_v48, %v9212_v53 }
  0x3c   :  { %325 = vmatprep.subr.mxu0 %v8962_v24  ;;  %239 = vmatpush1.msra.mxu1 %v238_v62  ;;  %v9136_v24 = vand.u32 4294901760, %v9127_v20  ;;  %v9238_v62 = vld [vmem:[#allocation7 + $0x18] sm:$0xff] }
  0x3d   :  { %328 = vmatpush1.msra.mxu0 %v8970_v28  ;;  %274 = vmatmul.mubr.f32.vlgmr.msra.gmra.mxu1 %v8967_v27 }
  0x3e   :  { %331 = vmatprep.subr.mxu0 %v229_v50  ;;  %409 = vmatprep.subr.mxu1 %v8930_v4  ;;  %v9206_v50 = vld [vmem:[#allocation7 + $0x28] sm:$0xff] }
  0x3f   :  { %334 = vmatpush1.msra.mxu0 %v235_v51  ;;  %367 = vmatprep.mubr.f32.mxu0 %v11182_v0  ;;  %v9215_v54 = vand.u32 4294901760, %v9206_v50 }
  0x40   :  { %411 = vmatpush1.msra.mxu1 %v8932_v5  ;;  %370 = vmatmul.mubr.f32.vlgmr.msra.gmra.mxu0 %v8985_v35 }
  0x41   :  { %413 = vmatprep.subr.mxu1 %v8934_v6  ;;  %502 = vmatprep.subr.mxu0 %v194_v25  ;;  %v9140_v25 = vsub.f32 %v9111_v14, %v9125_v19  ;;  %v9229_v59 = vsub.f32 %v9206_v50, %v9215_v54 }
  0x42   :  { %279 = vmatprep.mubr.f32.mxu1 %v11182_v0  ;;  %415 = vmatpush1.msra.mxu1 %v8936_v10 }
  0x43   :  { %506 = vmatpush1.msra.mxu0 %v200_v26  ;;  %281 = vmatmul.mubr.f32.gmra.mxu1 %v8998_v40  ;;  %v9142_v26 = vld [vmem:[#allocation7 + $0x48] sm:$0xff] }
  0x44   :  { %417 = vmatprep.subr.mxu1 %v8938_v11  ;;  %510 = vmatprep.subr.mxu0 %v206_v29  ;;  %v9149_v29 = vsub.f32 %v9127_v20, %v9136_v24 }
  0x45   :  { %375 = vmatprep.mubr.f32.mxu0 %v11182_v0  ;;  %419 = vmatpush1.msra.mxu1 %v8940_v12 }
  0x46   :  { %514 = vmatpush1.msra.mxu0 %v212_v30  ;;  %421 = vmatprep.subr.mxu1 %v8943_v16  ;;  %v9152_v30 = vand.u32 4294901760, %v9142_v26  ;;  %v9162_v34 = vand.u32 4294901760, %v9149_v29 }
  0x47   :  { %378 = vmatmul.mubr.f32.gmra.mxu0 %v9007_v47  ;;  %518 = vmatprep.subr.mxu0 %v218_v31  ;;  %v9156_v31 = vand.u32 4294901760, %v9140_v25 }
  0x48   :  { %423 = vmatpush1.msra.mxu1 %v8948_v18  ;;  %456 = vmatprep.mubr.f32.mxu1 %v11182_v0  ;;  %11387 = vst [vmem:[#allocation15_spill] sm:$0xff] %v9162_v34  ;;  %v9166_v35 = vsub.f32 %v9142_v26, %v9152_v30  ;;  %v849_v39 = vsub.f32 %v9149_v29, %v9162_v34 }
  0x49   :  { %522 = vmatpush1.msra.mxu0 %v224_v36  ;;  %460 = vmatmul.mubr.f32.vlgmr.msra.gmra.mxu1 %v148_v43  ;;  %11386 = vst [vmem:[#allocation14_spill] sm:$0xff] %v9156_v31  ;;  %v9169_v36 = vand.u32 4294901760, %v9158_v32  ;;  %v842_v37 = vsub.f32 %v9140_v25, %v9156_v31 }
  0x4a   :  { %526 = vmatprep.subr.mxu0 %v230_v55  ;;  %603 = vmatprep.subr.mxu1 %v8930_v4  ;;  %v9078_v4 = vand.u32 4294901760, %v9071_v2  ;;  %v850_v45 = vand.u32 4294901760, %v849_v39  ;;  %v9220_v55 = vsub.f32 %v9190_v44, %v9204_v49 }
  0x4b   :  { %530 = vmatpush1.msra.mxu0 %v236_v56  ;;  %563 = vmatprep.mubr.f32.mxu0 %v11182_v0  ;;  %v9184_v41 = vsub.f32 %v9158_v32, %v9169_v36  ;;  %v843_v43 = vand.u32 4294901760, %v842_v37  ;;  %v9222_v56 = vld [vmem:[#allocation7 + $0x20] sm:$0xff] }
  0x4c   :  { %605 = vmatpush1.msra.mxu1 %v8932_v5  ;;  %565 = vmatmul.mubr.f32.vlgmr.msra.gmra.mxu0 %v8967_v27  ;;  %v9081_v5 = vld [vmem:[#allocation7 + $0x68] sm:$0xff]  ;;  %v9089_v7 = vsub.f32 %v9071_v2, %v9078_v4  ;;  %v9232_v60 = vand.u32 4294901760, %v9222_v56  ;;  %v9236_v61 = vand.u32 4294901760, %v9220_v55 }
  0x4d   :  { %607 = vmatprep.subr.mxu1 %v8934_v6  ;;  %465 = vmatprep.mubr.f32.mxu1 %v11182_v0  ;;  %v9085_v6 = vand.u32 4294901760, %v9075_v3  ;;  %v9092_v8 = vand.u32 4294901760, %v9081_v5  ;;  %v9196_v47 = vand.u32 4294901760, %v9184_v41 }
  0x4e   :  { %609 = vmatpush1.msra.mxu1 %v8936_v10  ;;  %570 = vmatprep.mubr.f32.mxu0 %v11182_v0  ;;  %11391 = vst [vmem:[#allocation19_spill] sm:$0xff] %v9236_v61 }
  0x4f   :  { %469 = vmatmul.mubr.f32.gmra.mxu1 %v159_v52  ;;  %611 = vmatprep.subr.mxu1 %v8938_v11  ;;  %v814_v10 = vsub.f32 %v9075_v3, %v9085_v6  ;;  %v9101_v11 = vand.u32 4294901760, %v9089_v7  ;;  %11389 = vst [vmem:[#allocation17_spill] sm:$0xff] %v9196_v47  ;;  %v863_v52 = vsub.f32 %v9184_v41, %v9196_v47 }
  0x50   :  { %613 = vmatpush1.msra.mxu1 %v8940_v12  ;;  %572 = vmatmul.mubr.f32.gmra.mxu0 %v8998_v40  ;;  %v9105_v12 = vsub.f32 %v9081_v5, %v9092_v8 }
  0x51   :  { %615 = vmatprep.subr.mxu1 %v8943_v16  ;;  %650 = vmatprep.mubr.f32.mxu1 %v11182_v0  ;;  %v815_v15 = vand.u32 4294901760, %v814_v10  ;;  %v821_v16 = vsub.f32 %v9089_v7, %v9101_v11  ;;  %v864_v57 = vand.u32 4294901760, %v863_v52  ;;  %v871_v10 = vand.u32 4294901760, %v870_v58 }
  0x52   :  { %617 = vmatpush1.msra.mxu1 %v8948_v18  ;;  %7363 = vmatprep.subr.mxu0 %v9069_v1  ;;  %v9117_v17 = vand.u32 4294901760, %v9105_v12  ;;  %v9121_v18 = vsub.f32 %v9095_v9, %v9108_v13 }
  0x53   :  { %652 = vmatmul.mubr.f32.vlgmr.msra.gmra.mxu1 %v8967_v27  ;;  %7364 = vmatpush3.msra.mxu0 %v9069_v1  ;;  %v822_v21 = vand.u32 4294901760, %v821_v16  ;;  %v9246_v16 = vsub.f32 %v9222_v56, %v9232_v60 }
  0x54   :  { %657 = vmatprep.mubr.f32.mxu1 %v11182_v0  ;;  %7365 = vmatprep.subr.mxu0 %v9078_v4  ;;  %11384 = vst [vmem:[#allocation12_spill] sm:$0xff] %v9117_v17  ;;  %v828_v22 = vsub.f32 %v9105_v12, %v9117_v17  ;;  %v9133_v23 = vand.u32 4294901760, %v9121_v18 }
  0x55   :  { %7366 = vmatpush3.msra.mxu0 %v9078_v4  ;;  %7398 = vmatprep.subr.mxu1 %v815_v15 }
  0x56   :  { %7367 = vmatprep.subr.mxu0 %v9092_v8  ;;  %11385 = vst [vmem:[#allocation13_spill] sm:$0xff] %v9133_v23  ;;  %7399 = vmatpush3.msra.mxu1 %v815_v15  ;;  %v829_v27 = vand.u32 4294901760, %v828_v22  ;;  %v835_v28 = vsub.f32 %v9121_v18, %v9133_v23  ;;  %v9242_v15 = vand.u32 4294901760, %v9229_v59  ;;  %v877_v22 = vsub.f32 %v9220_v55, %v9236_v61 }
  0x57   :  { %659 = vmatmul.mubr.f32.gmra.mxu1 %v8998_v40  ;;  %7368 = vmatpush3.msra.mxu0 %v9092_v8  ;;  %v9180_v40 = vand.u32 4294901760, %v9166_v35 }
  0x58   :  { %7369 = vmatprep.subr.mxu0 %v9108_v13  ;;  %7400 = vmatprep.subr.mxu1 %v822_v21  ;;  %v836_v33 = vand.u32 4294901760, %v835_v28  ;;  %11392 = vst [vmem:[#allocation20_spill] sm:$0xff] %v9242_v15  ;;  %v884_v28 = vsub.f32 %v9229_v59, %v9242_v15 }
  0x59   :  { %7370 = vmatpush3.msra.mxu0 %v9108_v13  ;;  %7401 = vmatpush3.msra.mxu1 %v822_v21  ;;  %11388 = vst [vmem:[#allocation16_spill] sm:$0xff] %v9180_v40  ;;  %v856_v46 = vsub.f32 %v9166_v35, %v9180_v40  ;;  %v9249_v21 = vand.u32 4294901760, %v9238_v62 }
  0x5a   :  { %7371 = vmatprep.subr.mxu0 %v9125_v19  ;;  %7402 = vmatprep.subr.mxu1 %v829_v27 }
  0x5b   :  { %7372 = vmatpush3.msra.mxu0 %v9125_v19  ;;  %7403 = vmatpush3.msra.mxu1 %v829_v27  ;;  %v857_v51 = vand.u32 4294901760, %v856_v46  ;;  %v9254_v27 = vld [vmem:[#allocation7 + $0x10] sm:$0xff]  ;;  %v9264_v37 = vsub.f32 %v9238_v62, %v9249_v21  ;;  %v885_v46 = vand.u32 4294901760, %v884_v28 }
  0x5c   :  { %7373 = vmatprep.subr.mxu0 %v9136_v24  ;;  %7404 = vmatprep.subr.mxu1 %v836_v33  ;;  %v9267_v39 = vand.u32 4294901760, %v9254_v27 }
  0x5d   :  { %7374 = vmatpush3.msra.mxu0 %v9136_v24  ;;  %7405 = vmatpush3.msra.mxu1 %v836_v33  ;;  %v9260_v33 = vand.u32 4294901760, %v9246_v16  ;;  %v9276_v52 = vand.u32 4294901760, %v9264_v37 }
  0x5e   :  { %7375 = vmatprep.subr.mxu0 %v9152_v30  ;;  %7406 = vmatprep.subr.mxu1 %v843_v43 }
  0x5f   :  { %7376 = vmatpush3.msra.mxu0 %v9152_v30  ;;  %7407 = vmatpush3.msra.mxu1 %v843_v43  ;;  %11393 = vst [vmem:[#allocation21_spill] sm:$0xff] %v9260_v33  ;;  %v878_v43 = vand.u32 4294901760, %v877_v22  ;;  %11394 = vst [vmem:[#allocation22_spill] sm:$0xff] %v9276_v52  ;;  %v9286_v22 = vld [vmem:[#allocation7] sm:$0xff]  ;;  %v898_v28 = vsub.f32 %v9264_v37, %v9276_v52 }
  0x60   :  { %7377 = vmatprep.subr.mxu0 %v9169_v36  ;;  %7408 = vmatprep.subr.mxu1 %v850_v45 }
  0x61   :  { %7378 = vmatpush3.msra.mxu0 %v9169_v36  ;;  %7409 = vmatpush3.msra.mxu1 %v850_v45  ;;  %v9270_v45 = vld [vmem:[#allocation7 + $0x8] sm:$0xff] }
  0x62   :  { %7379 = vmatprep.subr.mxu0 %v9187_v42  ;;  %7410 = vmatprep.subr.mxu1 %v857_v51  ;;  %v9284_v58 = vand.u32 4294901760, %v9270_v45 }
  0x63   :  { %7380 = vmatpush3.msra.mxu0 %v9187_v42  ;;  %7411 = vmatpush3.msra.mxu1 %v857_v51  ;;  %v891_v51 = vsub.f32 %v9246_v16, %v9260_v33  ;;  %v9295_v33 = vand.u32 4294901760, %v9286_v22 }
  0x64   :  { %7381 = vmatprep.subr.mxu0 %v9204_v49  ;;  %7412 = vmatprep.subr.mxu1 %v864_v57  ;;  %v9300_v15 = vsub.f32 %v9270_v45, %v9284_v58 }
  0x65   :  { %7382 = vmatpush3.msra.mxu0 %v9204_v49  ;;  %7413 = vmatpush3.msra.mxu1 %v864_v57  ;;  %v9280_v57 = vsub.f32 %v9254_v27, %v9267_v39  ;;  %v9307_v52 = vsub.f32 %v9286_v22, %v9295_v33 }
  0x66   :  { %7383 = vmatprep.subr.mxu0 %v9215_v54  ;;  %7414 = vmatprep.subr.mxu1 %v871_v10  ;;  %v9311_v61 = vand.u32 4294901760, %v9300_v15 }
  0x67   :  { %7384 = vmatpush3.msra.mxu0 %v9215_v54  ;;  %7415 = vmatpush3.msra.mxu1 %v871_v10  ;;  %v892_v10 = vand.u32 4294901760, %v891_v51  ;;  %v9292_v0 = vand.u32 4294901760, %v9280_v57 }
  0x68   :  { %7385 = vmatprep.subr.mxu0 %v9232_v60  ;;  %7416 = vmatprep.subr.mxu1 %v878_v43  ;;  %11396 = vst [vmem:[#allocation24_spill] sm:$0xff] %v9311_v61 }
  0x69   :  { %7386 = vmatpush3.msra.mxu0 %v9232_v60  ;;  %7417 = vmatpush3.msra.mxu1 %v878_v43  ;;  %11395 = vst [vmem:[#allocation23_spill] sm:$0xff] %v9292_v0  ;;  %v899_v43 = vand.u32 4294901760, %v898_v28  ;;  %v905_v51 = vsub.f32 %v9280_v57, %v9292_v0  ;;  %v912_v28 = vsub.f32 %v9300_v15, %v9311_v61 }
  0x6a   :  { %7387 = vmatprep.subr.mxu0 %v9249_v21  ;;  %7418 = vmatprep.subr.mxu1 %v885_v46 }
  0x6b   :  { %7388 = vmatpush3.msra.mxu0 %v9249_v21  ;;  %7419 = vmatpush3.msra.mxu1 %v885_v46  ;;  %v906_v53 = vand.u32 4294901760, %v905_v51  ;;  %v9315_v46 = vand.u32 4294901760, %v9307_v52  ;;  %v913_v47 = vand.u32 4294901760, %v912_v28 }
  0x6c   :  { %7389 = vmatprep.subr.mxu0 %v9267_v39  ;;  %7420 = vmatprep.subr.mxu1 %v892_v10 }
  0x6d   :  { %7390 = vmatpush3.msra.mxu0 %v9267_v39  ;;  %7421 = vmatpush3.msra.mxu1 %v892_v10  ;;  %11397 = vst [vmem:[#allocation25_spill] sm:$0xff] %v9315_v46  ;;  %v919_v0 = vsub.f32 %v9307_v52, %v9315_v46 }
  0x6e   :  { %7391 = vmatprep.subr.mxu0 %v9284_v58  ;;  %7422 = vmatprep.subr.mxu1 %v899_v43 }
  0x6f   :  { %7392 = vmatpush3.msra.mxu0 %v9284_v58  ;;  %7423 = vmatpush3.msra.mxu1 %v899_v43  ;;  %v920_v10 = vand.u32 4294901760, %v919_v0 }
  0x70   :  { %7393 = vmatprep.subr.mxu0 %v9295_v33  ;;  %7424 = vmatprep.subr.mxu1 %v906_v53 }
  0x71   :  { %7394 = vmatpush3.msra.mxu0 %v9295_v33  ;;  %7425 = vmatpush3.msra.mxu1 %v906_v53 }
  0x72   :  { %7433 = vmatprep.subr.mxu0 %v9075_v3  ;;  %7426 = vmatprep.subr.mxu1 %v913_v47 }
  0x73   :  { %7427 = vmatpush3.msra.mxu1 %v913_v47  ;;  %1501 = vrot.lane.b32.xlu1 %v9081_v5, %s8889_s0 }
  0x74   :  { %7428 = vmatprep.subr.mxu1 %v920_v10  ;;  %1493 = vrot.lane.b32.xlu0 %v9142_v26, %s8889_s0 }
  0x75   :  { %7429 = vmatpush3.msra.mxu1 %v920_v10 }
  0x76   :  { %7468 = vmatprep.subr.mxu1 %v9069_v1 }
  0x77   :  { %1499 = vrot.lane.b32.xlu1 %v9095_v9, %s8889_s0 }
  0x78   :  { %1489 = vrot.lane.b32.xlu0 %v9174_v38, %s8889_s0 }
  0x7b   :  { %1495 = vrot.lane.b32.xlu1 %v9127_v20, %s8889_s0 }
  0x7c   :  { %1485 = vrot.lane.b32.xlu0 %v9206_v50, %s8889_s0 }
  0x7f   :  { %1491 = vrot.lane.b32.xlu1 %v9158_v32, %s8889_s0 }
  0x80   :  { %1481 = vrot.lane.b32.xlu0 %v9238_v62, %s8889_s0 }
  0x83   :  { %1487 = vrot.lane.b32.xlu1 %v9190_v44, %s8889_s0 }
  0x84   :  { %1477 = vrot.lane.b32.xlu0 %v9270_v45, %s8889_s0 }
  0x87   :  { %1483 = vrot.lane.b32.xlu1 %v9222_v56, %s8889_s0 }
  0x8b   :  { %1479 = vrot.lane.b32.xlu1 %v9254_v27, %s8889_s0 }
  0x8f   :  { %1475 = vrot.lane.b32.xlu1 %v9286_v22, %s8889_s0 }
  0xf7   :  { %v152_v51 = vpop.f32.mrf.mxu0 }
  0xf9   :  { %v154_v40 = vpop.f32.mrf.mxu0 }
  0xfb   :  { %v163_v34 = vpop.f32.mrf.mxu0 }
  0xfd   :  { %v165_v61 = vpop.f32.mrf.mxu0  ;;  %v275_v31 = vpop.f32.mrf.mxu1 }
  0xff   :  { %v277_v53 = vpop.f32.mrf.mxu1 }
 0x100   :  { %v278_v0 = vadd.f32 %v277_v53, %v154_v40  ;;  %v371_v43 = vpop.f32.mrf.mxu0  ;;  %v276_v40 = vadd.f32 %v275_v31, %v152_v51 }
 0x102   :  { %v373_v47 = vpop.f32.mrf.mxu0 }
 0x103   :  { %v282_v28 = vpop.f32.mrf.mxu1  ;;  %v374_v10 = vadd.f32 %v373_v47, %v278_v0  ;;  %v372_v0 = vadd.f32 %v371_v43, %v276_v40 }
 0x104   :  { %v283_v47 = vadd.f32 %v282_v28, %v163_v34 }
 0x105   :  { %v284_v46 = vpop.f32.mrf.mxu1 }
 0x106   :  { %v285_v63 = vadd.f32 %v284_v46, %v165_v61 }
 0x107   :  { %v379_v5 = vpop.f32.mrf.mxu0 }
 0x108   :  { %v380_v26 = vadd.f32 %v379_v5, %v283_v47 }
 0x109   :  { %v381_v53 = vpop.f32.mrf.mxu0  ;;  %v461_v23 = vpop.f32.mrf.mxu1 }
 0x10a   :  { %v382_v2 = vadd.f32 %v381_v53, %v285_v63  ;;  %v462_v20 = vadd.f32 %v461_v23, %v372_v0 }
 0x10b   :  { %v463_v9 = vpop.f32.mrf.mxu1 }
 0x10c   :  { %v464_v17 = vadd.f32 %v463_v9, %v374_v10  ;;  %v566_v14 = vpop.f32.mrf.mxu0 }
 0x10d   :  { %v567_v32 = vadd.f32 %v566_v14, %v462_v20 }
 0x10e   :  { %v568_v31 = vpop.f32.mrf.mxu0 }
 0x10f   :  { %v470_v61 = vpop.f32.mrf.mxu1  ;;  %v569_v46 = vadd.f32 %v568_v31, %v464_v17 }
 0x110   :  { %v471_v34 = vadd.f32 %v470_v61, %v380_v26  ;;  %v573_v38 = vpop.f32.mrf.mxu0 }
 0x111   :  { %v472_v51 = vpop.f32.mrf.mxu1 }
 0x112   :  { %v9348_v43 = vadd.f32 %v472_v51, %v382_v2  ;;  %v574_v17 = vadd.f32 %v573_v38, %v471_v34 }
 0x113   :  { %v653_v28 = vpop.f32.mrf.mxu1 }
 0x114   :  { %11398 = vst [vmem:[#allocation26_spill] sm:$0xff] %v9348_v43  ;;  %v654_v10 = vadd.f32 %v653_v28, %v567_v32  ;;  %v11421_v28 = vld [vmem:[#allocation21_spill] sm:$0xff] }
 0x115   :  { %v655_v44 = vpop.f32.mrf.mxu1 }
 0x116   :  { %v6674_v23 = vmul.f32 -1.442695, %v654_v10  ;;  %v9354_v50 = vadd.f32 %v655_v44, %v569_v46 }
 0x117   :  { %v660_v63 = vpop.f32.mrf.mxu1 }
 0x118   :  { %11399 = vst [vmem:[#allocation27_spill] sm:$0xff] %v9354_v50  ;;  %8755 = vpow2.f32 %v6674_v23  ;;  %v661_v56 = vadd.f32 %v660_v63, %v574_v17  ;;  %v11424_v23 = vld [vmem:[#allocation22_spill] sm:$0xff] }
 0x11a   :  { %v6676_v5 = vmul.f32 -1.442695, %v661_v56 }
 0x11c   :  { %8757 = vpow2.f32 %v6676_v5 }
 0x125   :  { %v8756_v40 = vpop.eup %8755 }
 0x126   :  { %v677_v62 = vadd.f32 1.0, %v8756_v40 }
 0x128   :  { %8759 = vrcp.f32 %v677_v62 }
 0x129   :  { %v8758_v53 = vpop.eup %8757 }
 0x12a   :  { %v679_v27 = vadd.f32 1.0, %v8758_v53 }
 0x12c   :  { %8761 = vrcp.f32 %v679_v27 }
 0x135   :  { %v8760_v2 = vpop.eup %8759 }
 0x136   :  { %v689_v9 = vmul.f32 %v8760_v2, %v654_v10  ;;  %v11431_v2 = vld [vmem:[#allocation24_spill] sm:$0xff] }
 0x138   :  { %v9360_v0 = vand.u32 4294901760, %v689_v9 }
 0x139   :  { %v8762_v47 = vpop.eup %8761 }
 0x13a   :  { %v791_v14 = vsub.f32 %v689_v9, %v9360_v0  ;;  %v691_v20 = vmul.f32 %v8762_v47, %v661_v56  ;;  %7430 = vmatprep.mubr.f32.mxu1 %v9360_v0 }
 0x13c   :  { %v9364_v45 = vand.u32 4294901760, %v691_v20  ;;  %v792_v22 = vand.u32 4294901760, %v791_v14 }
 0x13e   :  { %v9367_v31 = vsub.f32 %v691_v20, %v9364_v45  ;;  %7431 = vmatmul.mubr.f32.vlgmr.msra.gmra.mxu1 %v9364_v45  ;;  %v793_v61 = vsub.f32 %v791_v14, %v792_v22 }
 0x13f   :  { %7469 = vmatpush3.msra.mxu1 %v9069_v1  ;;  %7500 = vmatprep.mubr.f32.mxu1 %v792_v22 }
 0x140   :  { %v802_v46 = vand.u32 4294901760, %v9367_v31  ;;  %7470 = vmatprep.subr.mxu1 %v9078_v4  ;;  %v794_v26 = vand.u32 4294901760, %v793_v61 }
 0x141   :  { %7471 = vmatpush3.msra.mxu1 %v9078_v4 }
 0x142   :  { %v803_v51 = vsub.f32 %v9367_v31, %v802_v46  ;;  %7472 = vmatprep.subr.mxu1 %v9092_v8  ;;  %7395 = vmatprep.mubr.f32.mxu0 %v794_v26 }
 0x143   :  { %7473 = vmatpush3.msra.mxu1 %v9092_v8 }
 0x144   :  { %v804_v32 = vand.u32 4294901760, %v803_v51  ;;  %7474 = vmatprep.subr.mxu1 %v9108_v13 }
 0x145   :  { %7475 = vmatpush3.msra.mxu1 %v9108_v13 }
 0x146   :  { %7476 = vmatprep.subr.mxu1 %v9125_v19  ;;  %7396 = vmatmul.mubr.f32.vlgmr.msra.gmra.mxu0 %v804_v32 }
 0x147   :  { %7434 = vmatpush3.msra.mxu0 %v9075_v3  ;;  %7477 = vmatpush3.msra.mxu1 %v9125_v19  ;;  %v11401_v3 = vld [vmem:[#allocation13_spill] sm:$0xff] }
 0x148   :  { %7435 = vmatprep.subr.mxu0 %v9089_v7  ;;  %7465 = vmatprep.mubr.f32.mxu0 %v791_v14  ;;  %v11434_v14 = vld [vmem:[#allocation25_spill] sm:$0xff] }
 0x149   :  { %7478 = vmatprep.subr.mxu1 %v9136_v24  ;;  %7436 = vmatpush3.msra.mxu0 %v9089_v7  ;;  %v11402_v7 = vld [vmem:[#allocation14_spill] sm:$0xff] }
 0x14a   :  { %7479 = vmatpush3.msra.mxu1 %v9136_v24  ;;  %7437 = vmatprep.subr.mxu0 %v9105_v12 }
 0x14b   :  { %7480 = vmatprep.subr.mxu1 %v9152_v30  ;;  %7438 = vmatpush3.msra.mxu0 %v9105_v12  ;;  %v11404_v12 = vld [vmem:[#allocation15_spill] sm:$0xff] }
 0x14c   :  { %7481 = vmatpush3.msra.mxu1 %v9152_v30  ;;  %7439 = vmatprep.subr.mxu0 %v9121_v18 }
 0x14d   :  { %7482 = vmatprep.subr.mxu1 %v9169_v36  ;;  %7440 = vmatpush3.msra.mxu0 %v9121_v18 }
 0x14e   :  { %7483 = vmatpush3.msra.mxu1 %v9169_v36  ;;  %7441 = vmatprep.subr.mxu0 %v9140_v25 }
 0x14f   :  { %7484 = vmatprep.subr.mxu1 %v9187_v42  ;;  %7442 = vmatpush3.msra.mxu0 %v9140_v25  ;;  %v11406_v25 = vld [vmem:[#allocation16_spill] sm:$0xff] }
 0x150   :  { %7485 = vmatpush3.msra.mxu1 %v9187_v42  ;;  %7443 = vmatprep.subr.mxu0 %v9149_v29 }
 0x151   :  { %7486 = vmatprep.subr.mxu1 %v9204_v49  ;;  %7444 = vmatpush3.msra.mxu0 %v9149_v29 }
 0x152   :  { %7487 = vmatpush3.msra.mxu1 %v9204_v49  ;;  %7445 = vmatprep.subr.mxu0 %v9166_v35 }
 0x153   :  { %7488 = vmatprep.subr.mxu1 %v9215_v54  ;;  %7446 = vmatpush3.msra.mxu0 %v9166_v35 }
 0x154   :  { %7489 = vmatpush3.msra.mxu1 %v9215_v54  ;;  %7447 = vmatprep.subr.mxu0 %v9184_v41 }
 0x155   :  { %7490 = vmatprep.subr.mxu1 %v9232_v60  ;;  %7448 = vmatpush3.msra.mxu0 %v9184_v41  ;;  %v11409_v41 = vld [vmem:[#allocation17_spill] sm:$0xff] }
 0x156   :  { %7491 = vmatpush3.msra.mxu1 %v9232_v60  ;;  %7449 = vmatprep.subr.mxu0 %v9200_v48 }
 0x157   :  { %7492 = vmatprep.subr.mxu1 %v9249_v21  ;;  %7450 = vmatpush3.msra.mxu0 %v9200_v48 }
 0x158   :  { %7493 = vmatpush3.msra.mxu1 %v9249_v21  ;;  %7451 = vmatprep.subr.mxu0 %v9220_v55 }
 0x159   :  { %7494 = vmatprep.subr.mxu1 %v9267_v39  ;;  %7452 = vmatpush3.msra.mxu0 %v9220_v55  ;;  %v11412_v55 = vld [vmem:[#allocation18_spill] sm:$0xff] }
 0x15a   :  { %7495 = vmatpush3.msra.mxu1 %v9267_v39  ;;  %7453 = vmatprep.subr.mxu0 %v9229_v59 }
 0x15b   :  { %7496 = vmatprep.subr.mxu1 %v9284_v58  ;;  %7454 = vmatpush3.msra.mxu0 %v9229_v59 }
 0x15c   :  { %7497 = vmatpush3.msra.mxu1 %v9284_v58  ;;  %7455 = vmatprep.subr.mxu0 %v9246_v16 }
 0x15d   :  { %7498 = vmatprep.subr.mxu1 %v9295_v33  ;;  %7456 = vmatpush3.msra.mxu0 %v9246_v16 }
 0x15e   :  { %7499 = vmatpush3.msra.mxu1 %v9295_v33  ;;  %7457 = vmatprep.subr.mxu0 %v9264_v37 }
 0x15f   :  { %7501 = vmatmul.mubr.f32.vlgmr.msra.gmra.mxu1 %v802_v46  ;;  %7538 = vmatprep.subr.mxu1 %v9069_v1 }
 0x160   :  { %7458 = vmatpush3.msra.mxu0 %v9264_v37  ;;  %7539 = vmatpush3.msra.mxu1 %v9069_v1  ;;  %v11400_v1 = vld [vmem:[#allocation12_spill] sm:$0xff]  ;;  %v11416_v37 = vld [vmem:[#allocation19_spill] sm:$0xff] }
 0x161   :  { %7570 = vmatprep.mubr.f32.mxu1 %v9360_v0  ;;  %7459 = vmatprep.subr.mxu0 %v9280_v57 }
 0x162   :  { %7540 = vmatprep.subr.mxu1 %v9078_v4  ;;  %7460 = vmatpush3.msra.mxu0 %v9280_v57  ;;  %v11418_v57 = vld [vmem:[#allocation20_spill] sm:$0xff] }
 0x163   :  { %7541 = vmatpush3.msra.mxu1 %v9078_v4  ;;  %7461 = vmatprep.subr.mxu0 %v9300_v15  ;;  %v1506_v4 = vpop.permute.xlu0 %1505 }
 0x164   :  { %7542 = vmatprep.subr.mxu1 %v9092_v8  ;;  %7462 = vmatpush3.msra.mxu0 %v9300_v15 }
 0x165   :  { %7543 = vmatpush3.msra.mxu1 %v9092_v8  ;;  %7463 = vmatprep.subr.mxu0 %v9307_v52  ;;  %v1544_v8 = vsel %vm1507_vm1, %v1506_v4, 0 }
 0x166   :  { %7544 = vmatprep.subr.mxu1 %v9108_v13  ;;  %7464 = vmatpush3.msra.mxu0 %v9307_v52 }
 0x167   :  { %7545 = vmatpush3.msra.mxu1 %v9108_v13  ;;  %7466 = vmatmul.mubr.f32.vlgmr.msra.gmra.mxu0 %v9367_v31 }
 0x168   :  { %7503 = vmatprep.subr.mxu0 %v9085_v6  ;;  %7546 = vmatprep.subr.mxu1 %v9125_v19 }
 0x169   :  { %7504 = vmatpush3.msra.mxu0 %v9085_v6  ;;  %7535 = vmatprep.mubr.f32.mxu0 %v9360_v0  ;;  %v1502_v6 = vpop.permute.xlu1 %1501 }
 0x16a   :  { %7547 = vmatpush3.msra.mxu1 %v9125_v19  ;;  %7505 = vmatprep.subr.mxu0 %v9101_v11  ;;  %v1540_v13 = vsel %vm1507_vm1, %v1502_v6, 0  ;;  %v1504_v19 = vpop.permute.xlu0 %1503 }
 0x16b   :  { %7548 = vmatprep.subr.mxu1 %v9136_v24  ;;  %7506 = vmatpush3.msra.mxu0 %v9101_v11  ;;  %v9465_v11 = vand.u32 4294901760, %v1544_v8  ;;  %v1542_v29 = vsel %vm1507_vm1, %v1504_v19, 0  ;;  %v9482_v35 = vand.u32 4294901760, %v1540_v13 }
 0x16c   :  { %7549 = vmatpush3.msra.mxu1 %v9136_v24  ;;  %7507 = vmatprep.subr.mxu0 %v11400_v1 }
 0x16d   :  { %7550 = vmatprep.subr.mxu1 %v9152_v30  ;;  %7508 = vmatpush3.msra.mxu0 %v11400_v1  ;;  %11403 = vst [vmem:[#allocation12_spill] sm:$0xff] %v9465_v11  ;;  %v9473_v18 = vsub.f32 %v1544_v8, %v9465_v11  ;;  %v1500_v24 = vpop.permute.xlu1 %1499  ;;  %11408 = vst [vmem:[#allocation15_spill] sm:$0xff] %v9482_v35  ;;  %v9506_v16 = vsub.f32 %v1540_v13, %v9482_v35 }
 0x16e   :  { %7551 = vmatpush3.msra.mxu1 %v9152_v30  ;;  %7509 = vmatprep.subr.mxu0 %v11401_v3  ;;  %v9480_v30 = vand.u32 4294901760, %v1542_v29 }
 0x16f   :  { %7552 = vmatprep.subr.mxu1 %v9169_v36  ;;  %7510 = vmatpush3.msra.mxu0 %v11401_v3  ;;  %11405 = vst [vmem:[#allocation13_spill] sm:$0xff] %v9473_v18  ;;  %11415 = vst [vmem:[#allocation29_spill] sm:$0xff] %v9506_v16  ;;  %v9526_v38 = vand.u32 4294901760, %v9506_v16 }
 0x170   :  { %7553 = vmatpush3.msra.mxu1 %v9169_v36  ;;  %7511 = vmatprep.subr.mxu0 %v11402_v7  ;;  %11407 = vst [vmem:[#allocation14_spill] sm:$0xff] %v9480_v30  ;;  %v1538_v36 = vsel %vm1507_vm1, %v1500_v24, 0  ;;  %v9493_v48 = vsub.f32 %v1542_v29, %v9480_v30 }
 0x171   :  { %7554 = vmatprep.subr.mxu1 %v9187_v42  ;;  %7512 = vmatpush3.msra.mxu0 %v11402_v7  ;;  %v9497_v59 = vand.u32 4294901760, %v1538_v36  ;;  %11420 = vst [vmem:[#allocation30_spill] sm:$0xff] %v9526_v38  ;;  %v1496_v10 = vpop.permute.xlu1 %1495  ;;  %v1665_v40 = vsub.f32 %v9506_v16, %v9526_v38 }
 0x172   :  { %7555 = vmatpush3.msra.mxu1 %v9187_v42  ;;  %7513 = vmatprep.subr.mxu0 %v11404_v12  ;;  %v9488_v42 = vand.u32 4294901760, %v9473_v18  ;;  %11411 = vst [vmem:[#allocation17_spill] sm:$0xff] %v9493_v48  ;;  %v9503_v15 = vand.u32 4294901760, %v9493_v48  ;;  %v1534_v17 = vsel %vm1507_vm1, %v1496_v10, 0 }
 0x173   :  { %7556 = vmatprep.subr.mxu1 %v9204_v49  ;;  %7514 = vmatpush3.msra.mxu0 %v11404_v12  ;;  %11413 = vst [vmem:[#allocation18_spill] sm:$0xff] %v9497_v59  ;;  %v9519_v34 = vsub.f32 %v1538_v36, %v9497_v59  ;;  %v9545_v56 = vand.u32 4294901760, %v1534_v17  ;;  %v9569_v47 = vand.u32 4294901760, %v1665_v40 }
 0x174   :  { %7557 = vmatpush3.msra.mxu1 %v9204_v49  ;;  %7515 = vmatprep.subr.mxu0 %v11406_v25  ;;  %11410 = vst [vmem:[#allocation16_spill] sm:$0xff] %v9488_v42  ;;  %v1498_v49 = vpop.permute.xlu0 %1497  ;;  %11414 = vst [vmem:[#allocation28_spill] sm:$0xff] %v9503_v15 }
 0x175   :  { %7558 = vmatprep.subr.mxu1 %v9215_v54  ;;  %7516 = vmatpush3.msra.mxu0 %v11406_v25  ;;  %11419 = vst [vmem:[#allocation20_spill] sm:$0xff] %v9519_v34  ;;  %11427 = vst [vmem:[#allocation33_spill] sm:$0xff] %v9545_v56  ;;  %v9564_v9 = vsub.f32 %v1534_v17, %v9545_v56  ;;  %v1492_v22 = vpop.permute.xlu1 %1491 }
 0x176   :  { %7559 = vmatpush3.msra.mxu1 %v9215_v54  ;;  %7517 = vmatprep.subr.mxu0 %v11409_v41  ;;  %v1536_v54 = vsel %vm1507_vm1, %v1498_v49, 0  ;;  %11433 = vst [vmem:[#allocation35_spill] sm:$0xff] %v9569_v47  ;;  %v1530_v26 = vsel %vm1507_vm1, %v1492_v22, 0 }
 0x177   :  { %7560 = vmatprep.subr.mxu1 %v9232_v60  ;;  %7518 = vmatpush3.msra.mxu0 %v11409_v41  ;;  %v9514_v52 = vand.u32 4294901760, %v1536_v54  ;;  %11432 = vst [vmem:[#allocation24_spill] sm:$0xff] %v9564_v9  ;;  %v9582_v61 = vand.u32 4294901760, %v9564_v9  ;;  %v9589_v51 = vand.u32 4294901760, %v1530_v26 }
 0x178   :  { %7561 = vmatpush3.msra.mxu1 %v9232_v60  ;;  %7519 = vmatprep.subr.mxu0 %v11412_v55  ;;  %v1651_v60 = vsub.f32 %v9473_v18, %v9488_v42  ;;  %v1494_v5 = vpop.permute.xlu0 %1493 }
 0x179   :  { %7562 = vmatprep.subr.mxu1 %v9249_v21  ;;  %7520 = vmatpush3.msra.mxu0 %v11412_v55  ;;  %11417 = vst [vmem:[#allocation19_spill] sm:$0xff] %v9514_v52  ;;  %v9535_v44 = vsub.f32 %v1536_v54, %v9514_v52  ;;  %v1532_v62 = vsel %vm1507_vm1, %v1494_v5, 0  ;;  %11436 = vst [vmem:[#allocation36_spill] sm:$0xff] %v9582_v61  ;;  %v1488_v4 = vpop.permute.xlu1 %1487  ;;  %v9601_v6 = vsub.f32 %v1530_v26, %v9589_v51 }
 0x17a   :  { %7563 = vmatpush3.msra.mxu1 %v9249_v21  ;;  %7521 = vmatprep.subr.mxu0 %v11416_v37  ;;  %v1658_v21 = vsub.f32 %v9493_v48, %v9503_v15  ;;  %v9559_v27 = vand.u32 4294901760, %v1532_v62  ;;  %11438 = vst [vmem:[#allocation38_spill] sm:$0xff] %v9589_v51  ;;  %v1686_v8 = vsub.f32 %v9564_v9, %v9582_v61  ;;  %v1526_v12 = vsel %vm1507_vm1, %v1488_v4, 0 }
 0x17b   :  { %7564 = vmatprep.subr.mxu1 %v9267_v39  ;;  %7522 = vmatpush3.msra.mxu0 %v11416_v37  ;;  %11423 = vst [vmem:[#allocation31_spill] sm:$0xff] %v9535_v44  ;;  %v9557_v53 = vand.u32 4294901760, %v9535_v44  ;;  %11441 = vst [vmem:[#allocation41_spill] sm:$0xff] %v9601_v6  ;;  %v9611_v19 = vand.u32 4294901760, %v1526_v12  ;;  %v9616_v25 = vand.u32 4294901760, %v9601_v6 }
 0x17c   :  { %7565 = vmatpush3.msra.mxu1 %v9267_v39  ;;  %7523 = vmatprep.subr.mxu0 %v11418_v57  ;;  %v9530_v39 = vand.u32 4294901760, %v1651_v60  ;;  %v9543_v63 = vand.u32 4294901760, %v1658_v21  ;;  %11430 = vst [vmem:[#allocation34_spill] sm:$0xff] %v9559_v27  ;;  %v9575_v20 = vsub.f32 %v1532_v62, %v9559_v27  ;;  %v1490_v32 = vpop.permute.xlu0 %1489  ;;  %v9622_v36 = vand.u32 4294901760, %v1686_v8 }
 0x17d   :  { %7566 = vmatprep.subr.mxu1 %v9284_v58  ;;  %7524 = vmatpush3.msra.mxu0 %v11418_v57  ;;  %v1679_v31 = vsub.f32 %v9535_v44, %v9557_v53  ;;  %11443 = vst [vmem:[#allocation43_spill] sm:$0xff] %v9611_v19  ;;  %11444 = vst [vmem:[#allocation44_spill] sm:$0xff] %v9616_v25  ;;  %v1484_v49 = vpop.permute.xlu1 %1483  ;;  %v9629_v55 = vsub.f32 %v1526_v12, %v9611_v19 }
 0x17e   :  { %7567 = vmatpush3.msra.mxu1 %v9284_v58  ;;  %7525 = vmatprep.subr.mxu0 %v11421_v28  ;;  %11422 = vst [vmem:[#allocation21_spill] sm:$0xff] %v9530_v39  ;;  %v9541_v58 = vand.u32 4294901760, %v9519_v34  ;;  %11426 = vst [vmem:[#allocation32_spill] sm:$0xff] %v9543_v63  ;;  %v9595_v1 = vand.u32 4294901760, %v9575_v20  ;;  %v1700_v57 = vsub.f32 %v9601_v6, %v9616_v25  ;;  %v1522_v21 = vsel %vm1507_vm1, %v1484_v49, 0 }
 0x17f   :  { %7568 = vmatprep.subr.mxu1 %v9295_v33  ;;  %7526 = vmatpush3.msra.mxu0 %v11421_v28  ;;  %11435 = vst [vmem:[#allocation25_spill] sm:$0xff] %v9575_v20  ;;  %v9597_v3 = vand.u32 4294901760, %v1679_v31  ;;  %11446 = vst [vmem:[#allocation46_spill] sm:$0xff] %v9622_v36  ;;  %v9646_v10 = vand.u32 4294901760, %v9629_v55  ;;  %v9654_v5 = vand.u32 4294901760, %v1522_v21 }
 0x180   :  { %7569 = vmatpush3.msra.mxu1 %v9295_v33  ;;  %7527 = vmatprep.subr.mxu0 %v11424_v23  ;;  %11425 = vst [vmem:[#allocation22_spill] sm:$0xff] %v9541_v58  ;;  %v11428_v33 = vld [vmem:[#allocation23_spill] sm:$0xff]  ;;  %v1672_v0 = vsub.f32 %v9519_v34, %v9541_v58  ;;  %11439 = vst [vmem:[#allocation39_spill] sm:$0xff] %v9595_v1  ;;  %v1486_v13 = vpop.permute.xlu0 %1485  ;;  %v1693_v24 = vsub.f32 %v9575_v20, %v9595_v1 }
 0x181   :  { %7571 = vmatmul.mubr.f32.vlgmr.msra.gmra.mxu1 %v9364_v45  ;;  %7528 = vmatpush3.msra.mxu0 %v11424_v23  ;;  %11429 = vst [vmem:[#allocation23_spill] sm:$0xff] %v9557_v53  ;;  %11440 = vst [vmem:[#allocation40_spill] sm:$0xff] %v9597_v3  ;;  %v1524_v41 = vsel %vm1507_vm1, %v1486_v13, 0  ;;  %v9652_v23 = vand.u32 4294901760, %v1700_v57  ;;  %v1714_v22 = vsub.f32 %v9629_v55, %v9646_v10  ;;  %v1480_v26 = vpop.permute.xlu1 %1479 }
 0x182   :  { %7529 = vmatprep.subr.mxu0 %v11428_v33  ;;  %7608 = vmatprep.subr.mxu1 %v9530_v39  ;;  %v9584_v46 = vand.u32 4294901760, %v1672_v0  ;;  %11447 = vst [vmem:[#allocation47_spill] sm:$0xff] %v9629_v55  ;;  %v9631_v54 = vand.u32 4294901760, %v1524_v41  ;;  %v9637_v60 = vand.u32 4294901760, %v1693_v24  ;;  %11451 = vst [vmem:[#allocation51_spill] sm:$0xff] %v9646_v10  ;;  %v9669_v0 = vsub.f32 %v1522_v21, %v9654_v5 }
 0x183   :  { %7530 = vmatpush3.msra.mxu0 %v11428_v33  ;;  %7609 = vmatpush3.xpose.msra.mxu1 %v9530_v39  ;;  %11453 = vst [vmem:[#allocation53_spill] sm:$0xff] %v9652_v23  ;;  %11454 = vst [vmem:[#allocation54_spill] sm:$0xff] %v9654_v5  ;;  %v1518_v4 = vsel %vm1507_vm1, %v1480_v26, 0 }
 0x184   :  { %7531 = vmatprep.subr.mxu0 %v11431_v2  ;;  %7610 = vmatprep.subr.mxu1 %v9543_v63  ;;  %11437 = vst [vmem:[#allocation37_spill] sm:$0xff] %v9584_v46  ;;  %11448 = vst [vmem:[#allocation48_spill] sm:$0xff] %v9631_v54  ;;  %v1482_v28 = vpop.permute.xlu0 %1481  ;;  %v9649_v17 = vsub.f32 %v1524_v41, %v9631_v54  ;;  %v9691_v12 = vand.u32 4294901760, %v1518_v4 }
 0x185   :  { %7532 = vmatpush3.msra.mxu0 %v11431_v2  ;;  %11450 = vst [vmem:[#allocation50_spill] sm:$0xff] %v9637_v60  ;;  %v1520_v62 = vsel %vm1507_vm1, %v1482_v28, 0  ;;  %11457 = vst [vmem:[#allocation57_spill] sm:$0xff] %v9669_v0  ;;  %v1476_v26 = vpop.permute.xlu1 %1475 }
 0x186   :  { %7533 = vmatprep.subr.mxu0 %v11434_v14  ;;  %11452 = vst [vmem:[#allocation52_spill] sm:$0xff] %v9649_v17  ;;  %v9662_v33 = vand.u32 4294901760, %v1520_v62  ;;  %v9665_v2 = vand.u32 4294901760, %v9649_v17  ;;  %11462 = vst [vmem:[#allocation62_spill] sm:$0xff] %v9691_v12  ;;  %v9701_v49 = vsub.f32 %v1518_v4, %v9691_v12 }
 0x187   :  { %7534 = vmatpush3.msra.mxu0 %v11434_v14  ;;  %7611 = vmatpush3.xpose.msra.mxu1 %v9543_v63 }
 0x188   :  { %7536 = vmatmul.mubr.f32.vlgmr.msra.gmra.mxu0 %v9364_v45  ;;  %7573 = vmatprep.subr.mxu0 %v9465_v11  ;;  %v1528_v45 = vsel %vm1507_vm1, %v1490_v32, 0  ;;  %11455 = vst [vmem:[#allocation55_spill] sm:$0xff] %v9662_v33  ;;  %11456 = vst [vmem:[#allocation56_spill] sm:$0xff] %v9665_v2  ;;  %v9679_v31 = vsub.f32 %v1520_v62, %v9662_v33  ;;  %v9682_v32 = vand.u32 4294901760, %v9669_v0  ;;  %v1478_v13 = vpop.permute.xlu0 %1477 }
 0x189   :  { %7574 = vmatpush3.xpose.msra.mxu0 %v9465_v11  ;;  %7612 = vmatprep.subr.mxu1 %v9569_v47  ;;  %v9603_v7 = vand.u32 4294901760, %v1528_v45  ;;  %v1721_v8 = vsub.f32 %v9649_v17, %v9665_v2  ;;  %v1516_v24 = vsel %vm1507_vm1, %v1478_v13, 0  ;;  %11464 = vst [vmem:[#allocation64_spill] sm:$0xff] %v9701_v49 }
 0x18a   :  { %7575 = vmatprep.subr.mxu0 %v9480_v30  ;;  %11459 = vst [vmem:[#allocation59_spill] sm:$0xff] %v9679_v31  ;;  %11460 = vst [vmem:[#allocation60_spill] sm:$0xff] %v9682_v32  ;;  %v9697_v41 = vand.u32 4294901760, %v9679_v31  ;;  %v9705_v21 = vand.u32 4294901760, %v1516_v24  ;;  %v1728_v28 = vsub.f32 %v9669_v0, %v9682_v32 }
 0x18b   :  { %7613 = vmatpush3.xpose.msra.mxu1 %v9569_v47  ;;  %11442 = vst [vmem:[#allocation42_spill] sm:$0xff] %v9603_v7  ;;  %v9620_v29 = vsub.f32 %v1528_v45, %v9603_v7  ;;  %v9685_v45 = vand.u32 4294901760, %v1714_v22  ;;  %v9703_v57 = vand.u32 4294901760, %v1721_v8  ;;  %v1514_v8 = vsel %vm1507_vm1, %v1476_v26, 0 }
 0x18c   :  { %7614 = vmatprep.subr.mxu1 %v9584_v46  ;;  %11463 = vst [vmem:[#allocation63_spill] sm:$0xff] %v9697_v41  ;;  %11466 = vst [vmem:[#allocation66_spill] sm:$0xff] %v9705_v21  ;;  %v9717_v62 = vsub.f32 %v1516_v24, %v9705_v21  ;;  %v9719_v22 = vand.u32 4294901760, %v1728_v28  ;;  %v1735_v4 = vsub.f32 %v9679_v31, %v9697_v41  ;;  %v9726_v13 = vand.u32 4294901760, %v1514_v8 }
 0x18d   :  { %7576 = vmatpush3.xpose.msra.mxu0 %v9480_v30  ;;  %11445 = vst [vmem:[#allocation45_spill] sm:$0xff] %v9620_v29  ;;  %v9634_v37 = vand.u32 4294901760, %v9620_v29  ;;  %11461 = vst [vmem:[#allocation61_spill] sm:$0xff] %v9685_v45 }
 0x18e   :  { %7577 = vmatprep.subr.mxu0 %v9482_v35  ;;  %11465 = vst [vmem:[#allocation65_spill] sm:$0xff] %v9703_v57  ;;  %11468 = vst [vmem:[#allocation68_spill] sm:$0xff] %v9717_v62  ;;  %v9734_v24 = vsub.f32 %v1514_v8, %v9726_v13  ;;  %v9736_v28 = vand.u32 4294901760, %v1735_v4 }
 0x18f   :  { %7615 = vmatpush3.xpose.msra.mxu1 %v9584_v46  ;;  %11449 = vst [vmem:[#allocation49_spill] sm:$0xff] %v9634_v37  ;;  %v1707_v40 = vsub.f32 %v9620_v29, %v9634_v37  ;;  %11469 = vst [vmem:[#allocation69_spill] sm:$0xff] %v9719_v22 }
 0x190   :  { %7616 = vmatprep.subr.mxu1 %v9597_v3  ;;  %11470 = vst [vmem:[#allocation70_spill] sm:$0xff] %v9726_v13  ;;  %11472 = vst [vmem:[#allocation72_spill] sm:$0xff] %v9734_v24  ;;  %v9744_v26 = vand.u32 4294901760, %v9734_v24 }
 0x191   :  { %7578 = vmatpush3.xpose.msra.mxu0 %v9482_v35  ;;  %v9671_v14 = vand.u32 4294901760, %v1707_v40  ;;  %v9713_v40 = vand.u32 4294901760, %v9701_v49  ;;  %11473 = vst [vmem:[#allocation73_spill] sm:$0xff] %v9736_v28 }
 0x192   :  { %7579 = vmatprep.subr.mxu0 %v9497_v59  ;;  %11474 = vst [vmem:[#allocation74_spill] sm:$0xff] %v9744_v26 }
 0x193   :  { %7617 = vmatpush3.xpose.msra.mxu1 %v9597_v3  ;;  %11458 = vst [vmem:[#allocation58_spill] sm:$0xff] %v9671_v14  ;;  %11467 = vst [vmem:[#allocation67_spill] sm:$0xff] %v9713_v40 }
 0x194   :  { %7618 = vmatprep.subr.mxu1 %v9622_v36 }
 0x195   :  { %7580 = vmatpush3.xpose.msra.mxu0 %v9497_v59 }
 0x196   :  { %7581 = vmatprep.subr.mxu0 %v9514_v52 }
 0x197   :  { %7619 = vmatpush3.xpose.msra.mxu1 %v9622_v36 }
 0x198   :  { %7620 = vmatprep.subr.mxu1 %v9637_v60 }
 0x199   :  { %7582 = vmatpush3.xpose.msra.mxu0 %v9514_v52 }
 0x19a   :  { %7583 = vmatprep.subr.mxu0 %v9545_v56 }
 0x19b   :  { %7621 = vmatpush3.xpose.msra.mxu1 %v9637_v60 }
 0x19c   :  { %7622 = vmatprep.subr.mxu1 %v9652_v23 }
 0x19d   :  { %7584 = vmatpush3.xpose.msra.mxu0 %v9545_v56 }
 0x19e   :  { %7585 = vmatprep.subr.mxu0 %v9559_v27 }
 0x19f   :  { %7623 = vmatpush3.xpose.msra.mxu1 %v9652_v23 }
 0x1a0   :  { %7624 = vmatprep.subr.mxu1 %v9671_v14 }
 0x1a1   :  { %7586 = vmatpush3.xpose.msra.mxu0 %v9559_v27 }
 0x1a2   :  { %7587 = vmatprep.subr.mxu0 %v9589_v51 }
 0x1a3   :  { %7625 = vmatpush3.xpose.msra.mxu1 %v9671_v14  ;;  %v1742_v14 = vsub.f32 %v9701_v49, %v9713_v40 }
 0x1a4   :  { %7626 = vmatprep.subr.mxu1 %v9685_v45 }
 0x1a5   :  { %7588 = vmatpush3.xpose.msra.mxu0 %v9589_v51 }
 0x1a6   :  { %7589 = vmatprep.subr.mxu0 %v9603_v7 }
 0x1a7   :  { %7627 = vmatpush3.xpose.msra.mxu1 %v9685_v45  ;;  %v9730_v45 = vand.u32 4294901760, %v9717_v62 }
 0x1a8   :  { %7628 = vmatprep.subr.mxu1 %v9703_v57 }
 0x1a9   :  { %7590 = vmatpush3.xpose.msra.mxu0 %v9603_v7  ;;  %11471 = vst [vmem:[#allocation71_spill] sm:$0xff] %v9730_v45  ;;  %v1749_v4 = vsub.f32 %v9717_v62, %v9730_v45 }
 0x1aa   :  { %7591 = vmatprep.subr.mxu0 %v9611_v19 }
 0x1ab   :  { %7629 = vmatpush3.xpose.msra.mxu1 %v9703_v57  ;;  %v9747_v57 = vand.u32 4294901760, %v1742_v14  ;;  %v9755_v8 = vand.u32 4294901760, %v1749_v4 }
 0x1ac   :  { %7630 = vmatprep.subr.mxu1 %v9719_v22 }
 0x1ad   :  { %7592 = vmatpush3.xpose.msra.mxu0 %v9611_v19  ;;  %11475 = vst [vmem:[#allocation75_spill] sm:$0xff] %v9747_v57  ;;  %11476 = vst [vmem:[#allocation76_spill] sm:$0xff] %v9755_v8 }
 0x1ae   :  { %7593 = vmatprep.subr.mxu0 %v9631_v54 }
 0x1af   :  { %7631 = vmatpush3.xpose.msra.mxu1 %v9719_v22  ;;  %v1756_v22 = vsub.f32 %v9734_v24, %v9744_v26 }
 0x1b0   :  { %7632 = vmatprep.subr.mxu1 %v9736_v28 }
 0x1b1   :  { %7594 = vmatpush3.xpose.msra.mxu0 %v9631_v54  ;;  %v9763_v14 = vand.u32 4294901760, %v1756_v22  ;;  %v1393_v22 = vlaneseq }
 0x1b2   :  { %7595 = vmatprep.subr.mxu0 %v9654_v5 }
 0x1b3   :  { %7633 = vmatpush3.xpose.msra.mxu1 %v9736_v28  ;;  %11477 = vst [vmem:[#allocation77_spill] sm:$0xff] %v9763_v14  ;;  %v9777_v4 = vshrl.u32 %v1393_v22, 7  ;;  %v9785_v28 = vpop.f32.mrf.mxu1 }
 0x1b4   :  { %7634 = vmatprep.subr.mxu1 %v9747_v57  ;;  %11480 = vst [vmem:[#allocation80_spill] sm:$0xff] %v9785_v28 }
 0x1b5   :  { %7596 = vmatpush3.xpose.msra.mxu0 %v9654_v5  ;;  %vm1422_vm3 = vcmp.lt.s32.totalorder %v9777_v4, 1  ;;  %vm1433_vm6 = vcmp.lt.s32.totalorder %v9777_v4, 2  ;;  %vm1444_vm9 = vcmp.lt.s32.totalorder %v9777_v4, 4 }
 0x1b6   :  { %7597 = vmatprep.subr.mxu0 %v9662_v33 }
 0x1b7   :  { %7635 = vmatpush3.xpose.msra.mxu1 %v9747_v57  ;;  %v9783_v57 = vpop.f32.mrf.mxu0 }
 0x1b8   :  { %7636 = vmatprep.subr.mxu1 %v9755_v8  ;;  %11479 = vst [vmem:[#allocation79_spill] sm:$0xff] %v9783_v57  ;;  %v1395_v57 = vadd.s32 8, %v9777_v4 }
 0x1b9   :  { %7598 = vmatpush3.xpose.msra.mxu0 %v9662_v33 }
 0x1ba   :  { %7599 = vmatprep.subr.mxu0 %v9691_v12 }
 0x1bb   :  { %7637 = vmatpush3.xpose.msra.mxu1 %v9755_v8  ;;  %v9779_v8 = vand.u32 127, %v1393_v22 }
 0x1bc   :  { %7638 = vmatprep.subr.mxu1 %v9763_v14 }
 0x1bd   :  { %7600 = vmatpush3.xpose.msra.mxu0 %v9691_v12  ;;  %11478 = vst [vmem:[#allocation78_spill] sm:$0xff] %v9779_v8  ;;  %vm2234_vm2 = vcmp.le.s32.totalorder %v9779_v8, %v9777_v4 }
 0x1be   :  { %7601 = vmatprep.subr.mxu0 %v9705_v21 }
 0x1bf   :  { %7639 = vmatpush3.xpose.msra.mxu1 %v9763_v14 }
 0x1c0   :  { %7678 = vmatprep.subr.mxu1 %v9465_v11 }
 0x1c1   :  { %7602 = vmatpush3.xpose.msra.mxu0 %v9705_v21 }
 0x1c2   :  { %7603 = vmatprep.subr.mxu0 %v9726_v13 }
 0x1c5   :  { %7604 = vmatpush3.xpose.msra.mxu0 %v9726_v13 }
 0x1c6   :  { %7643 = vmatprep.subr.mxu0 %v9473_v18 }
 0x1fe   :  { %v7432_v23 = vpop.f32.mrf.mxu1 }
 0x200   :  { %v957_v3 = vpop.f32.mrf.mxu1 }
 0x206   :  { %v7397_v14 = vpop.f32.mrf.mxu0 }
 0x207   :  { %v964_v46 = vadd.f32 %v7432_v23, %v7397_v14  ;;  %v1400_v23 = vand.u32 7, %v9777_v4  ;;  %v1407_v14 = vand.u32 7, %v1395_v57 }
 0x208   :  { %v796_v60 = vpop.f32.mrf.mxu0 }
 0x209   :  { %v958_v39 = vadd.f32 %v957_v3, %v796_v60  ;;  %vm1425_vm4 = vcmp.ge.s32.totalorder %v1400_v23, 1  ;;  %vm1426_vm5 = vcmp.ge.s32.totalorder %v1407_v14, 1  ;;  %vm1436_vm7 = vcmp.ge.s32.totalorder %v1400_v23, 2 }
 0x20a   :  { %vm1437_vm8 = vcmp.ge.s32.totalorder %v1407_v14, 2  ;;  %vm1447_vm10 = vcmp.ge.s32.totalorder %v1400_v23, 4  ;;  %vm1448_vm11 = vcmp.ge.s32.totalorder %v1407_v14, 4 }
 0x21f   :  { %v7502_v47 = vpop.f32.mrf.mxu1 }
 0x221   :  { %v1163_v22 = vpop.f32.mrf.mxu1 }
 0x227   :  { %v7467_v36 = vpop.f32.mrf.mxu0 }
 0x228   :  { %v1075_v50 = vadd.f32 %v7467_v36, %v964_v46 }
 0x229   :  { %v1067_v63 = vpop.f32.mrf.mxu0 }
 0x22a   :  { %v1068_v43 = vadd.f32 %v1067_v63, %v958_v39  ;;  %v1172_v26 = vadd.f32 %v7502_v47, %v1075_v50 }
 0x22c   :  { %v1164_v41 = vadd.f32 %v1163_v22, %v1068_v43 }
 0x241   :  { %v7572_v45 = vpop.f32.mrf.mxu1 }
 0x243   :  { %v1383_v10 = vpop.f32.mrf.mxu1 }
 0x248   :  { %v7537_v40 = vpop.f32.mrf.mxu0 }
 0x249   :  { %v1297_v8 = vadd.f32 %v7537_v40, %v1172_v26 }
 0x24a   :  { %v1290_v32 = vpop.f32.mrf.mxu0 }
 0x24b   :  { %v1390_v28 = vadd.f32 %v7572_v45, %v1297_v8  ;;  %v1291_v2 = vadd.f32 %v1290_v32, %v1164_v41 }
 0x24d   :  { %v1384_v37 = vadd.f32 %v1383_v10, %v1291_v2  ;;  %v1421_v46 = vrot.slane %v1390_v28, 7 }
 0x24f   :  { %v1420_v39 = vrot.slane %v1384_v37, 7 }
 0x251   :  { %v1423_v63 = vsel %vm1422_vm3, %v1420_v39, %v1421_v46  ;;  %v1424_v50 = vsel %vm1422_vm3, %v1421_v46, %v1420_v39 }
 0x252   :  { %v1427_v47 = vmax.f32 %v1384_v37, %v1424_v50  ;;  %v1428_v43 = vmax.f32 %v1390_v28, %v1423_v63 }
 0x254   :  { %v1429_v3 = vsel %vm1425_vm4, %v1427_v47, %v1384_v37  ;;  %v1430_v36 = vsel %vm1426_vm5, %v1428_v43, %v1390_v28 }
 0x255   :  { %v1431_v60 = vrot.slane %v1429_v3, 6  ;;  %v1432_v32 = vrot.slane %v1430_v36, 6 }
 0x257   :  { %v1434_v10 = vsel %vm1433_vm6, %v1431_v60, %v1432_v32  ;;  %v1435_v2 = vsel %vm1433_vm6, %v1432_v32, %v1431_v60 }
 0x258   :  { %v1438_v45 = vmax.f32 %v1429_v3, %v1435_v2  ;;  %v1439_v41 = vmax.f32 %v1430_v36, %v1434_v10 }
 0x25a   :  { %v1440_v57 = vsel %vm1436_vm7, %v1438_v45, %v1429_v3  ;;  %v1441_v40 = vsel %vm1437_vm8, %v1439_v41, %v1430_v36 }
 0x25b   :  { %v1442_v26 = vrot.slane %v1440_v57, 4  ;;  %v1443_v8 = vrot.slane %v1441_v40, 4 }
 0x25d   :  { %v1445_v22 = vsel %vm1444_vm9, %v1442_v26, %v1443_v8  ;;  %v1446_v46 = vsel %vm1444_vm9, %v1443_v8, %v1442_v26  ;;  %v11482_v8 = vld [vmem:[#allocation44_spill] sm:$0xff] }
 0x25e   :  { %v1449_v39 = vmax.f32 %v1440_v57, %v1446_v46  ;;  %v1450_v63 = vmax.f32 %v1441_v40, %v1445_v22  ;;  %v11483_v22 = vld [vmem:[#allocation49_spill] sm:$0xff]  ;;  %v11484_v46 = vld [vmem:[#allocation51_spill] sm:$0xff] }
 0x260   :  { %v1451_v50 = vsel %vm1447_vm10, %v1449_v39, %v1440_v57  ;;  %v1452_v47 = vsel %vm1448_vm11, %v1450_v63, %v1441_v40  ;;  %v11485_v39 = vld [vmem:[#allocation56_spill] sm:$0xff] }
 0x261   :  { %v1453_v43 = vsub.f32 %v1384_v37, %v1451_v50  ;;  %v1454_v60 = vsub.f32 %v1390_v28, %v1452_v47  ;;  %v11486_v63 = vld [vmem:[#allocation60_spill] sm:$0xff]  ;;  %v11487_v50 = vld [vmem:[#allocation63_spill] sm:$0xff] }
 0x262   :  { %v11488_v47 = vld [vmem:[#allocation67_spill] sm:$0xff] }
 0x263   :  { %v1455_v32 = vmul.f32 1.442695, %v1453_v43  ;;  %v1457_v25 = vmul.f32 1.442695, %v1454_v60  ;;  %v11489_v43 = vld [vmem:[#allocation71_spill] sm:$0xff]  ;;  %v11490_v60 = vmov 0.0  }
 0x265   :  { %8763 = vpow2.f32 %v1455_v32  ;;  %v11491_v32 = vld [vmem:[#allocation74_spill] sm:$0xff] }
 0x266   :  { %8765 = vpow2.f32 %v1457_v25 }
 0x272   :  { %v9792_v3 = vpop.eup %8763 }
 0x273   :  { %v9794_v36 = vpop.eup %8765  ;;  %v1509_v10 = vsel %vm1507_vm1, %v9792_v3, 0 }
 0x274   :  { %11481 = vst [vmem:[#allocation81_spill] sm:$0xff] %v9794_v36  ;;  %v9798_v2 = vand.u32 4294901760, %v1509_v10  ;;  %v1512_v23 = vsel %vm1507_vm1, %v9794_v36, 0 }
 0x275   :  { %v9802_v14 = vand.u32 4294901760, %v1512_v23 }
 0x276   :  { %7640 = vmatprep.mubr.f32.mxu1 %v9798_v2  ;;  %v1628_v37 = vsub.f32 %v1509_v10, %v9798_v2 }
 0x277   :  { %v9807_v25 = vsub.f32 %v1512_v23, %v9802_v14  ;;  %7641 = vmatmul.mubr.f32.vlgmr.msra.gmra.mxu1 %v9802_v14 }
 0x278   :  { %7679 = vmatpush3.xpose.msra.mxu1 %v9465_v11  ;;  %v1629_v28 = vand.u32 4294901760, %v1628_v37 }
 0x279   :  { %7680 = vmatprep.subr.mxu1 %v9480_v30  ;;  %v1639_v45 = vand.u32 4294901760, %v9807_v25 }
 0x27a   :  { %7710 = vmatprep.mubr.f32.mxu1 %v1629_v28  ;;  %v1630_v41 = vsub.f32 %v1628_v37, %v1629_v28 }
 0x27b   :  { %v1640_v57 = vsub.f32 %v9807_v25, %v1639_v45 }
 0x27c   :  { %7681 = vmatpush3.xpose.msra.mxu1 %v9480_v30  ;;  %v1631_v40 = vand.u32 4294901760, %v1630_v41 }
 0x27d   :  { %7682 = vmatprep.subr.mxu1 %v9482_v35  ;;  %v1641_v26 = vand.u32 4294901760, %v1640_v57 }
 0x27e   :  { %7605 = vmatprep.mubr.f32.mxu0 %v1631_v40  ;;  %v11492_v40 = vld [vmem:[#allocation26_spill] sm:$0xff] }
 0x27f   :  { %7606 = vmatmul.mubr.f32.vlgmr.msra.gmra.mxu0 %v1641_v26  ;;  %v11493_v26 = vld [vmem:[#allocation79_spill] sm:$0xff] }
 0x280   :  { %7644 = vmatpush3.xpose.msra.mxu0 %v9473_v18  ;;  %7683 = vmatpush3.xpose.msra.mxu1 %v9482_v35  ;;  %v576_v36 = vadd.f32 %v11493_v26, %v11492_v40 }
 0x281   :  { %7645 = vmatprep.subr.mxu0 %v9493_v48  ;;  %7675 = vmatprep.mubr.f32.mxu0 %v1628_v37 }
 0x282   :  { %7684 = vmatprep.subr.mxu1 %v9497_v59 }
 0x284   :  { %7646 = vmatpush3.xpose.msra.mxu0 %v9493_v48  ;;  %7685 = vmatpush3.xpose.msra.mxu1 %v9497_v59 }
 0x285   :  { %7647 = vmatprep.subr.mxu0 %v9506_v16  ;;  %7686 = vmatprep.subr.mxu1 %v9514_v52 }
 0x288   :  { %7648 = vmatpush3.xpose.msra.mxu0 %v9506_v16  ;;  %7687 = vmatpush3.xpose.msra.mxu1 %v9514_v52 }
 0x289   :  { %7649 = vmatprep.subr.mxu0 %v9519_v34  ;;  %7688 = vmatprep.subr.mxu1 %v9545_v56 }
 0x28c   :  { %7650 = vmatpush3.xpose.msra.mxu0 %v9519_v34  ;;  %7689 = vmatpush3.xpose.msra.mxu1 %v9545_v56 }
 0x28d   :  { %7651 = vmatprep.subr.mxu0 %v9535_v44  ;;  %7690 = vmatprep.subr.mxu1 %v9559_v27 }
 0x290   :  { %7652 = vmatpush3.xpose.msra.mxu0 %v9535_v44  ;;  %7691 = vmatpush3.xpose.msra.mxu1 %v9559_v27 }
 0x291   :  { %7653 = vmatprep.subr.mxu0 %v9564_v9  ;;  %7692 = vmatprep.subr.mxu1 %v9589_v51 }
 0x294   :  { %7654 = vmatpush3.xpose.msra.mxu0 %v9564_v9  ;;  %7693 = vmatpush3.xpose.msra.mxu1 %v9589_v51 }
 0x295   :  { %7655 = vmatprep.subr.mxu0 %v9575_v20  ;;  %7694 = vmatprep.subr.mxu1 %v9603_v7 }
 0x298   :  { %7656 = vmatpush3.xpose.msra.mxu0 %v9575_v20  ;;  %7695 = vmatpush3.xpose.msra.mxu1 %v9603_v7 }
 0x299   :  { %7657 = vmatprep.subr.mxu0 %v9601_v6  ;;  %7696 = vmatprep.subr.mxu1 %v9611_v19 }
 0x29c   :  { %7658 = vmatpush3.xpose.msra.mxu0 %v9601_v6  ;;  %7697 = vmatpush3.xpose.msra.mxu1 %v9611_v19 }
 0x29d   :  { %7659 = vmatprep.subr.mxu0 %v9620_v29  ;;  %7698 = vmatprep.subr.mxu1 %v9631_v54 }
 0x2a0   :  { %7660 = vmatpush3.xpose.msra.mxu0 %v9620_v29  ;;  %7699 = vmatpush3.xpose.msra.mxu1 %v9631_v54 }
 0x2a1   :  { %7661 = vmatprep.subr.mxu0 %v9629_v55  ;;  %7700 = vmatprep.subr.mxu1 %v9654_v5 }
 0x2a4   :  { %7662 = vmatpush3.xpose.msra.mxu0 %v9629_v55  ;;  %7701 = vmatpush3.xpose.msra.mxu1 %v9654_v5 }
 0x2a5   :  { %7663 = vmatprep.subr.mxu0 %v9649_v17  ;;  %7702 = vmatprep.subr.mxu1 %v9662_v33 }
 0x2a8   :  { %7664 = vmatpush3.xpose.msra.mxu0 %v9649_v17  ;;  %7703 = vmatpush3.xpose.msra.mxu1 %v9662_v33 }
 0x2a9   :  { %7665 = vmatprep.subr.mxu0 %v9669_v0  ;;  %7704 = vmatprep.subr.mxu1 %v9691_v12 }
 0x2ac   :  { %7666 = vmatpush3.xpose.msra.mxu0 %v9669_v0  ;;  %7705 = vmatpush3.xpose.msra.mxu1 %v9691_v12 }
 0x2ad   :  { %7667 = vmatprep.subr.mxu0 %v9679_v31  ;;  %7706 = vmatprep.subr.mxu1 %v9705_v21 }
 0x2b0   :  { %7668 = vmatpush3.xpose.msra.mxu0 %v9679_v31  ;;  %7707 = vmatpush3.xpose.msra.mxu1 %v9705_v21 }
 0x2b1   :  { %7669 = vmatprep.subr.mxu0 %v9701_v49  ;;  %7708 = vmatprep.subr.mxu1 %v9726_v13 }
 0x2b4   :  { %7670 = vmatpush3.xpose.msra.mxu0 %v9701_v49  ;;  %7709 = vmatpush3.xpose.msra.mxu1 %v9726_v13 }
 0x2b5   :  { %7671 = vmatprep.subr.mxu0 %v9717_v62  ;;  %7748 = vmatprep.subr.mxu1 %v9465_v11 }
 0x2b7   :  { %7711 = vmatmul.mubr.f32.vlgmr.msra.gmra.mxu1 %v1639_v45 }
 0x2b8   :  { %7672 = vmatpush3.xpose.msra.mxu0 %v9717_v62  ;;  %7749 = vmatpush3.xpose.msra.mxu1 %v9465_v11 }
 0x2b9   :  { %7780 = vmatprep.mubr.f32.mxu1 %v9798_v2  ;;  %7673 = vmatprep.subr.mxu0 %v9734_v24 }
 0x2ba   :  { %7750 = vmatprep.subr.mxu1 %v9480_v30 }
 0x2bc   :  { %7674 = vmatpush3.xpose.msra.mxu0 %v9734_v24  ;;  %7751 = vmatpush3.xpose.msra.mxu1 %v9480_v30 }
 0x2bd   :  { %7713 = vmatprep.subr.mxu0 %v9488_v42  ;;  %7752 = vmatprep.subr.mxu1 %v9482_v35 }
 0x2bf   :  { %7676 = vmatmul.mubr.f32.vlgmr.msra.gmra.mxu0 %v9807_v25 }
 0x2c0   :  { %7714 = vmatpush3.xpose.msra.mxu0 %v9488_v42  ;;  %7745 = vmatprep.mubr.f32.mxu0 %v9798_v2 }
 0x2c1   :  { %7753 = vmatpush3.xpose.msra.mxu1 %v9482_v35  ;;  %7715 = vmatprep.subr.mxu0 %v9503_v15 }
 0x2c2   :  { %7754 = vmatprep.subr.mxu1 %v9497_v59 }
 0x2c4   :  { %7716 = vmatpush3.xpose.msra.mxu0 %v9503_v15 }
 0x2c5   :  { %7755 = vmatpush3.xpose.msra.mxu1 %v9497_v59  ;;  %7717 = vmatprep.subr.mxu0 %v9526_v38 }
 0x2c6   :  { %7756 = vmatprep.subr.mxu1 %v9514_v52 }
 0x2c8   :  { %7718 = vmatpush3.xpose.msra.mxu0 %v9526_v38 }
 0x2c9   :  { %7757 = vmatpush3.xpose.msra.mxu1 %v9514_v52  ;;  %7719 = vmatprep.subr.mxu0 %v9541_v58 }
 0x2ca   :  { %7758 = vmatprep.subr.mxu1 %v9545_v56 }
 0x2cc   :  { %7720 = vmatpush3.xpose.msra.mxu0 %v9541_v58 }
 0x2cd   :  { %7759 = vmatpush3.xpose.msra.mxu1 %v9545_v56  ;;  %7721 = vmatprep.subr.mxu0 %v9557_v53 }
 0x2ce   :  { %7760 = vmatprep.subr.mxu1 %v9559_v27 }
 0x2d0   :  { %7722 = vmatpush3.xpose.msra.mxu0 %v9557_v53 }
 0x2d1   :  { %7761 = vmatpush3.xpose.msra.mxu1 %v9559_v27  ;;  %7723 = vmatprep.subr.mxu0 %v9582_v61 }
 0x2d2   :  { %7762 = vmatprep.subr.mxu1 %v9589_v51 }
 0x2d4   :  { %7724 = vmatpush3.xpose.msra.mxu0 %v9582_v61 }
 0x2d5   :  { %7763 = vmatpush3.xpose.msra.mxu1 %v9589_v51  ;;  %7725 = vmatprep.subr.mxu0 %v9595_v1 }
 0x2d6   :  { %7764 = vmatprep.subr.mxu1 %v9603_v7 }
 0x2d8   :  { %7726 = vmatpush3.xpose.msra.mxu0 %v9595_v1 }
 0x2d9   :  { %7765 = vmatpush3.xpose.msra.mxu1 %v9603_v7  ;;  %7727 = vmatprep.subr.mxu0 %v11482_v8 }
 0x2da   :  { %7766 = vmatprep.subr.mxu1 %v9611_v19 }
 0x2dc   :  { %7728 = vmatpush3.xpose.msra.mxu0 %v11482_v8 }
 0x2dd   :  { %7767 = vmatpush3.xpose.msra.mxu1 %v9611_v19  ;;  %7729 = vmatprep.subr.mxu0 %v11483_v22 }
 0x2de   :  { %7768 = vmatprep.subr.mxu1 %v9631_v54 }
 0x2e0   :  { %7730 = vmatpush3.xpose.msra.mxu0 %v11483_v22 }
 0x2e1   :  { %7769 = vmatpush3.xpose.msra.mxu1 %v9631_v54  ;;  %7731 = vmatprep.subr.mxu0 %v11484_v46 }
 0x2e2   :  { %7770 = vmatprep.subr.mxu1 %v9654_v5 }
 0x2e4   :  { %7732 = vmatpush3.xpose.msra.mxu0 %v11484_v46 }
 0x2e5   :  { %7771 = vmatpush3.xpose.msra.mxu1 %v9654_v5  ;;  %7733 = vmatprep.subr.mxu0 %v11485_v39 }
 0x2e6   :  { %7772 = vmatprep.subr.mxu1 %v9662_v33 }
 0x2e8   :  { %7734 = vmatpush3.xpose.msra.mxu0 %v11485_v39 }
 0x2e9   :  { %7773 = vmatpush3.xpose.msra.mxu1 %v9662_v33  ;;  %7735 = vmatprep.subr.mxu0 %v11486_v63 }
 0x2ea   :  { %7774 = vmatprep.subr.mxu1 %v9691_v12 }
 0x2ec   :  { %7736 = vmatpush3.xpose.msra.mxu0 %v11486_v63 }
 0x2ed   :  { %7775 = vmatpush3.xpose.msra.mxu1 %v9691_v12  ;;  %7737 = vmatprep.subr.mxu0 %v11487_v50 }
 0x2ee   :  { %7776 = vmatprep.subr.mxu1 %v9705_v21 }
 0x2f0   :  { %7738 = vmatpush3.xpose.msra.mxu0 %v11487_v50 }
 0x2f1   :  { %7777 = vmatpush3.xpose.msra.mxu1 %v9705_v21  ;;  %7739 = vmatprep.subr.mxu0 %v11488_v47 }
 0x2f2   :  { %7778 = vmatprep.subr.mxu1 %v9726_v13 }
 0x2f4   :  { %7740 = vmatpush3.xpose.msra.mxu0 %v11488_v47 }
 0x2f5   :  { %7779 = vmatpush3.xpose.msra.mxu1 %v9726_v13  ;;  %7741 = vmatprep.subr.mxu0 %v11489_v43 }
 0x2f6   :  { %7788 = vmatprep.subr.mxu1 %v11490_v60 }
 0x2f8   :  { %7781 = vmatmul.mubr.f32.vlgmr.msra.gmra.mxu1 %v9802_v14  ;;  %7742 = vmatpush3.xpose.msra.mxu0 %v11489_v43 }
 0x2f9   :  { %7743 = vmatprep.subr.mxu0 %v11491_v32  ;;  %7790 = vmatprep.mubr.msk.f32.mxu1 %vm8890_vm12, %v11490_v60 }
 0x2fc   :  { %7744 = vmatpush3.xpose.msra.mxu0 %v11491_v32 }
 0x2fd   :  { %7783 = vmatprep.subr.mxu0 %v11490_v60 }
 0x2ff   :  { %7746 = vmatmul.mubr.f32.vlgmr.msra.gmra.mxu0 %v9802_v14  ;;  %v11494_v14 = vld [vmem:[#allocation80_spill] sm:$0xff] }
 0x300   :  { %7785 = vmatprep.mubr.msk.f32.mxu0 %vm8890_vm12, %v11490_v60  ;;  %v663_v32 = vadd.f32 %v11494_v14, %v576_v36 }
 0x302   :  { %v6677_v43 = vmul.f32 -1.442695, %v663_v32 }
 0x304   :  { %8767 = vpow2.f32 %v6677_v43 }
 0x311   :  { %v8768_v47 = vpop.eup %8767 }
 0x312   :  { %v680_v63 = vadd.f32 1.0, %v8768_v47 }
 0x337   :  { %v7642_v10 = vpop.f32.mrf.mxu1 }
 0x339   :  { %v1794_v25 = vpop.f32.mrf.mxu1 }
 0x33f   :  { %v7607_v2 = vpop.f32.mrf.mxu0 }
 0x340   :  { %v1801_v23 = vadd.f32 %v7642_v10, %v7607_v2  ;;  %v11495_v10 = vld [vmem:[#allocation27_spill] sm:$0xff] }
 0x341   :  { %v1633_v37 = vpop.f32.mrf.mxu0  ;;  %v6675_v2 = vmul.f32 -1.442695, %v11495_v10 }
 0x343   :  { %8769 = vpow2.f32 %v6675_v2 }
 0x344   :  { %8771 = vrcp.f32 %v680_v63 }
 0x350   :  { %v8770_v50 = vpop.eup %8769 }
 0x351   :  { %v678_v39 = vadd.f32 1.0, %v8770_v50  ;;  %v8772_v47 = vpop.eup %8771 }
 0x352   :  { %v692_v46 = vmul.f32 %v8772_v47, %v663_v32  ;;  %v11503_v47 = vld [vmem:[#allocation35_spill] sm:$0xff] }
 0x353   :  { %8773 = vrcp.f32 %v678_v39 }
 0x360   :  { %v8774_v2 = vpop.eup %8773 }
 0x377   :  { %v7712_v41 = vpop.f32.mrf.mxu1 }
 0x379   :  { %v2000_v26 = vpop.f32.mrf.mxu1 }
 0x37f   :  { %v7677_v28 = vpop.f32.mrf.mxu0 }
 0x380   :  { %v1912_v45 = vadd.f32 %v7677_v28, %v1801_v23  ;;  %v9961_v28 = vsel %vm2234_vm2, 1.0, %v11490_v60 }
 0x381   :  { %11497 = vst [vmem:[#allocation26_spill] sm:$0xff] %v9961_v28  ;;  %v2239_v36 = vsel %vm2237_vm13, %v9961_v28, 0 }
 0x382   :  { %v2009_v57 = vadd.f32 %v7712_v41, %v1912_v45  ;;  %v1904_v45 = vpop.f32.mrf.mxu0  ;;  %v1795_v41 = vadd.f32 %v1794_v25, %v1633_v37  ;;  %v9965_v43 = vsub.f32 %v2239_v36, %v2239_v36  ;;  %v690_v25 = vmul.f32 %v8774_v2, %v11495_v10  ;;  %v11508_v2 = vld [vmem:[#allocation53_spill] sm:$0xff] }
 0x384   :  { %11498 = vst [vmem:[#allocation79_spill] sm:$0xff] %v9965_v43  ;;  %v1905_v40 = vadd.f32 %v1904_v45, %v1795_v41  ;;  %v9968_v39 = vand.u32 4294901760, %v9965_v43 }
 0x386   :  { %11499 = vst [vmem:[#allocation80_spill] sm:$0xff] %v9968_v39  ;;  %v2001_v4 = vadd.f32 %v2000_v26, %v1905_v40  ;;  %v2310_v37 = vsub.f32 %v9965_v43, %v9968_v39  ;;  %v2718_v40 = vand.u32 4294901760, %v9792_v3  ;;  %v11502_v26 = vld [vmem:[#allocation32_spill] sm:$0xff] }
 0x388   :  { %v9975_v61 = vand.u32 4294901760, %v2310_v37  ;;  %v11510_v37 = vld [vmem:[#allocation61_spill] sm:$0xff] }
 0x38a   :  { %11500 = vst [vmem:[#allocation27_spill] sm:$0xff] %v9975_v61 }
 0x3b8   :  { %v7782_v50 = vpop.f32.mrf.mxu1 }
 0x3ba   :  { %v2220_v1 = vpop.f32.mrf.mxu1 }
 0x3bf   :  { %v7747_v63 = vpop.f32.mrf.mxu0 }
 0x3c0   :  { %v2134_v14 = vadd.f32 %v7747_v63, %v2009_v57  ;;  %v11505_v63 = vld [vmem:[#allocation40_spill] sm:$0xff] }
 0x3c1   :  { %v2127_v23 = vpop.f32.mrf.mxu0 }
 0x3c2   :  { %v2227_v22 = vadd.f32 %v7782_v50, %v2134_v14  ;;  %v2128_v8 = vadd.f32 %v2127_v23, %v2001_v4  ;;  %v11504_v50 = vld [vmem:[#allocation37_spill] sm:$0xff]  ;;  %v11506_v14 = vld [vmem:[#allocation46_spill] sm:$0xff] }
 0x3c3   :  { %v11507_v4 = vld [vmem:[#allocation50_spill] sm:$0xff] }
 0x3c4   :  { %v9973_v36 = vmul.f32 %v2227_v22, %v692_v46  ;;  %v2221_v45 = vadd.f32 %v2220_v1, %v2128_v8  ;;  %v2795_v8 = vsub.f32 %v9792_v3, %v2718_v40  ;;  %v11509_v23 = vld [vmem:[#allocation58_spill] sm:$0xff] }
 0x3c6   :  { %v2230_v41 = vmul.f32 %v2221_v45, %v690_v25  ;;  %v2796_v46 = vand.u32 4294901760, %v2795_v8  ;;  %v11511_v25 = vld [vmem:[#allocation65_spill] sm:$0xff] }
 0x3c7   :  { %v11512_v45 = vld [vmem:[#allocation69_spill] sm:$0xff] }
 0x3c8   :  { %v2272_v53 = vand.u32 4294901760, %v2230_v41  ;;  %v2797_v3 = vsub.f32 %v2795_v8, %v2796_v46 }
 0x3ca   :  { %v2349_v57 = vsub.f32 %v2230_v41, %v2272_v53  ;;  %7784 = vmatpush3.msra.mxu0 %v2272_v53  ;;  %v2798_v10 = vand.u32 4294901760, %v2797_v3  ;;  %v11513_v41 = vld [vmem:[#allocation73_spill] sm:$0xff] }
 0x3cb   :  { %7786 = vmatmul.mubr.f32.vlgmr.msra.gmra.mxu0 %v9975_v61  ;;  %7793 = vmatprep.subr.mxu0 %v11490_v60 }
 0x3cc   :  { %7794 = vmatpush3.msra.mxu0 %v2349_v57  ;;  %7795 = vmatprep.mubr.msk.f32.mxu0 %vm8890_vm12, %v11490_v60  ;;  %v2350_v32 = vand.u32 4294901760, %v2349_v57 }
 0x3cd   :  { %7803 = vmatprep.subr.mxu0 %v11490_v60 }
 0x3ce   :  { %v2351_v1 = vsub.f32 %v2349_v57, %v2350_v32  ;;  %v11514_v57 = vld [vmem:[#allocation75_spill] sm:$0xff] }
 0x3cf   :  { %7796 = vmatmul.mubr.f32.vlgmr.msra.gmra.mxu0 %v9965_v43 }
 0x3d0   :  { %7804 = vmatpush3.msra.mxu0 %v2350_v32  ;;  %v2352_v22 = vand.u32 4294901760, %v2351_v1  ;;  %7805 = vmatprep.mubr.msk.f32.mxu0 %vm8890_vm12, %v11490_v60  ;;  %v11516_v32 = vld [vmem:[#allocation77_spill] sm:$0xff] }
 0x3d1   :  { %7813 = vmatprep.subr.mxu0 %v11490_v60 }
 0x3d2   :  { %7789 = vmatpush3.msra.mxu1 %v2352_v22 }
 0x3d3   :  { %7791 = vmatmul.mubr.msk.f32.vlgmr.msra.gmra.mxu1 %vm2237_vm13, %v9961_v28  ;;  %7798 = vmatprep.subr.mxu1 %v11490_v60 }
 0x3d4   :  { %7806 = vmatmul.mubr.msk.f32.vlgmr.msra.gmra.mxu0 %vm2237_vm13, %v9961_v28  ;;  %7799 = vmatpush3.msra.mxu1 %v2272_v53 }
 0x3d5   :  { %7814 = vmatpush3.msra.mxu0 %v2718_v40  ;;  %7800 = vmatprep.mubr.msk.f32.mxu1 %vm8890_vm12, %v11490_v60 }
 0x3d6   :  { %7808 = vmatprep.subr.mxu1 %v11490_v60  ;;  %7815 = vmatprep.mubr.msk.f32.mxu0 %vm8890_vm12, %v11490_v60 }
 0x3d7   :  { %7823 = vmatprep.subr.mxu0 %v11490_v60  ;;  %7801 = vmatmul.mubr.f32.vlgmr.msra.gmra.mxu1 %v9968_v39 }
 0x3d8   :  { %7809 = vmatpush3.msra.mxu1 %v2272_v53  ;;  %7816 = vmatmul.mubr.f32.vlgmr.msra.gmra.mxu0 %v9975_v61  ;;  %v11501_v53 = vld [vmem:[#allocation21_spill] sm:$0xff] }
 0x3d9   :  { %7824 = vmatpush3.msra.mxu0 %v2795_v8  ;;  %7810 = vmatprep.mubr.msk.f32.mxu1 %vm8890_vm12, %v11490_v60 }
 0x3da   :  { %7818 = vmatprep.subr.mxu1 %v11490_v60  ;;  %7825 = vmatprep.mubr.msk.f32.mxu0 %vm8890_vm12, %v11490_v60 }
 0x3db   :  { %7833 = vmatprep.subr.mxu0 %v11490_v60  ;;  %7811 = vmatmul.mubr.msk.f32.vlgmr.msra.gmra.mxu1 %vm2237_vm13, %v9961_v28 }
 0x3dc   :  { %7819 = vmatpush3.msra.mxu1 %v2798_v10  ;;  %7826 = vmatmul.mubr.f32.vlgmr.msra.gmra.mxu0 %v9965_v43 }
 0x3dd   :  { %7834 = vmatpush3.msra.mxu0 %v2796_v46  ;;  %7820 = vmatprep.mubr.msk.f32.mxu1 %vm8890_vm12, %v11490_v60 }
 0x3de   :  { %7828 = vmatprep.subr.mxu1 %v11490_v60  ;;  %7835 = vmatprep.mubr.msk.f32.mxu0 %vm8890_vm12, %v11490_v60 }
 0x3df   :  { %7843 = vmatprep.subr.mxu0 %v11490_v60  ;;  %7821 = vmatmul.mubr.msk.f32.vlgmr.msra.gmra.mxu1 %vm2237_vm13, %v9961_v28 }
 0x3e0   :  { %7829 = vmatpush3.msra.mxu1 %v2718_v40  ;;  %7836 = vmatmul.mubr.msk.f32.vlgmr.msra.gmra.mxu0 %vm2237_vm13, %v9961_v28 }
 0x3e1   :  { %7844 = vmatpush3.xpose.msra.mxu0 %v9465_v11  ;;  %7830 = vmatprep.mubr.msk.f32.mxu1 %vm8890_vm12, %v11490_v60 }
 0x3e2   :  { %7838 = vmatprep.subr.mxu1 %v11490_v60  ;;  %7845 = vmatprep.subr.mxu0 %v11490_v60 }
 0x3e3   :  { %7831 = vmatmul.mubr.f32.vlgmr.msra.gmra.mxu1 %v9968_v39  ;;  %7875 = vmatprep.mubr.msk.f32.mxu0 %vm8890_vm12, %v11490_v60 }
 0x3e4   :  { %7839 = vmatpush3.msra.mxu1 %v2718_v40  ;;  %7840 = vmatprep.mubr.msk.f32.mxu1 %vm8890_vm12, %v11490_v60  ;;  %v11515_v40 = vld [vmem:[#allocation76_spill] sm:$0xff] }
 0x3e5   :  { %7846 = vmatpush3.xpose.msra.mxu0 %v9480_v30  ;;  %7878 = vmatprep.subr.mxu1 %v11490_v60 }
 0x3e6   :  { %7847 = vmatprep.subr.mxu0 %v11490_v60 }
 0x3e7   :  { %7841 = vmatmul.mubr.msk.f32.vlgmr.msra.gmra.mxu1 %vm2237_vm13, %v9961_v28 }
 0x3e8   :  { %7879 = vmatpush3.xpose.msra.mxu1 %v11501_v53  ;;  %7910 = vmatprep.mubr.msk.f32.mxu1 %vm8890_vm12, %v11490_v60 }
 0x3e9   :  { %7848 = vmatpush3.xpose.msra.mxu0 %v9482_v35  ;;  %7880 = vmatprep.subr.mxu1 %v11490_v60 }
 0x3ea   :  { %7849 = vmatprep.subr.mxu0 %v11490_v60 }
 0x3ec   :  { %7881 = vmatpush3.xpose.msra.mxu1 %v11502_v26 }
 0x3ed   :  { %7850 = vmatpush3.xpose.msra.mxu0 %v9497_v59  ;;  %7882 = vmatprep.subr.mxu1 %v11490_v60 }
 0x3ee   :  { %7851 = vmatprep.subr.mxu0 %v11490_v60 }
 0x3f0   :  { %7883 = vmatpush3.xpose.msra.mxu1 %v11503_v47 }
 0x3f1   :  { %7852 = vmatpush3.xpose.msra.mxu0 %v9514_v52  ;;  %7884 = vmatprep.subr.mxu1 %v11490_v60 }
 0x3f2   :  { %7853 = vmatprep.subr.mxu0 %v11490_v60 }
 0x3f4   :  { %7885 = vmatpush3.xpose.msra.mxu1 %v11504_v50 }
 0x3f5   :  { %7854 = vmatpush3.xpose.msra.mxu0 %v9545_v56  ;;  %7886 = vmatprep.subr.mxu1 %v11490_v60 }
 0x3f6   :  { %7855 = vmatprep.subr.mxu0 %v11490_v60 }
 0x3f8   :  { %7887 = vmatpush3.xpose.msra.mxu1 %v11505_v63 }
 0x3f9   :  { %7856 = vmatpush3.xpose.msra.mxu0 %v9559_v27  ;;  %7888 = vmatprep.subr.mxu1 %v11490_v60 }
 0x3fa   :  { %7857 = vmatprep.subr.mxu0 %v11490_v60 }
 0x3fc   :  { %7889 = vmatpush3.xpose.msra.mxu1 %v11506_v14 }
 0x3fd   :  { %7858 = vmatpush3.xpose.msra.mxu0 %v9589_v51  ;;  %7890 = vmatprep.subr.mxu1 %v11490_v60 }
 0x3fe   :  { %7859 = vmatprep.subr.mxu0 %v11490_v60 }
 0x400   :  { %7891 = vmatpush3.xpose.msra.mxu1 %v11507_v4 }
 0x401   :  { %7860 = vmatpush3.xpose.msra.mxu0 %v9603_v7  ;;  %7892 = vmatprep.subr.mxu1 %v11490_v60 }
 0x402   :  { %7861 = vmatprep.subr.mxu0 %v11490_v60 }
 0x404   :  { %7893 = vmatpush3.xpose.msra.mxu1 %v11508_v2 }
 0x405   :  { %7862 = vmatpush3.xpose.msra.mxu0 %v9611_v19  ;;  %7894 = vmatprep.subr.mxu1 %v11490_v60 }
 0x406   :  { %7863 = vmatprep.subr.mxu0 %v11490_v60 }
 0x408   :  { %7895 = vmatpush3.xpose.msra.mxu1 %v11509_v23 }
 0x409   :  { %7864 = vmatpush3.xpose.msra.mxu0 %v9631_v54  ;;  %7896 = vmatprep.subr.mxu1 %v11490_v60 }
 0x40a   :  { %7865 = vmatprep.subr.mxu0 %v11490_v60 }
 0x40c   :  { %7897 = vmatpush3.xpose.msra.mxu1 %v11510_v37 }
 0x40d   :  { %7866 = vmatpush3.xpose.msra.mxu0 %v9654_v5  ;;  %7898 = vmatprep.subr.mxu1 %v11490_v60 }
 0x40e   :  { %7867 = vmatprep.subr.mxu0 %v11490_v60 }
 0x410   :  { %7899 = vmatpush3.xpose.msra.mxu1 %v11511_v25 }
 0x411   :  { %7868 = vmatpush3.xpose.msra.mxu0 %v9662_v33  ;;  %7900 = vmatprep.subr.mxu1 %v11490_v60 }
 0x412   :  { %7869 = vmatprep.subr.mxu0 %v11490_v60 }
 0x414   :  { %7901 = vmatpush3.xpose.msra.mxu1 %v11512_v45 }
 0x415   :  { %7870 = vmatpush3.xpose.msra.mxu0 %v9691_v12  ;;  %7902 = vmatprep.subr.mxu1 %v11490_v60 }
 0x416   :  { %7871 = vmatprep.subr.mxu0 %v11490_v60 }
 0x418   :  { %7903 = vmatpush3.xpose.msra.mxu1 %v11513_v41 }
 0x419   :  { %7872 = vmatpush3.xpose.msra.mxu0 %v9705_v21  ;;  %7904 = vmatprep.subr.mxu1 %v11490_v60 }
 0x41a   :  { %7873 = vmatprep.subr.mxu0 %v11490_v60 }
 0x41c   :  { %7905 = vmatpush3.xpose.msra.mxu1 %v11514_v57 }
 0x41d   :  { %7874 = vmatpush3.xpose.msra.mxu0 %v9726_v13  ;;  %7906 = vmatprep.subr.mxu1 %v11490_v60 }
 0x41e   :  { %7913 = vmatprep.subr.mxu0 %v11490_v60 }
 0x420   :  { %7907 = vmatpush3.xpose.msra.mxu1 %v11515_v40 }
 0x421   :  { %7908 = vmatprep.subr.mxu1 %v11490_v60 }
 0x424   :  { %7909 = vmatpush3.xpose.msra.mxu1 %v11516_v32 }
 0x425   :  { %7948 = vmatprep.subr.mxu1 %v11490_v60 }
 0x48b   :  { %v2313_v1 = vpop.f32.mrf.mxu0 }
 0x48d   :  { %v7787_v8 = vpop.f32.mrf.mxu0 }
 0x48f   :  { %v2463_v22 = vpop.f32.mrf.mxu0 }
 0x491   :  { %v7797_v46 = vpop.f32.mrf.mxu0 }
 0x493   :  { %v2389_v3 = vpop.f32.mrf.mxu1 }
 0x494   :  { %v2390_v10 = vadd.f32 %v2389_v3, %v2313_v1  ;;  %v2611_v57 = vpop.f32.mrf.mxu0 }
 0x495   :  { %v7792_v41 = vpop.f32.mrf.mxu1 }
 0x496   :  { %v2464_v45 = vadd.f32 %v2463_v22, %v2390_v10  ;;  %v7807_v25 = vpop.f32.mrf.mxu0 }
 0x497   :  { %v2537_v37 = vpop.f32.mrf.mxu1 }
 0x498   :  { %v2538_v23 = vadd.f32 %v2537_v37, %v2464_v45  ;;  %v2759_v2 = vpop.f32.mrf.mxu0 }
 0x499   :  { %v7802_v40 = vpop.f32.mrf.mxu1 }
 0x49a   :  { %v2612_v4 = vadd.f32 %v2611_v57, %v2538_v23  ;;  %v7817_v14 = vpop.f32.mrf.mxu0 }
 0x49b   :  { %v2683_v63 = vpop.f32.mrf.mxu1 }
 0x49c   :  { %v10097_v32 = vadd.f32 %v2683_v63, %v2612_v4  ;;  %v2909_v50 = vpop.f32.mrf.mxu0 }
 0x49d   :  { %v7812_v47 = vpop.f32.mrf.mxu1 }
 0x49e   :  { %v7827_v8 = vpop.f32.mrf.mxu0 }
 0x49f   :  { %v2835_v26 = vpop.f32.mrf.mxu1 }
 0x4a0   :  { %v2836_v46 = vadd.f32 %v2835_v26, %v2759_v2  ;;  %v3057_v53 = vpop.f32.mrf.mxu0 }
 0x4a1   :  { %v7822_v1 = vpop.f32.mrf.mxu1 }
 0x4a2   :  { %v2910_v3 = vadd.f32 %v2909_v50, %v2836_v46  ;;  %v7837_v41 = vpop.f32.mrf.mxu0  ;;  %v8779_v46 = vld [vmem:[#allocation7 + $0x78] sm:$0xff]  ;;  %v8780_v1 = vld [vmem:[#allocation7 + $0x70] sm:$0xff] }
 0x4a3   :  { %v2983_v22 = vpop.f32.mrf.mxu1  ;;  %3812 = vrot.lane.b32.xlu0 %v8779_v46, %s8891_s2  ;;  %3810 = vrot.lane.b32.xlu1 %v8780_v1, %s8891_s2  ;;  %v8782_v41 = vld [vmem:[#allocation7 + $0x60] sm:$0xff]  ;;  %v11521_v46 = vld [vmem:[#allocation49_spill] sm:$0xff]  ;;  %v11522_v1 = vld [vmem:[#allocation51_spill] sm:$0xff] }
 0x4a4   :  { %v2984_v25 = vadd.f32 %v2983_v22, %v2910_v3  ;;  %v8781_v3 = vld [vmem:[#allocation7 + $0x68] sm:$0xff]  ;;  %v8783_v22 = vld [vmem:[#allocation7 + $0x58] sm:$0xff] }
 0x4a5   :  { %v7832_v10 = vpop.f32.mrf.mxu1 }
 0x4a6   :  { %v3058_v37 = vadd.f32 %v3057_v53, %v2984_v25  ;;  %v8784_v25 = vld [vmem:[#allocation7 + $0x50] sm:$0xff]  ;;  %v8785_v10 = vld [vmem:[#allocation7 + $0x48] sm:$0xff] }
 0x4a7   :  { %v3129_v45 = vpop.f32.mrf.mxu1  ;;  %3808 = vrot.lane.b32.xlu0 %v8781_v3, %s8891_s2  ;;  %3806 = vrot.lane.b32.xlu1 %v8782_v41, %s8891_s2  ;;  %v11523_v3 = vld [vmem:[#allocation56_spill] sm:$0xff] }
 0x4a8   :  { %v3130_v40 = vadd.f32 %v3129_v45, %v3058_v37  ;;  %v8786_v37 = vld [vmem:[#allocation7 + $0x40] sm:$0xff]  ;;  %v8787_v45 = vld [vmem:[#allocation7 + $0x38] sm:$0xff]  ;;  %v11524_v41 = vld [vmem:[#allocation60_spill] sm:$0xff] }
 0x4a9   :  { %v7842_v23 = vpop.f32.mrf.mxu1 }
 0x4aa   :  { %8775 = vrcp.f32 %v3130_v40  ;;  %v8789_v23 = vld [vmem:[#allocation7 + $0x28] sm:$0xff] }
 0x4ab   :  { %3804 = vrot.lane.b32.xlu0 %v8783_v22, %s8891_s2  ;;  %3802 = vrot.lane.b32.xlu1 %v8784_v25, %s8891_s2  ;;  %v11525_v22 = vld [vmem:[#allocation63_spill] sm:$0xff] }
 0x4ac   :  { %v11526_v25 = vld [vmem:[#allocation67_spill] sm:$0xff] }
 0x4af   :  { %3800 = vrot.lane.b32.xlu0 %v8785_v10, %s8891_s2  ;;  %3798 = vrot.lane.b32.xlu1 %v8786_v37, %s8891_s2  ;;  %v11527_v10 = vld [vmem:[#allocation71_spill] sm:$0xff]  ;;  %v11528_v37 = vld [vmem:[#allocation74_spill] sm:$0xff] }
 0x4b3   :  { %3796 = vrot.lane.b32.xlu0 %v8787_v45, %s8891_s2 }
 0x4b7   :  { %v8776_v14 = vpop.eup %8775  ;;  %3792 = vrot.lane.b32.xlu0 %v8789_v23, %s8891_s2 }
 0x4b8   :  { %v3134_v63 = vmul.f32 %v8776_v14, %v3130_v40  ;;  %v8788_v40 = vld [vmem:[#allocation7 + $0x30] sm:$0xff] }
 0x4b9   :  { %3794 = vrot.lane.b32.xlu1 %v8788_v40, %s8891_s2 }
 0x4ba   :  { %v3135_v4 = vsub.f32 2.0, %v3134_v63  ;;  %v8791_v63 = vld [vmem:[#allocation7 + $0x18] sm:$0xff] }
 0x4bb   :  { %3788 = vrot.lane.b32.xlu0 %v8791_v63, %s8891_s2 }
 0x4bc   :  { %v3136_v57 = vmul.f32 %v8776_v14, %v3135_v4  ;;  %v8790_v14 = vld [vmem:[#allocation7 + $0x20] sm:$0xff]  ;;  %v8792_v4 = vld [vmem:[#allocation7 + $0x10] sm:$0xff] }
 0x4bd   :  { %3790 = vrot.lane.b32.xlu1 %v8790_v14, %s8891_s2 }
 0x4be   :  { %v3138_v47 = vsel %vm1507_vm1, %v3136_v57, 0  ;;  %v8793_v57 = vld [vmem:[#allocation7 + $0x8] sm:$0xff] }
 0x4bf   :  { %v10100_v8 = vand.u32 4294901760, %v3138_v47  ;;  %3784 = vrot.lane.b32.xlu0 %v8793_v57, %s8891_s2 }
 0x4c1   :  { %7911 = vmatmul.mubr.f32.vlgmr.msra.gmra.mxu1 %v10100_v8  ;;  %v10104_v26 = vsub.f32 %v3138_v47, %v10100_v8  ;;  %3786 = vrot.lane.b32.xlu1 %v8792_v4, %s8891_s2  ;;  %v8794_v47 = vld [vmem:[#allocation7] sm:$0xff] }
 0x4c2   :  { %7949 = vmatpush3.xpose.msra.mxu1 %v9465_v11  ;;  %7980 = vmatprep.mubr.msk.f32.mxu1 %vm8890_vm12, %v11490_v60 }
 0x4c3   :  { %7950 = vmatprep.subr.mxu1 %v11490_v60  ;;  %v3223_v53 = vand.u32 4294901760, %v10104_v26 }
 0x4c5   :  { %v3224_v50 = vsub.f32 %v10104_v26, %v3223_v53  ;;  %3782 = vrot.lane.b32.xlu1 %v8794_v47, %s8891_s2 }
 0x4c6   :  { %7951 = vmatpush3.xpose.msra.mxu1 %v9480_v30 }
 0x4c7   :  { %7952 = vmatprep.subr.mxu1 %v11490_v60  ;;  %v3225_v2 = vand.u32 4294901760, %v3224_v50  ;;  %v11519_v50 = vld [vmem:[#allocation39_spill] sm:$0xff] }
 0x4c9   :  { %7876 = vmatmul.mubr.f32.vlgmr.msra.gmra.mxu0 %v3225_v2  ;;  %v11520_v2 = vld [vmem:[#allocation44_spill] sm:$0xff] }
 0x4ca   :  { %7914 = vmatpush3.xpose.msra.mxu0 %v9473_v18  ;;  %7953 = vmatpush3.xpose.msra.mxu1 %v9482_v35 }
 0x4cb   :  { %7915 = vmatprep.subr.mxu0 %v11490_v60  ;;  %7954 = vmatprep.subr.mxu1 %v11490_v60 }
 0x4cc   :  { %7945 = vmatprep.mubr.msk.f32.mxu0 %vm8890_vm12, %v11490_v60 }
 0x4ce   :  { %7916 = vmatpush3.xpose.msra.mxu0 %v9493_v48  ;;  %7955 = vmatpush3.xpose.msra.mxu1 %v9497_v59 }
 0x4cf   :  { %7917 = vmatprep.subr.mxu0 %v11490_v60  ;;  %7956 = vmatprep.subr.mxu1 %v11490_v60 }
 0x4d2   :  { %7918 = vmatpush3.xpose.msra.mxu0 %v9506_v16  ;;  %7957 = vmatpush3.xpose.msra.mxu1 %v9514_v52 }
 0x4d3   :  { %7919 = vmatprep.subr.mxu0 %v11490_v60  ;;  %7958 = vmatprep.subr.mxu1 %v11490_v60 }
 0x4d6   :  { %7920 = vmatpush3.xpose.msra.mxu0 %v9519_v34  ;;  %7959 = vmatpush3.xpose.msra.mxu1 %v9545_v56 }
 0x4d7   :  { %7921 = vmatprep.subr.mxu0 %v11490_v60  ;;  %7960 = vmatprep.subr.mxu1 %v11490_v60 }
 0x4da   :  { %7922 = vmatpush3.xpose.msra.mxu0 %v9535_v44  ;;  %7961 = vmatpush3.xpose.msra.mxu1 %v9559_v27 }
 0x4db   :  { %7923 = vmatprep.subr.mxu0 %v11490_v60  ;;  %7962 = vmatprep.subr.mxu1 %v11490_v60 }
 0x4de   :  { %7924 = vmatpush3.xpose.msra.mxu0 %v9564_v9  ;;  %7963 = vmatpush3.xpose.msra.mxu1 %v9589_v51 }
 0x4df   :  { %7925 = vmatprep.subr.mxu0 %v11490_v60  ;;  %7964 = vmatprep.subr.mxu1 %v11490_v60 }
 0x4e2   :  { %7926 = vmatpush3.xpose.msra.mxu0 %v9575_v20  ;;  %7965 = vmatpush3.xpose.msra.mxu1 %v9603_v7 }
 0x4e3   :  { %7927 = vmatprep.subr.mxu0 %v11490_v60  ;;  %7966 = vmatprep.subr.mxu1 %v11490_v60 }
 0x4e6   :  { %7928 = vmatpush3.xpose.msra.mxu0 %v9601_v6  ;;  %7967 = vmatpush3.xpose.msra.mxu1 %v9611_v19 }
 0x4e7   :  { %7929 = vmatprep.subr.mxu0 %v11490_v60  ;;  %7968 = vmatprep.subr.mxu1 %v11490_v60 }
 0x4ea   :  { %7930 = vmatpush3.xpose.msra.mxu0 %v9620_v29  ;;  %7969 = vmatpush3.xpose.msra.mxu1 %v9631_v54 }
 0x4eb   :  { %7931 = vmatprep.subr.mxu0 %v11490_v60  ;;  %7970 = vmatprep.subr.mxu1 %v11490_v60 }
 0x4ee   :  { %7932 = vmatpush3.xpose.msra.mxu0 %v9629_v55  ;;  %7971 = vmatpush3.xpose.msra.mxu1 %v9654_v5 }
 0x4ef   :  { %7933 = vmatprep.subr.mxu0 %v11490_v60  ;;  %7972 = vmatprep.subr.mxu1 %v11490_v60 }
 0x4f2   :  { %7934 = vmatpush3.xpose.msra.mxu0 %v9649_v17  ;;  %7973 = vmatpush3.xpose.msra.mxu1 %v9662_v33 }
 0x4f3   :  { %7935 = vmatprep.subr.mxu0 %v11490_v60  ;;  %7974 = vmatprep.subr.mxu1 %v11490_v60 }
 0x4f6   :  { %7936 = vmatpush3.xpose.msra.mxu0 %v9669_v0  ;;  %7975 = vmatpush3.xpose.msra.mxu1 %v9691_v12 }
 0x4f7   :  { %7937 = vmatprep.subr.mxu0 %v11490_v60  ;;  %7976 = vmatprep.subr.mxu1 %v11490_v60 }
 0x4fa   :  { %7938 = vmatpush3.xpose.msra.mxu0 %v9679_v31  ;;  %7977 = vmatpush3.xpose.msra.mxu1 %v9705_v21 }
 0x4fb   :  { %7939 = vmatprep.subr.mxu0 %v11490_v60  ;;  %7978 = vmatprep.subr.mxu1 %v11490_v60 }
 0x4fe   :  { %7940 = vmatpush3.xpose.msra.mxu0 %v9701_v49  ;;  %7979 = vmatpush3.xpose.msra.mxu1 %v9726_v13 }
 0x4ff   :  { %7941 = vmatprep.subr.mxu0 %v11490_v60  ;;  %8018 = vmatprep.subr.mxu1 %v11490_v60 }
 0x501   :  { %7981 = vmatmul.mubr.f32.vlgmr.msra.gmra.mxu1 %v3223_v53  ;;  %v11518_v53 = vld [vmem:[#allocation36_spill] sm:$0xff] }
 0x502   :  { %7942 = vmatpush3.xpose.msra.mxu0 %v9717_v62  ;;  %8019 = vmatpush3.xpose.msra.mxu1 %v9465_v11 }
 0x503   :  { %7943 = vmatprep.subr.mxu0 %v11490_v60  ;;  %8020 = vmatprep.subr.mxu1 %v11490_v60 }
 0x504   :  { %8050 = vmatprep.mubr.msk.f32.mxu1 %vm8890_vm12, %v11490_v60 }
 0x506   :  { %7944 = vmatpush3.xpose.msra.mxu0 %v9734_v24  ;;  %8021 = vmatpush3.xpose.msra.mxu1 %v9480_v30 }
 0x507   :  { %7983 = vmatprep.subr.mxu0 %v11490_v60  ;;  %8022 = vmatprep.subr.mxu1 %v11490_v60 }
 0x509   :  { %7946 = vmatmul.mubr.f32.vlgmr.msra.gmra.mxu0 %v10104_v26  ;;  %v11517_v26 = vld [vmem:[#allocation23_spill] sm:$0xff] }
 0x50a   :  { %7984 = vmatpush3.xpose.msra.mxu0 %v9488_v42  ;;  %8023 = vmatpush3.xpose.msra.mxu1 %v9482_v35 }
 0x50b   :  { %7985 = vmatprep.subr.mxu0 %v11490_v60  ;;  %8024 = vmatprep.subr.mxu1 %v11490_v60 }
 0x50c   :  { %8015 = vmatprep.mubr.msk.f32.mxu0 %vm8890_vm12, %v11490_v60 }
 0x50e   :  { %7986 = vmatpush3.xpose.msra.mxu0 %v9503_v15  ;;  %8025 = vmatpush3.xpose.msra.mxu1 %v9497_v59 }
 0x50f   :  { %7987 = vmatprep.subr.mxu0 %v11490_v60  ;;  %8026 = vmatprep.subr.mxu1 %v11490_v60 }
 0x512   :  { %7988 = vmatpush3.xpose.msra.mxu0 %v9526_v38  ;;  %8027 = vmatpush3.xpose.msra.mxu1 %v9514_v52 }
 0x513   :  { %7989 = vmatprep.subr.mxu0 %v11490_v60  ;;  %8028 = vmatprep.subr.mxu1 %v11490_v60 }
 0x515   :  { %v3813_v45 = vpop.permute.xlu0 %3812  ;;  %v3811_v40 = vpop.permute.xlu1 %3810 }
 0x516   :  { %7990 = vmatpush3.xpose.msra.mxu0 %v9541_v58  ;;  %8029 = vmatpush3.xpose.msra.mxu1 %v9545_v56  ;;  %v10271_v23 = vand.u32 4294901760, %v3813_v45  ;;  %v10273_v14 = vand.u32 4294901760, %v3811_v40 }
 0x517   :  { %7991 = vmatprep.subr.mxu0 %v11490_v60  ;;  %8030 = vmatprep.subr.mxu1 %v11490_v60 }
 0x518   :  { %v10276_v63 = vsub.f32 %v3813_v45, %v10271_v23  ;;  %v10279_v4 = vsub.f32 %v3811_v40, %v10273_v14 }
 0x519   :  { %v3809_v57 = vpop.permute.xlu0 %3808  ;;  %v3807_v47 = vpop.permute.xlu1 %3806 }
 0x51a   :  { %7992 = vmatpush3.xpose.msra.mxu0 %v11517_v26  ;;  %8031 = vmatpush3.xpose.msra.mxu1 %v9559_v27 }
 0x51b   :  { %7993 = vmatprep.subr.mxu0 %v11490_v60  ;;  %8032 = vmatprep.subr.mxu1 %v11490_v60 }
 0x51e   :  { %7994 = vmatpush3.xpose.msra.mxu0 %v11518_v53  ;;  %8033 = vmatpush3.xpose.msra.mxu1 %v9589_v51 }
 0x51f   :  { %7995 = vmatprep.subr.mxu0 %v11490_v60  ;;  %8034 = vmatprep.subr.mxu1 %v11490_v60 }
 0x522   :  { %7996 = vmatpush3.xpose.msra.mxu0 %v11519_v50  ;;  %8035 = vmatpush3.xpose.msra.mxu1 %v9603_v7 }
 0x523   :  { %7997 = vmatprep.subr.mxu0 %v11490_v60  ;;  %8036 = vmatprep.subr.mxu1 %v11490_v60 }
 0x526   :  { %7998 = vmatpush3.xpose.msra.mxu0 %v11520_v2  ;;  %8037 = vmatpush3.xpose.msra.mxu1 %v9611_v19 }
 0x527   :  { %7999 = vmatprep.subr.mxu0 %v11490_v60  ;;  %8038 = vmatprep.subr.mxu1 %v11490_v60 }
 0x52a   :  { %8000 = vmatpush3.xpose.msra.mxu0 %v11521_v46  ;;  %8039 = vmatpush3.xpose.msra.mxu1 %v9631_v54 }
 0x52b   :  { %8001 = vmatprep.subr.mxu0 %v11490_v60  ;;  %8040 = vmatprep.subr.mxu1 %v11490_v60 }
 0x52e   :  { %8002 = vmatpush3.xpose.msra.mxu0 %v11522_v1  ;;  %8041 = vmatpush3.xpose.msra.mxu1 %v9654_v5  ;;  %v3803_v1 = vpop.permute.xlu1 %3802 }
 0x52f   :  { %8003 = vmatprep.subr.mxu0 %v11490_v60  ;;  %8042 = vmatprep.subr.mxu1 %v11490_v60  ;;  %v10315_v2 = vand.u32 4294901760, %v3803_v1 }
 0x531   :  { %v10327_v58 = vsub.f32 %v3803_v1, %v10315_v2 }
 0x532   :  { %8004 = vmatpush3.xpose.msra.mxu0 %v11523_v3  ;;  %8043 = vmatpush3.xpose.msra.mxu1 %v9662_v33  ;;  %v3805_v3 = vpop.permute.xlu0 %3804 }
 0x533   :  { %8005 = vmatprep.subr.mxu0 %v11490_v60  ;;  %8044 = vmatprep.subr.mxu1 %v11490_v60  ;;  %v10340_v1 = vand.u32 4294901760, %v10327_v58 }
 0x535   :  { %11536 = vst [vmem:[#allocation88_spill] sm:$0xff] %v10340_v1 }
 0x536   :  { %8006 = vmatpush3.xpose.msra.mxu0 %v11524_v41  ;;  %8045 = vmatpush3.xpose.msra.mxu1 %v9691_v12 }
 0x537   :  { %8007 = vmatprep.subr.mxu0 %v11490_v60  ;;  %8046 = vmatprep.subr.mxu1 %v11490_v60 }
 0x53a   :  { %8008 = vmatpush3.xpose.msra.mxu0 %v11525_v22  ;;  %8047 = vmatpush3.xpose.msra.mxu1 %v9705_v21 }
 0x53b   :  { %8009 = vmatprep.subr.mxu0 %v11490_v60  ;;  %8048 = vmatprep.subr.mxu1 %v11490_v60 }
 0x53e   :  { %8010 = vmatpush3.xpose.msra.mxu0 %v11526_v25  ;;  %8049 = vmatpush3.xpose.msra.mxu1 %v9726_v13  ;;  %v10291_v25 = vand.u32 4294901760, %v3807_v47 }
 0x53f   :  { %8011 = vmatprep.subr.mxu0 %v11490_v60  ;;  %8088 = vmatprep.subr.mxu1 %v11490_v60 }
 0x540   :  { %v10299_v40 = vsub.f32 %v3807_v47, %v10291_v25  ;;  %v10313_v47 = vand.u32 4294901760, %v3805_v3 }
 0x541   :  { %8051 = vmatmul.mubr.f32.vlgmr.msra.gmra.mxu1 %v10100_v8 }
 0x542   :  { %8012 = vmatpush3.xpose.msra.mxu0 %v11527_v10  ;;  %8120 = vmatprep.mubr.msk.f32.mxu1 %vm8890_vm12, %v11490_v60  ;;  %v10289_v10 = vand.u32 4294901760, %v3809_v57  ;;  %v10324_v26 = vsub.f32 %v3805_v3, %v10313_v47 }
 0x543   :  { %8013 = vmatprep.subr.mxu0 %v11490_v60 }
 0x544   :  { %v10296_v45 = vsub.f32 %v3809_v57, %v10289_v10  ;;  %v10311_v57 = vand.u32 4294901760, %v10299_v40  ;;  %v10337_v3 = vand.u32 4294901760, %v10324_v26 }
 0x546   :  { %8014 = vmatpush3.xpose.msra.mxu0 %v11528_v37  ;;  %v10287_v37 = vand.u32 4294901760, %v10279_v4  ;;  %v10308_v46 = vand.u32 4294901760, %v10296_v45  ;;  %11532 = vst [vmem:[#allocation84_spill] sm:$0xff] %v10311_v57  ;;  %v3946_v15 = vsub.f32 %v10299_v40, %v10311_v57  ;;  %11535 = vst [vmem:[#allocation87_spill] sm:$0xff] %v10337_v3  ;;  %v3953_v0 = vsub.f32 %v10324_v26, %v10337_v3 }
 0x547   :  { %8053 = vmatprep.subr.mxu0 %v11490_v60 }
 0x548   :  { %11530 = vst [vmem:[#allocation82_spill] sm:$0xff] %v10287_v37  ;;  %v3932_v41 = vsub.f32 %v10279_v4, %v10287_v37  ;;  %11531 = vst [vmem:[#allocation83_spill] sm:$0xff] %v10308_v46  ;;  %v3939_v38 = vsub.f32 %v10296_v45, %v10308_v46  ;;  %v10351_v62 = vand.u32 4294901760, %v3946_v15  ;;  %v10376_v17 = vand.u32 4294901760, %v3953_v0 }
 0x549   :  { %8016 = vmatmul.mubr.f32.vlgmr.msra.gmra.mxu0 %v10100_v8  ;;  %v10284_v8 = vand.u32 4294901760, %v10276_v63 }
 0x54a   :  { %8085 = vmatprep.mubr.msk.f32.mxu0 %vm8890_vm12, %v11490_v60  ;;  %8054 = vmatpush3.msra.mxu0 %v10271_v23  ;;  %v10320_v53 = vand.u32 4294901760, %v3932_v41  ;;  %v3801_v41 = vpop.permute.xlu0 %3800  ;;  %11538 = vst [vmem:[#allocation90_spill] sm:$0xff] %v10351_v62  ;;  %11541 = vst [vmem:[#allocation93_spill] sm:$0xff] %v10376_v17 }
 0x54b   :  { %8055 = vmatprep.subr.mxu0 %v11490_v60  ;;  %11529 = vst [vmem:[#allocation78_spill] sm:$0xff] %v10284_v8  ;;  %v3925_v22 = vsub.f32 %v10276_v63, %v10284_v8  ;;  %v10342_v42 = vand.u32 4294901760, %v3801_v41 }
 0x54c   :  { %8056 = vmatpush3.msra.mxu0 %v10273_v14  ;;  %11534 = vst [vmem:[#allocation86_spill] sm:$0xff] %v10320_v53 }
 0x54d   :  { %8057 = vmatprep.subr.mxu0 %v11490_v60  ;;  %v10318_v50 = vand.u32 4294901760, %v3925_v22  ;;  %v3799_v22 = vpop.permute.xlu1 %3798  ;;  %v10355_v49 = vsub.f32 %v3801_v41, %v10342_v42 }
 0x54e   :  { %8058 = vmatpush3.msra.mxu0 %v10289_v10  ;;  %v10345_v24 = vand.u32 4294901760, %v3799_v22  ;;  %v3797_v15 = vpop.permute.xlu0 %3796 }
 0x54f   :  { %8059 = vmatprep.subr.mxu0 %v11490_v60  ;;  %11533 = vst [vmem:[#allocation85_spill] sm:$0xff] %v10318_v50  ;;  %8089 = vmatpush3.msra.mxu1 %v10318_v50  ;;  %v10349_v50 = vand.u32 4294901760, %v3939_v38  ;;  %v10368_v41 = vand.u32 4294901760, %v10355_v49 }
 0x550   :  { %8060 = vmatpush3.msra.mxu0 %v10291_v25  ;;  %8090 = vmatprep.subr.mxu1 %v11490_v60  ;;  %v10358_v31 = vsub.f32 %v3799_v22, %v10345_v24 }
 0x551   :  { %8061 = vmatprep.subr.mxu0 %v11490_v60  ;;  %8091 = vmatpush3.msra.mxu1 %v10320_v53  ;;  %11537 = vst [vmem:[#allocation89_spill] sm:$0xff] %v10349_v50  ;;  %v3960_v53 = vsub.f32 %v10327_v58, %v10340_v1  ;;  %v3795_v38 = vpop.permute.xlu1 %3794  ;;  %11539 = vst [vmem:[#allocation91_spill] sm:$0xff] %v10368_v41  ;;  %v3967_v29 = vsub.f32 %v10355_v49, %v10368_v41 }
 0x552   :  { %8062 = vmatpush3.msra.mxu0 %v10313_v47  ;;  %8092 = vmatprep.subr.mxu1 %v11490_v60  ;;  %v10371_v22 = vand.u32 4294901760, %v10358_v31  ;;  %v3793_v20 = vpop.permute.xlu0 %3792  ;;  %v10390_v0 = vand.u32 4294901760, %v3795_v38 }
 0x553   :  { %8063 = vmatprep.subr.mxu0 %v11490_v60  ;;  %8093 = vmatpush3.msra.mxu1 %v10349_v50  ;;  %v10378_v55 = vand.u32 4294901760, %v3960_v53  ;;  %v10381_v50 = vand.u32 4294901760, %v3797_v15  ;;  %v10395_v53 = vand.u32 4294901760, %v3967_v29  ;;  %v10400_v44 = vand.u32 4294901760, %v3793_v20 }
 0x554   :  { %8064 = vmatpush3.msra.mxu0 %v10315_v2  ;;  %11540 = vst [vmem:[#allocation92_spill] sm:$0xff] %v10371_v22  ;;  %8094 = vmatprep.subr.mxu1 %v11490_v60  ;;  %v3974_v6 = vsub.f32 %v10358_v31, %v10371_v22 }
 0x555   :  { %8065 = vmatprep.subr.mxu0 %v11490_v60  ;;  %8095 = vmatpush3.msra.mxu1 %v10351_v62  ;;  %11542 = vst [vmem:[#allocation94_spill] sm:$0xff] %v10378_v55  ;;  %v3791_v62 = vpop.permute.xlu1 %3790  ;;  %11543 = vst [vmem:[#allocation95_spill] sm:$0xff] %v10395_v53  ;;  %v10433_v48 = vsub.f32 %v3793_v20, %v10400_v44 }
 0x556   :  { %8066 = vmatpush3.msra.mxu0 %v10342_v42  ;;  %8096 = vmatprep.subr.mxu1 %v11490_v60  ;;  %v10397_v9 = vand.u32 4294901760, %v3974_v6  ;;  %v10406_v34 = vand.u32 4294901760, %v3791_v62 }
 0x557   :  { %8067 = vmatprep.subr.mxu0 %v11490_v60  ;;  %8097 = vmatpush3.msra.mxu1 %v10376_v17  ;;  %v3789_v17 = vpop.permute.xlu0 %3788  ;;  %11548 = vst [vmem:[#allocation100_spill] sm:$0xff] %v10433_v48  ;;  %v10442_v21 = vand.u32 4294901760, %v10433_v48 }
 0x558   :  { %8068 = vmatpush3.msra.mxu0 %v10345_v24  ;;  %8098 = vmatprep.subr.mxu1 %v11490_v60  ;;  %11544 = vst [vmem:[#allocation96_spill] sm:$0xff] %v10397_v9  ;;  %v10412_v29 = vand.u32 4294901760, %v3789_v17  ;;  %v10436_v18 = vsub.f32 %v3791_v62, %v10406_v34 }
 0x559   :  { %8069 = vmatprep.subr.mxu0 %v11490_v60  ;;  %8099 = vmatpush3.msra.mxu1 %v10378_v55  ;;  %v3787_v6 = vpop.permute.xlu1 %3786  ;;  %v10427_v55 = vsub.f32 %v3795_v38, %v10390_v0  ;;  %11551 = vst [vmem:[#allocation103_spill] sm:$0xff] %v10442_v21 }
 0x55a   :  { %8070 = vmatpush3.msra.mxu0 %v10381_v50  ;;  %8100 = vmatprep.subr.mxu1 %v11490_v60  ;;  %11549 = vst [vmem:[#allocation101_spill] sm:$0xff] %v10436_v18  ;;  %v10448_v38 = vsub.f32 %v3789_v17, %v10412_v29 }
 0x55b   :  { %8071 = vmatprep.subr.mxu0 %v11490_v60  ;;  %8101 = vmatpush3.msra.mxu1 %v10395_v53  ;;  %v10417_v53 = vand.u32 4294901760, %v3787_v6  ;;  %11546 = vst [vmem:[#allocation98_spill] sm:$0xff] %v10427_v55  ;;  %v10439_v13 = vand.u32 4294901760, %v10427_v55  ;;  %v3785_v5 = vpop.permute.xlu0 %3784 }
 0x55c   :  { %8072 = vmatpush3.msra.mxu0 %v10390_v0  ;;  %8102 = vmatprep.subr.mxu1 %v11490_v60  ;;  %11553 = vst [vmem:[#allocation105_spill] sm:$0xff] %v10448_v38  ;;  %v10459_v19 = vand.u32 4294901760, %v3785_v5  ;;  %v10462_v51 = vand.u32 4294901760, %v10448_v38 }
 0x55d   :  { %8073 = vmatprep.subr.mxu0 %v11490_v60  ;;  %8103 = vmatpush3.msra.mxu1 %v10397_v9  ;;  %v10424_v9 = vsub.f32 %v3797_v15, %v10381_v50  ;;  %11550 = vst [vmem:[#allocation102_spill] sm:$0xff] %v10439_v13  ;;  %v10445_v15 = vand.u32 4294901760, %v10436_v18  ;;  %v10453_v33 = vsub.f32 %v3787_v6, %v10417_v53  ;;  %v3783_v27 = vpop.permute.xlu1 %3782 }
 0x55e   :  { %8074 = vmatpush3.msra.mxu0 %v10400_v44  ;;  %8104 = vmatprep.subr.mxu1 %v11490_v60  ;;  %v3988_v54 = vsub.f32 %v10427_v55, %v10439_v13  ;;  %11556 = vst [vmem:[#allocation108_spill] sm:$0xff] %v10462_v51  ;;  %v3995_v6 = vsub.f32 %v10433_v48, %v10442_v21 }
 0x55f   :  { %8075 = vmatprep.subr.mxu0 %v11490_v60  ;;  %11545 = vst [vmem:[#allocation97_spill] sm:$0xff] %v10424_v9  ;;  %v10430_v16 = vand.u32 4294901760, %v10424_v9  ;;  %11552 = vst [vmem:[#allocation104_spill] sm:$0xff] %v10445_v15  ;;  %v10472_v56 = vsub.f32 %v3785_v5, %v10459_v19 }
 0x560   :  { %8076 = vmatpush3.msra.mxu0 %v10406_v34  ;;  %11554 = vst [vmem:[#allocation106_spill] sm:$0xff] %v10453_v33  ;;  %v10465_v17 = vand.u32 4294901760, %v3988_v54  ;;  %v10482_v54 = vand.u32 4294901760, %v3995_v6  ;;  %v4009_v6 = vsub.f32 %v10448_v38, %v10462_v51 }
 0x561   :  { %8077 = vmatprep.subr.mxu0 %v11490_v60  ;;  %11547 = vst [vmem:[#allocation99_spill] sm:$0xff] %v10430_v16  ;;  %v3981_v12 = vsub.f32 %v10424_v9, %v10430_v16  ;;  %11558 = vst [vmem:[#allocation110_spill] sm:$0xff] %v10472_v56  ;;  %v10493_v59 = vand.u32 4294901760, %v10472_v56 }
 0x562   :  { %8078 = vmatpush3.msra.mxu0 %v10412_v29  ;;  %11557 = vst [vmem:[#allocation109_spill] sm:$0xff] %v10465_v17  ;;  %11560 = vst [vmem:[#allocation112_spill] sm:$0xff] %v10482_v54 }
 0x563   :  { %8079 = vmatprep.subr.mxu0 %v11490_v60  ;;  %v10455_v62 = vand.u32 4294901760, %v3981_v12  ;;  %v4002_v12 = vsub.f32 %v10436_v18, %v10445_v15  ;;  %11563 = vst [vmem:[#allocation115_spill] sm:$0xff] %v10493_v59  ;;  %v4023_v43 = vsub.f32 %v10472_v56, %v10493_v59 }
 0x564   :  { %8080 = vmatpush3.msra.mxu0 %v10417_v53 }
 0x565   :  { %8081 = vmatprep.subr.mxu0 %v11490_v60  ;;  %11555 = vst [vmem:[#allocation107_spill] sm:$0xff] %v10455_v62  ;;  %8105 = vmatpush3.msra.mxu1 %v10455_v62  ;;  %v10479_v62 = vand.u32 4294901760, %v10453_v33  ;;  %v10484_v52 = vand.u32 4294901760, %v4002_v12 }
 0x566   :  { %8106 = vmatprep.subr.mxu1 %v11490_v60  ;;  %8082 = vmatpush3.msra.mxu0 %v10459_v19 }
 0x567   :  { %11559 = vst [vmem:[#allocation111_spill] sm:$0xff] %v10479_v62  ;;  %8107 = vmatpush3.msra.mxu1 %v10465_v17  ;;  %11561 = vst [vmem:[#allocation113_spill] sm:$0xff] %v10484_v52  ;;  %8083 = vmatprep.subr.mxu0 %v11490_v60  ;;  %v10504_v17 = vand.u32 4294901760, %v4009_v6  ;;  %v4016_v35 = vsub.f32 %v10453_v33, %v10479_v62  ;;  %v10516_v6 = vand.u32 4294901760, %v4023_v43 }
 0x568   :  { %8108 = vmatprep.subr.mxu1 %v11490_v60 }
 0x569   :  { %8109 = vmatpush3.msra.mxu1 %v10482_v54  ;;  %11565 = vst [vmem:[#allocation117_spill] sm:$0xff] %v10504_v17  ;;  %v10510_v11 = vand.u32 4294901760, %v4016_v35  ;;  %11567 = vst [vmem:[#allocation119_spill] sm:$0xff] %v10516_v6 }
 0x56a   :  { %8110 = vmatprep.subr.mxu1 %v11490_v60 }
 0x56b   :  { %8111 = vmatpush3.msra.mxu1 %v10484_v52  ;;  %11566 = vst [vmem:[#allocation118_spill] sm:$0xff] %v10510_v11 }
 0x56c   :  { %8112 = vmatprep.subr.mxu1 %v11490_v60 }
 0x56d   :  { %8113 = vmatpush3.msra.mxu1 %v10504_v17 }
 0x56e   :  { %8114 = vmatprep.subr.mxu1 %v11490_v60 }
 0x56f   :  { %8115 = vmatpush3.msra.mxu1 %v10510_v11 }
 0x570   :  { %8116 = vmatprep.subr.mxu1 %v11490_v60 }
 0x571   :  { %8117 = vmatpush3.msra.mxu1 %v10516_v6 }
 0x572   :  { %8118 = vmatprep.subr.mxu1 %v11490_v60 }
 0x581   :  { %v3378_v20 = vpop.f32.mrf.mxu1 }
 0x583   :  { %v7912_v7 = vpop.f32.mrf.mxu1 }
 0x584   :  { %v10475_v7 = vand.u32 4294901760, %v3783_v27 }
 0x586   :  { %v10488_v5 = vsub.f32 %v3783_v27, %v10475_v7  ;;  %8084 = vmatpush3.msra.mxu0 %v10475_v7 }
 0x587   :  { %8123 = vmatprep.subr.mxu0 %v11490_v60 }
 0x588   :  { %11562 = vst [vmem:[#allocation114_spill] sm:$0xff] %v10488_v5  ;;  %v10501_v27 = vand.u32 4294901760, %v10488_v5 }
 0x589   :  { %v3227_v12 = vpop.f32.mrf.mxu0 }
 0x58a   :  { %11564 = vst [vmem:[#allocation116_spill] sm:$0xff] %v10501_v27  ;;  %v3379_v30 = vadd.f32 %v3378_v20, %v3227_v12  ;;  %v4030_v52 = vsub.f32 %v10488_v5, %v10501_v27 }
 0x58b   :  { %v7877_v54 = vpop.f32.mrf.mxu0 }
 0x58c   :  { %v10522_v20 = vand.u32 4294901760, %v4030_v52 }
 0x58e   :  { %11568 = vst [vmem:[#allocation120_spill] sm:$0xff] %v10522_v20  ;;  %8119 = vmatpush3.msra.mxu1 %v10522_v20 }
 0x58f   :  { %8158 = vmatprep.subr.mxu1 %v11490_v60 }
 0x5c1   :  { %v3571_v35 = vpop.f32.mrf.mxu1 }
 0x5c3   :  { %v7982_v54 = vpop.f32.mrf.mxu1 }
 0x5c4   :  { %v11572_v54 = vld [vmem:[#allocation115_spill] sm:$0xff] }
 0x5c9   :  { %v3482_v12 = vpop.f32.mrf.mxu0 }
 0x5ca   :  { %v3483_v43 = vadd.f32 %v3482_v12, %v3379_v30 }
 0x5cb   :  { %v7947_v11 = vpop.f32.mrf.mxu0 }
 0x5cc   :  { %v3572_v17 = vadd.f32 %v3571_v35, %v3483_v43  ;;  %v11571_v35 = vld [vmem:[#allocation26_spill] sm:$0xff]  ;;  %v11573_v43 = vld [vmem:[#allocation116_spill] sm:$0xff] }
 0x601   :  { %v3777_v61 = vpop.f32.mrf.mxu1 }
 0x603   :  { %v8052_v39 = vpop.f32.mrf.mxu1 }
 0x609   :  { %v3690_v27 = vpop.f32.mrf.mxu0 }
 0x60a   :  { %v3691_v59 = vadd.f32 %v3690_v27, %v3572_v17 }
 0x60b   :  { %v8017_v28 = vpop.f32.mrf.mxu0 }
 0x60c   :  { %v3778_v6 = vadd.f32 %v3777_v61, %v3691_v59  ;;  %v4503_v61 = vand.u32 4294901760, %v9973_v36 }
 0x60e   :  { %v3781_v52 = vmul.f32 %v3778_v6, %v10097_v32  ;;  %v10638_v28 = vsub.f32 %v9973_v36, %v4503_v61  ;;  %v11569_v32 = vld [vmem:[#allocation81_spill] sm:$0xff] }
 0x60f   :  { %v4949_v17 = vand.u32 4294901760, %v11569_v32 }
 0x610   :  { %v10528_v62 = vand.u32 4294901760, %v3781_v52  ;;  %v4581_v39 = vand.u32 4294901760, %v10638_v28 }
 0x611   :  { %v5026_v6 = vsub.f32 %v11569_v32, %v4949_v17  ;;  %v11581_v32 = vld [vmem:[#allocation14_spill] sm:$0xff] }
 0x612   :  { %v10531_v20 = vsub.f32 %v3781_v52, %v10528_v62  ;;  %8121 = vmatmul.mubr.f32.vlgmr.msra.gmra.mxu1 %v10528_v62  ;;  %v4582_v36 = vsub.f32 %v10638_v28, %v4581_v39 }
 0x613   :  { %8159 = vmatpush3.msra.mxu1 %v10271_v23  ;;  %8190 = vmatprep.mubr.msk.f32.mxu1 %vm8890_vm12, %v11490_v60  ;;  %v5027_v12 = vand.u32 4294901760, %v5026_v6 }
 0x614   :  { %8160 = vmatprep.subr.mxu1 %v11490_v60  ;;  %v3913_v11 = vand.u32 4294901760, %v10531_v20  ;;  %v4583_v27 = vand.u32 4294901760, %v4582_v36  ;;  %v11580_v36 = vld [vmem:[#allocation35_spill] sm:$0xff] }
 0x615   :  { %8161 = vmatpush3.msra.mxu1 %v10273_v14  ;;  %v5028_v52 = vsub.f32 %v5026_v6, %v5027_v12 }
 0x616   :  { %8162 = vmatprep.subr.mxu1 %v11490_v60  ;;  %v3914_v30 = vsub.f32 %v10531_v20, %v3913_v11 }
 0x617   :  { %8163 = vmatpush3.msra.mxu1 %v10289_v10 }
 0x618   :  { %8164 = vmatprep.subr.mxu1 %v11490_v60  ;;  %v3915_v59 = vand.u32 4294901760, %v3914_v30  ;;  %v11575_v30 = vld [vmem:[#allocation27_spill] sm:$0xff] }
 0x619   :  { %8165 = vmatpush3.msra.mxu1 %v10291_v25 }
 0x61a   :  { %8166 = vmatprep.subr.mxu1 %v11490_v60  ;;  %8086 = vmatmul.mubr.f32.vlgmr.msra.gmra.mxu0 %v3915_v59  ;;  %v11576_v59 = vld [vmem:[#allocation79_spill] sm:$0xff] }
 0x61b   :  { %8124 = vmatpush3.msra.mxu0 %v10276_v63  ;;  %8167 = vmatpush3.msra.mxu1 %v10313_v47 }
 0x61c   :  { %8125 = vmatprep.subr.mxu0 %v11490_v60  ;;  %8168 = vmatprep.subr.mxu1 %v11490_v60 }
 0x61d   :  { %8126 = vmatpush3.msra.mxu0 %v10279_v4  ;;  %8169 = vmatpush3.msra.mxu1 %v10315_v2 }
 0x61e   :  { %8127 = vmatprep.subr.mxu0 %v11490_v60  ;;  %8170 = vmatprep.subr.mxu1 %v11490_v60 }
 0x61f   :  { %8128 = vmatpush3.msra.mxu0 %v10296_v45  ;;  %8171 = vmatpush3.msra.mxu1 %v10342_v42 }
 0x620   :  { %8129 = vmatprep.subr.mxu0 %v11490_v60  ;;  %8172 = vmatprep.subr.mxu1 %v11490_v60 }
 0x621   :  { %8130 = vmatpush3.msra.mxu0 %v10299_v40  ;;  %8173 = vmatpush3.msra.mxu1 %v10345_v24 }
 0x622   :  { %8131 = vmatprep.subr.mxu0 %v11490_v60  ;;  %8174 = vmatprep.subr.mxu1 %v11490_v60 }
 0x623   :  { %8132 = vmatpush3.msra.mxu0 %v10324_v26  ;;  %8175 = vmatpush3.msra.mxu1 %v10381_v50 }
 0x624   :  { %8133 = vmatprep.subr.mxu0 %v11490_v60  ;;  %8176 = vmatprep.subr.mxu1 %v11490_v60 }
 0x625   :  { %8134 = vmatpush3.msra.mxu0 %v10327_v58  ;;  %8177 = vmatpush3.msra.mxu1 %v10390_v0 }
 0x626   :  { %8135 = vmatprep.subr.mxu0 %v11490_v60  ;;  %8178 = vmatprep.subr.mxu1 %v11490_v60 }
 0x627   :  { %8136 = vmatpush3.msra.mxu0 %v10355_v49  ;;  %8179 = vmatpush3.msra.mxu1 %v10400_v44 }
 0x628   :  { %8137 = vmatprep.subr.mxu0 %v11490_v60  ;;  %8180 = vmatprep.subr.mxu1 %v11490_v60 }
 0x629   :  { %8138 = vmatpush3.msra.mxu0 %v10358_v31  ;;  %8181 = vmatpush3.msra.mxu1 %v10406_v34 }
 0x62a   :  { %8139 = vmatprep.subr.mxu0 %v11490_v60  ;;  %8182 = vmatprep.subr.mxu1 %v11490_v60 }
 0x62b   :  { %8140 = vmatpush3.msra.mxu0 %v10424_v9  ;;  %8183 = vmatpush3.msra.mxu1 %v10412_v29 }
 0x62c   :  { %8141 = vmatprep.subr.mxu0 %v11490_v60  ;;  %8184 = vmatprep.subr.mxu1 %v11490_v60 }
 0x62d   :  { %8142 = vmatpush3.msra.mxu0 %v10427_v55  ;;  %8185 = vmatpush3.msra.mxu1 %v10417_v53 }
 0x62e   :  { %8143 = vmatprep.subr.mxu0 %v11490_v60  ;;  %8186 = vmatprep.subr.mxu1 %v11490_v60 }
 0x62f   :  { %8144 = vmatpush3.msra.mxu0 %v10433_v48  ;;  %8187 = vmatpush3.msra.mxu1 %v10459_v19 }
 0x630   :  { %8145 = vmatprep.subr.mxu0 %v11490_v60  ;;  %8188 = vmatprep.subr.mxu1 %v11490_v60 }
 0x631   :  { %8146 = vmatpush3.msra.mxu0 %v10436_v18  ;;  %8189 = vmatpush3.msra.mxu1 %v10475_v7 }
 0x632   :  { %8147 = vmatprep.subr.mxu0 %v11490_v60  ;;  %8191 = vmatmul.mubr.f32.vlgmr.msra.gmra.mxu1 %v3913_v11  ;;  %v11574_v11 = vld [vmem:[#allocation80_spill] sm:$0xff] }
 0x633   :  { %8228 = vmatprep.subr.mxu1 %v11490_v60  ;;  %8148 = vmatpush3.msra.mxu0 %v10448_v38 }
 0x634   :  { %8229 = vmatpush3.msra.mxu1 %v10271_v23  ;;  %8149 = vmatprep.subr.mxu0 %v11490_v60 }
 0x635   :  { %8230 = vmatprep.subr.mxu1 %v11490_v60  ;;  %8150 = vmatpush3.msra.mxu0 %v10453_v33 }
 0x636   :  { %8231 = vmatpush3.msra.mxu1 %v10273_v14  ;;  %8151 = vmatprep.subr.mxu0 %v11490_v60 }
 0x637   :  { %8232 = vmatprep.subr.mxu1 %v11490_v60  ;;  %8152 = vmatpush3.msra.mxu0 %v10472_v56 }
 0x638   :  { %8233 = vmatpush3.msra.mxu1 %v10289_v10  ;;  %8153 = vmatprep.subr.mxu0 %v11490_v60 }
 0x639   :  { %8234 = vmatprep.subr.mxu1 %v11490_v60  ;;  %8154 = vmatpush3.msra.mxu0 %v10488_v5 }
 0x63a   :  { %8155 = vmatprep.mubr.msk.f32.mxu0 %vm8890_vm12, %v11490_v60  ;;  %8235 = vmatpush3.msra.mxu1 %v10291_v25 }
 0x63b   :  { %8156 = vmatmul.mubr.f32.vlgmr.msra.gmra.mxu0 %v10531_v20  ;;  %8193 = vmatprep.subr.mxu0 %v11490_v60  ;;  %v11570_v20 = vld [vmem:[#allocation111_spill] sm:$0xff] }
 0x63c   :  { %8236 = vmatprep.subr.mxu1 %v11490_v60  ;;  %8194 = vmatpush3.msra.mxu0 %v10284_v8 }
 0x63d   :  { %8237 = vmatpush3.msra.mxu1 %v10313_v47  ;;  %8195 = vmatprep.subr.mxu0 %v11490_v60 }
 0x63e   :  { %8238 = vmatprep.subr.mxu1 %v11490_v60  ;;  %8196 = vmatpush3.msra.mxu0 %v10287_v37 }
 0x63f   :  { %8239 = vmatpush3.msra.mxu1 %v10315_v2  ;;  %8197 = vmatprep.subr.mxu0 %v11490_v60 }
 0x640   :  { %8240 = vmatprep.subr.mxu1 %v11490_v60  ;;  %8198 = vmatpush3.msra.mxu0 %v10308_v46 }
 0x641   :  { %8241 = vmatpush3.msra.mxu1 %v10342_v42  ;;  %8199 = vmatprep.subr.mxu0 %v11490_v60 }
 0x642   :  { %8242 = vmatprep.subr.mxu1 %v11490_v60  ;;  %8200 = vmatpush3.msra.mxu0 %v10311_v57 }
 0x643   :  { %8243 = vmatpush3.msra.mxu1 %v10345_v24  ;;  %8201 = vmatprep.subr.mxu0 %v11490_v60 }
 0x644   :  { %8244 = vmatprep.subr.mxu1 %v11490_v60  ;;  %8202 = vmatpush3.msra.mxu0 %v10337_v3 }
 0x645   :  { %8245 = vmatpush3.msra.mxu1 %v10381_v50  ;;  %8203 = vmatprep.subr.mxu0 %v11490_v60 }
 0x646   :  { %8246 = vmatprep.subr.mxu1 %v11490_v60  ;;  %8204 = vmatpush3.msra.mxu0 %v10340_v1 }
 0x647   :  { %8247 = vmatpush3.msra.mxu1 %v10390_v0  ;;  %8205 = vmatprep.subr.mxu0 %v11490_v60 }
 0x648   :  { %8248 = vmatprep.subr.mxu1 %v11490_v60  ;;  %8206 = vmatpush3.msra.mxu0 %v10368_v41 }
 0x649   :  { %8249 = vmatpush3.msra.mxu1 %v10400_v44  ;;  %8207 = vmatprep.subr.mxu0 %v11490_v60 }
 0x64a   :  { %8250 = vmatprep.subr.mxu1 %v11490_v60  ;;  %8208 = vmatpush3.msra.mxu0 %v10371_v22 }
 0x64b   :  { %8251 = vmatpush3.msra.mxu1 %v10406_v34  ;;  %8209 = vmatprep.subr.mxu0 %v11490_v60 }
 0x64c   :  { %8252 = vmatprep.subr.mxu1 %v11490_v60  ;;  %8210 = vmatpush3.msra.mxu0 %v10430_v16 }
 0x64d   :  { %8253 = vmatpush3.msra.mxu1 %v10412_v29  ;;  %8211 = vmatprep.subr.mxu0 %v11490_v60 }
 0x64e   :  { %8254 = vmatprep.subr.mxu1 %v11490_v60  ;;  %8212 = vmatpush3.msra.mxu0 %v10439_v13 }
 0x64f   :  { %8255 = vmatpush3.msra.mxu1 %v10417_v53  ;;  %8213 = vmatprep.subr.mxu0 %v11490_v60 }
 0x650   :  { %8256 = vmatprep.subr.mxu1 %v11490_v60  ;;  %8214 = vmatpush3.msra.mxu0 %v10442_v21 }
 0x651   :  { %8257 = vmatpush3.msra.mxu1 %v10459_v19  ;;  %8215 = vmatprep.subr.mxu0 %v11490_v60 }
 0x652   :  { %8258 = vmatprep.subr.mxu1 %v11490_v60  ;;  %8216 = vmatpush3.msra.mxu0 %v10445_v15 }
 0x653   :  { %8259 = vmatpush3.msra.mxu1 %v10475_v7  ;;  %8260 = vmatprep.mubr.msk.f32.mxu1 %vm8890_vm12, %v11490_v60 }
 0x654   :  { %8217 = vmatprep.subr.mxu0 %v11490_v60  ;;  %8261 = vmatmul.mubr.f32.vlgmr.msra.gmra.mxu1 %v10528_v62 }
 0x655   :  { %8268 = vmatprep.subr.mxu1 %v11490_v60  ;;  %8218 = vmatpush3.msra.mxu0 %v10462_v51 }
 0x656   :  { %8269 = vmatpush3.msra.mxu1 %v4583_v27  ;;  %8219 = vmatprep.subr.mxu0 %v11490_v60  ;;  %v11583_v27 = vld [vmem:[#allocation15_spill] sm:$0xff] }
 0x657   :  { %8220 = vmatpush3.msra.mxu0 %v11570_v20  ;;  %8270 = vmatprep.mubr.msk.f32.mxu1 %vm8890_vm12, %v11490_v60  ;;  %v11608_v20 = vld [vmem:[#allocation70_spill] sm:$0xff] }
 0x658   :  { %8278 = vmatprep.subr.mxu1 %v11490_v60  ;;  %8221 = vmatprep.subr.mxu0 %v11490_v60 }
 0x659   :  { %8271 = vmatmul.mubr.msk.f32.vlgmr.msra.gmra.mxu1 %vm2237_vm13, %v11571_v35  ;;  %8222 = vmatpush3.msra.mxu0 %v11572_v54  ;;  %v11606_v54 = vld [vmem:[#allocation77_spill] sm:$0xff] }
 0x65a   :  { %8279 = vmatpush3.msra.mxu1 %v4503_v61  ;;  %8223 = vmatprep.subr.mxu0 %v11490_v60 }
 0x65b   :  { %8224 = vmatpush3.msra.mxu0 %v11573_v43  ;;  %8225 = vmatprep.mubr.msk.f32.mxu0 %vm8890_vm12, %v11490_v60  ;;  %v11604_v43 = vld [vmem:[#allocation76_spill] sm:$0xff] }
 0x65c   :  { %8280 = vmatprep.mubr.msk.f32.mxu1 %vm8890_vm12, %v11490_v60  ;;  %8288 = vmatprep.subr.mxu1 %v11490_v60 }
 0x65d   :  { %8226 = vmatmul.mubr.f32.vlgmr.msra.gmra.mxu0 %v10528_v62  ;;  %8263 = vmatprep.subr.mxu0 %v11490_v60  ;;  %v5029_v62 = vand.u32 4294901760, %v5028_v52  ;;  %v11587_v52 = vld [vmem:[#allocation19_spill] sm:$0xff] }
 0x65e   :  { %8281 = vmatmul.mubr.f32.vlgmr.msra.gmra.mxu1 %v11574_v11  ;;  %8264 = vmatpush3.msra.mxu0 %v4503_v61 }
 0x65f   :  { %8289 = vmatpush3.msra.mxu1 %v4503_v61  ;;  %8265 = vmatprep.mubr.msk.f32.mxu0 %vm8890_vm12, %v11490_v60  ;;  %v11577_v61 = vld [vmem:[#allocation21_spill] sm:$0xff] }
 0x660   :  { %8273 = vmatprep.subr.mxu0 %v11490_v60  ;;  %8290 = vmatprep.mubr.msk.f32.mxu1 %vm8890_vm12, %v11490_v60 }
 0x661   :  { %8298 = vmatprep.subr.mxu1 %v11490_v60  ;;  %8266 = vmatmul.mubr.f32.vlgmr.msra.gmra.mxu0 %v11575_v30 }
 0x662   :  { %8274 = vmatpush3.msra.mxu0 %v10638_v28  ;;  %8291 = vmatmul.mubr.msk.f32.vlgmr.msra.gmra.mxu1 %vm2237_vm13, %v11571_v35  ;;  %v11578_v28 = vld [vmem:[#allocation32_spill] sm:$0xff] }
 0x663   :  { %8299 = vmatpush3.msra.mxu1 %v5029_v62  ;;  %8275 = vmatprep.mubr.msk.f32.mxu0 %vm8890_vm12, %v11490_v60  ;;  %v11590_v62 = vld [vmem:[#allocation53_spill] sm:$0xff] }
 0x664   :  { %8283 = vmatprep.subr.mxu0 %v11490_v60  ;;  %8300 = vmatprep.mubr.msk.f32.mxu1 %vm8890_vm12, %v11490_v60 }
 0x665   :  { %8308 = vmatprep.subr.mxu1 %v11490_v60  ;;  %8276 = vmatmul.mubr.f32.vlgmr.msra.gmra.mxu0 %v11576_v59 }
 0x666   :  { %8284 = vmatpush3.msra.mxu0 %v4581_v39  ;;  %8301 = vmatmul.mubr.msk.f32.vlgmr.msra.gmra.mxu1 %vm2237_vm13, %v11571_v35  ;;  %v11579_v39 = vld [vmem:[#allocation12_spill] sm:$0xff] }
 0x667   :  { %8309 = vmatpush3.msra.mxu1 %v4949_v17  ;;  %8285 = vmatprep.mubr.msk.f32.mxu0 %vm8890_vm12, %v11490_v60 }
 0x668   :  { %8293 = vmatprep.subr.mxu0 %v11490_v60  ;;  %8310 = vmatprep.mubr.msk.f32.mxu1 %vm8890_vm12, %v11490_v60 }
 0x669   :  { %8318 = vmatprep.subr.mxu1 %v11490_v60  ;;  %8286 = vmatmul.mubr.msk.f32.vlgmr.msra.gmra.mxu0 %vm2237_vm13, %v11571_v35 }
 0x66a   :  { %8294 = vmatpush3.msra.mxu0 %v4949_v17  ;;  %8311 = vmatmul.mubr.f32.vlgmr.msra.gmra.mxu1 %v11574_v11  ;;  %v11588_v11 = vld [vmem:[#allocation50_spill] sm:$0xff] }
 0x66b   :  { %8319 = vmatpush3.msra.mxu1 %v4949_v17  ;;  %8295 = vmatprep.mubr.msk.f32.mxu0 %vm8890_vm12, %v11490_v60  ;;  %v11582_v17 = vld [vmem:[#allocation37_spill] sm:$0xff] }
 0x66c   :  { %8303 = vmatprep.subr.mxu0 %v11490_v60  ;;  %8320 = vmatprep.mubr.msk.f32.mxu1 %vm8890_vm12, %v11490_v60 }
 0x66d   :  { %8358 = vmatprep.subr.mxu1 %v11490_v60  ;;  %8296 = vmatmul.mubr.f32.vlgmr.msra.gmra.mxu0 %v11575_v30  ;;  %v11589_v30 = vld [vmem:[#allocation33_spill] sm:$0xff] }
 0x66e   :  { %8304 = vmatpush3.msra.mxu0 %v5026_v6  ;;  %8321 = vmatmul.mubr.msk.f32.vlgmr.msra.gmra.mxu1 %vm2237_vm13, %v11571_v35  ;;  %v11584_v6 = vld [vmem:[#allocation40_spill] sm:$0xff] }
 0x66f   :  { %8359 = vmatpush3.xpose.msra.mxu1 %v11577_v61  ;;  %8305 = vmatprep.mubr.msk.f32.mxu0 %vm8890_vm12, %v11490_v60  ;;  %v11592_v61 = vld [vmem:[#allocation58_spill] sm:$0xff] }
 0x670   :  { %8313 = vmatprep.subr.mxu0 %v11490_v60  ;;  %8360 = vmatprep.subr.mxu1 %v11490_v60 }
 0x671   :  { %8306 = vmatmul.mubr.f32.vlgmr.msra.gmra.mxu0 %v11576_v59  ;;  %8390 = vmatprep.mubr.msk.f32.mxu1 %vm8890_vm12, %v11490_v60  ;;  %v11591_v59 = vld [vmem:[#allocation34_spill] sm:$0xff] }
 0x672   :  { %8314 = vmatpush3.msra.mxu0 %v5027_v12  ;;  %8315 = vmatprep.mubr.msk.f32.mxu0 %vm8890_vm12, %v11490_v60  ;;  %v11586_v12 = vld [vmem:[#allocation46_spill] sm:$0xff] }
 0x673   :  { %8361 = vmatpush3.xpose.msra.mxu1 %v11578_v28  ;;  %8323 = vmatprep.subr.mxu0 %v11490_v60  ;;  %v11593_v28 = vld [vmem:[#allocation38_spill] sm:$0xff] }
 0x674   :  { %8362 = vmatprep.subr.mxu1 %v11490_v60 }
 0x675   :  { %8316 = vmatmul.mubr.msk.f32.vlgmr.msra.gmra.mxu0 %vm2237_vm13, %v11571_v35  ;;  %v11585_v35 = vld [vmem:[#allocation18_spill] sm:$0xff] }
 0x676   :  { %8324 = vmatpush3.xpose.msra.mxu0 %v11579_v39  ;;  %8355 = vmatprep.mubr.msk.f32.mxu0 %vm8890_vm12, %v11490_v60 }
 0x677   :  { %8363 = vmatpush3.xpose.msra.mxu1 %v11580_v36  ;;  %8325 = vmatprep.subr.mxu0 %v11490_v60  ;;  %v11594_v36 = vld [vmem:[#allocation61_spill] sm:$0xff] }
 0x678   :  { %8364 = vmatprep.subr.mxu1 %v11490_v60 }
 0x67a   :  { %8326 = vmatpush3.xpose.msra.mxu0 %v11581_v32 }
 0x67b   :  { %8365 = vmatpush3.xpose.msra.mxu1 %v11582_v17  ;;  %8327 = vmatprep.subr.mxu0 %v11490_v60  ;;  %v11595_v17 = vld [vmem:[#allocation42_spill] sm:$0xff] }
 0x67c   :  { %8366 = vmatprep.subr.mxu1 %v11490_v60 }
 0x67e   :  { %8328 = vmatpush3.xpose.msra.mxu0 %v11583_v27 }
 0x67f   :  { %8367 = vmatpush3.xpose.msra.mxu1 %v11584_v6  ;;  %8329 = vmatprep.subr.mxu0 %v11490_v60  ;;  %v11596_v6 = vld [vmem:[#allocation65_spill] sm:$0xff] }
 0x680   :  { %8368 = vmatprep.subr.mxu1 %v11490_v60 }
 0x682   :  { %8330 = vmatpush3.xpose.msra.mxu0 %v11585_v35 }
 0x683   :  { %8369 = vmatpush3.xpose.msra.mxu1 %v11586_v12  ;;  %8331 = vmatprep.subr.mxu0 %v11490_v60  ;;  %v11597_v12 = vld [vmem:[#allocation43_spill] sm:$0xff] }
 0x684   :  { %8370 = vmatprep.subr.mxu1 %v11490_v60 }
 0x686   :  { %8332 = vmatpush3.xpose.msra.mxu0 %v11587_v52 }
 0x687   :  { %8371 = vmatpush3.xpose.msra.mxu1 %v11588_v11  ;;  %8333 = vmatprep.subr.mxu0 %v11490_v60  ;;  %v11598_v11 = vld [vmem:[#allocation69_spill] sm:$0xff] }
 0x688   :  { %8372 = vmatprep.subr.mxu1 %v11490_v60 }
 0x68a   :  { %8334 = vmatpush3.xpose.msra.mxu0 %v11589_v30 }
 0x68b   :  { %8373 = vmatpush3.xpose.msra.mxu1 %v11590_v62  ;;  %8335 = vmatprep.subr.mxu0 %v11490_v60  ;;  %v11599_v62 = vld [vmem:[#allocation48_spill] sm:$0xff] }
 0x68c   :  { %8374 = vmatprep.subr.mxu1 %v11490_v60 }
 0x68e   :  { %8336 = vmatpush3.xpose.msra.mxu0 %v11591_v59 }
 0x68f   :  { %8375 = vmatpush3.xpose.msra.mxu1 %v11592_v61  ;;  %8337 = vmatprep.subr.mxu0 %v11490_v60  ;;  %v11600_v61 = vld [vmem:[#allocation73_spill] sm:$0xff] }
 0x690   :  { %8376 = vmatprep.subr.mxu1 %v11490_v60 }
 0x692   :  { %8338 = vmatpush3.xpose.msra.mxu0 %v11593_v28 }
 0x693   :  { %8377 = vmatpush3.xpose.msra.mxu1 %v11594_v36  ;;  %8339 = vmatprep.subr.mxu0 %v11490_v60  ;;  %v11601_v36 = vld [vmem:[#allocation54_spill] sm:$0xff] }
 0x694   :  { %8378 = vmatprep.subr.mxu1 %v11490_v60 }
 0x696   :  { %8340 = vmatpush3.xpose.msra.mxu0 %v11595_v17 }
 0x697   :  { %8379 = vmatpush3.xpose.msra.mxu1 %v11596_v6  ;;  %8341 = vmatprep.subr.mxu0 %v11490_v60  ;;  %v11602_v6 = vld [vmem:[#allocation75_spill] sm:$0xff] }
 0x698   :  { %8380 = vmatprep.subr.mxu1 %v11490_v60 }
 0x69a   :  { %8342 = vmatpush3.xpose.msra.mxu0 %v11597_v12 }
 0x69b   :  { %8381 = vmatpush3.xpose.msra.mxu1 %v11598_v11  ;;  %8343 = vmatprep.subr.mxu0 %v11490_v60  ;;  %v11603_v11 = vld [vmem:[#allocation55_spill] sm:$0xff] }
 0x69c   :  { %8382 = vmatprep.subr.mxu1 %v11490_v60 }
 0x69e   :  { %8344 = vmatpush3.xpose.msra.mxu0 %v11599_v62 }
 0x69f   :  { %8383 = vmatpush3.xpose.msra.mxu1 %v11600_v61  ;;  %8345 = vmatprep.subr.mxu0 %v11490_v60  ;;  %v11605_v61 = vld [vmem:[#allocation62_spill] sm:$0xff] }
 0x6a0   :  { %8384 = vmatprep.subr.mxu1 %v11490_v60 }
 0x6a2   :  { %8346 = vmatpush3.xpose.msra.mxu0 %v11601_v36 }
 0x6a3   :  { %8385 = vmatpush3.xpose.msra.mxu1 %v11602_v6  ;;  %8347 = vmatprep.subr.mxu0 %v11490_v60  ;;  %v11607_v6 = vld [vmem:[#allocation66_spill] sm:$0xff] }
 0x6a4   :  { %8386 = vmatprep.subr.mxu1 %v11490_v60 }
 0x6a6   :  { %8348 = vmatpush3.xpose.msra.mxu0 %v11603_v11 }
 0x6a7   :  { %8387 = vmatpush3.xpose.msra.mxu1 %v11604_v43  ;;  %8349 = vmatprep.subr.mxu0 %v11490_v60 }
 0x6a8   :  { %8388 = vmatprep.subr.mxu1 %v11490_v60 }
 0x6aa   :  { %8350 = vmatpush3.xpose.msra.mxu0 %v11605_v61 }
 0x6ab   :  { %8389 = vmatpush3.xpose.msra.mxu1 %v11606_v54  ;;  %8351 = vmatprep.subr.mxu0 %v11490_v60 }
 0x6ac   :  { %8428 = vmatprep.subr.mxu1 %v11490_v60 }
 0x6ae   :  { %8352 = vmatpush3.xpose.msra.mxu0 %v11607_v6 }
 0x6af   :  { %8353 = vmatprep.subr.mxu0 %v11490_v60 }
 0x6b2   :  { %8354 = vmatpush3.xpose.msra.mxu0 %v11608_v20 }
 0x6b3   :  { %8393 = vmatprep.subr.mxu0 %v11490_v60 }
 0x6d2   :  { %v4068_v43 = vpop.f32.mrf.mxu1 }
 0x6d4   :  { %v8122_v51 = vpop.f32.mrf.mxu1 }
 0x6da   :  { %v3917_v15 = vpop.f32.mrf.mxu0 }
 0x6db   :  { %v4069_v1 = vadd.f32 %v4068_v43, %v3917_v15 }
 0x6dc   :  { %v8087_v21 = vpop.f32.mrf.mxu0 }
 0x6f2   :  { %v4261_v13 = vpop.f32.mrf.mxu1 }
 0x6f4   :  { %v8192_v16 = vpop.f32.mrf.mxu1 }
 0x6fb   :  { %v4172_v22 = vpop.f32.mrf.mxu0 }
 0x6fc   :  { %v4173_v57 = vadd.f32 %v4172_v22, %v4069_v1 }
 0x6fd   :  { %v8157_v54 = vpop.f32.mrf.mxu0 }
 0x6fe   :  { %v4262_v8 = vadd.f32 %v4261_v13, %v4173_v57 }
 0x714   :  { %v4467_v41 = vpop.f32.mrf.mxu1 }
 0x716   :  { %v8262_v3 = vpop.f32.mrf.mxu1 }
 0x719   :  { %v4620_v46 = vpop.f32.mrf.mxu1 }
 0x71b   :  { %v8272_v37 = vpop.f32.mrf.mxu1 }
 0x71d   :  { %v4380_v5 = vpop.f32.mrf.mxu0 }
 0x71e   :  { %v4381_v56 = vadd.f32 %v4380_v5, %v4262_v8  ;;  %v4768_v33 = vpop.f32.mrf.mxu1 }
 0x71f   :  { %v8227_v38 = vpop.f32.mrf.mxu0 }
 0x720   :  { %v4468_v18 = vadd.f32 %v4467_v41, %v4381_v56  ;;  %v8282_v48 = vpop.f32.mrf.mxu1 }
 0x721   :  { %v4544_v51 = vpop.f32.mrf.mxu0 }
 0x722   :  { %4471 = vst.msk [vmem:[#allocation8] sm:$0xff] %vm66_vm0, %v4468_v18  ;;  %v4621_v21 = vadd.f32 %v4620_v46, %v4544_v51  ;;  %v4914_v16 = vpop.f32.mrf.mxu1 }
 0x723   :  { %v8267_v55 = vpop.f32.mrf.mxu0 }
 0x724   :  { %v8292_v54 = vpop.f32.mrf.mxu1 }
 0x725   :  { %v4694_v9 = vpop.f32.mrf.mxu0 }
 0x726   :  { %v4695_v15 = vadd.f32 %v4694_v9, %v4621_v21  ;;  %v5066_v3 = vpop.f32.mrf.mxu1 }
 0x727   :  { %v8277_v1 = vpop.f32.mrf.mxu0 }
 0x728   :  { %v4769_v22 = vadd.f32 %v4768_v33, %v4695_v15  ;;  %v8302_v37 = vpop.f32.mrf.mxu1 }
 0x729   :  { %v4842_v13 = vpop.f32.mrf.mxu0 }
 0x72a   :  { %v4843_v57 = vadd.f32 %v4842_v13, %v4769_v22  ;;  %v5214_v8 = vpop.f32.mrf.mxu1 }
 0x72b   :  { %v8287_v5 = vpop.f32.mrf.mxu0 }
 0x72c   :  { %v10807_v38 = vadd.f32 %v4914_v16, %v4843_v57  ;;  %v8312_v48 = vpop.f32.mrf.mxu1 }
 0x72d   :  { %v4990_v56 = vpop.f32.mrf.mxu0 }
 0x72e   :  { %v5360_v41 = vpop.f32.mrf.mxu1  ;;  %v5067_v46 = vadd.f32 %v5066_v3, %v4990_v56 }
 0x72f   :  { %v8297_v18 = vpop.f32.mrf.mxu0 }
 0x730   :  { %v8322_v43 = vpop.f32.mrf.mxu1  ;;  %v11610_v18 = vld [vmem:[#allocation17_spill] sm:$0xff] }
 0x731   :  { %v5140_v55 = vpop.f32.mrf.mxu0  ;;  %v11612_v43 = vld [vmem:[#allocation20_spill] sm:$0xff] }
 0x732   :  { %v5141_v51 = vadd.f32 %v5140_v55, %v5067_v46  ;;  %v11611_v46 = vld [vmem:[#allocation29_spill] sm:$0xff]  ;;  %v11613_v55 = vld [vmem:[#allocation31_spill] sm:$0xff] }
 0x733   :  { %v8307_v54 = vpop.f32.mrf.mxu0 }
 0x734   :  { %v5215_v9 = vadd.f32 %v5214_v8, %v5141_v51  ;;  %v11614_v51 = vld [vmem:[#allocation24_spill] sm:$0xff]  ;;  %v11615_v54 = vld [vmem:[#allocation25_spill] sm:$0xff] }
 0x735   :  { %v5288_v21 = vpop.f32.mrf.mxu0 }
 0x736   :  { %v5289_v1 = vadd.f32 %v5288_v21, %v5215_v9  ;;  %v11616_v9 = vld [vmem:[#allocation41_spill] sm:$0xff] }
 0x737   :  { %v8317_v33 = vpop.f32.mrf.mxu0  ;;  %v11617_v21 = vld [vmem:[#allocation45_spill] sm:$0xff] }
 0x738   :  { %v5361_v15 = vadd.f32 %v5360_v41, %v5289_v1  ;;  %v11609_v41 = vld [vmem:[#allocation13_spill] sm:$0xff]  ;;  %v11618_v1 = vld [vmem:[#allocation47_spill] sm:$0xff]  ;;  %v11619_v33 = vld [vmem:[#allocation52_spill] sm:$0xff] }
 0x73a   :  { %8777 = vrcp.f32 %v5361_v15 }
 0x747   :  { %v8778_v22 = vpop.eup %8777 }
 0x748   :  { %v5365_v37 = vmul.f32 %v8778_v22, %v5361_v15  ;;  %v11620_v15 = vld [vmem:[#allocation57_spill] sm:$0xff] }
 0x74a   :  { %v5366_v13 = vsub.f32 2.0, %v5365_v37  ;;  %v11622_v37 = vld [vmem:[#allocation64_spill] sm:$0xff] }
 0x74c   :  { %v5367_v16 = vmul.f32 %v8778_v22, %v5366_v13  ;;  %v11621_v22 = vld [vmem:[#allocation59_spill] sm:$0xff]  ;;  %v11623_v13 = vld [vmem:[#allocation68_spill] sm:$0xff] }
 0x74e   :  { %v5369_v57 = vsel %vm1507_vm1, %v5367_v16, 0  ;;  %v11624_v16 = vld [vmem:[#allocation72_spill] sm:$0xff] }
 0x74f   :  { %v10810_v5 = vand.u32 4294901760, %v5369_v57 }
 0x751   :  { %8391 = vmatmul.mubr.f32.vlgmr.msra.gmra.mxu1 %v10810_v5  ;;  %v10814_v3 = vsub.f32 %v5369_v57, %v10810_v5  ;;  %v11625_v57 = vld [vmem:[#allocation16_spill] sm:$0xff] }
 0x752   :  { %8429 = vmatpush3.xpose.msra.mxu1 %v11579_v39  ;;  %8460 = vmatprep.mubr.msk.f32.mxu1 %vm8890_vm12, %v11490_v60 }
 0x753   :  { %8430 = vmatprep.subr.mxu1 %v11490_v60  ;;  %v5454_v8 = vand.u32 4294901760, %v10814_v3 }
 0x755   :  { %v5455_v48 = vsub.f32 %v10814_v3, %v5454_v8 }
 0x756   :  { %8431 = vmatpush3.xpose.msra.mxu1 %v11581_v32 }
 0x757   :  { %8432 = vmatprep.subr.mxu1 %v11490_v60  ;;  %v5456_v56 = vand.u32 4294901760, %v5455_v48  ;;  %v11644_v48 = vld [vmem:[#allocation90_spill] sm:$0xff] }
 0x759   :  { %8356 = vmatmul.mubr.f32.vlgmr.msra.gmra.mxu0 %v5456_v56  ;;  %v11645_v56 = vld [vmem:[#allocation93_spill] sm:$0xff] }
 0x75a   :  { %8394 = vmatpush3.xpose.msra.mxu0 %v11609_v41  ;;  %8433 = vmatpush3.xpose.msra.mxu1 %v11583_v27  ;;  %v11646_v41 = vld [vmem:[#allocation94_spill] sm:$0xff] }
 0x75b   :  { %8395 = vmatprep.subr.mxu0 %v11490_v60  ;;  %8434 = vmatprep.subr.mxu1 %v11490_v60 }
 0x75c   :  { %8425 = vmatprep.mubr.msk.f32.mxu0 %vm8890_vm12, %v11490_v60 }
 0x75e   :  { %8396 = vmatpush3.xpose.msra.mxu0 %v11610_v18  ;;  %8435 = vmatpush3.xpose.msra.mxu1 %v11585_v35  ;;  %v11648_v18 = vld [vmem:[#allocation96_spill] sm:$0xff] }
 0x75f   :  { %8397 = vmatprep.subr.mxu0 %v11490_v60  ;;  %8436 = vmatprep.subr.mxu1 %v11490_v60 }
 0x762   :  { %8398 = vmatpush3.xpose.msra.mxu0 %v11611_v46  ;;  %8437 = vmatpush3.xpose.msra.mxu1 %v11587_v52  ;;  %v11649_v46 = vld [vmem:[#allocation107_spill] sm:$0xff] }
 0x763   :  { %8399 = vmatprep.subr.mxu0 %v11490_v60  ;;  %8438 = vmatprep.subr.mxu1 %v11490_v60 }
 0x766   :  { %8400 = vmatpush3.xpose.msra.mxu0 %v11612_v43  ;;  %8439 = vmatpush3.xpose.msra.mxu1 %v11589_v30  ;;  %v11650_v43 = vld [vmem:[#allocation109_spill] sm:$0xff] }
 0x767   :  { %8401 = vmatprep.subr.mxu0 %v11490_v60  ;;  %8440 = vmatprep.subr.mxu1 %v11490_v60 }
 0x76a   :  { %8402 = vmatpush3.xpose.msra.mxu0 %v11613_v55  ;;  %8441 = vmatpush3.xpose.msra.mxu1 %v11591_v59  ;;  %v11651_v55 = vld [vmem:[#allocation112_spill] sm:$0xff] }
 0x76b   :  { %8403 = vmatprep.subr.mxu0 %v11490_v60  ;;  %8442 = vmatprep.subr.mxu1 %v11490_v60 }
 0x76e   :  { %8404 = vmatpush3.xpose.msra.mxu0 %v11614_v51  ;;  %8443 = vmatpush3.xpose.msra.mxu1 %v11593_v28  ;;  %v11652_v51 = vld [vmem:[#allocation113_spill] sm:$0xff] }
 0x76f   :  { %8405 = vmatprep.subr.mxu0 %v11490_v60  ;;  %8444 = vmatprep.subr.mxu1 %v11490_v60 }
 0x772   :  { %8406 = vmatpush3.xpose.msra.mxu0 %v11615_v54  ;;  %8445 = vmatpush3.xpose.msra.mxu1 %v11595_v17  ;;  %v11653_v54 = vld [vmem:[#allocation117_spill] sm:$0xff] }
 0x773   :  { %8407 = vmatprep.subr.mxu0 %v11490_v60  ;;  %8446 = vmatprep.subr.mxu1 %v11490_v60 }
 0x776   :  { %8408 = vmatpush3.xpose.msra.mxu0 %v11616_v9  ;;  %8447 = vmatpush3.xpose.msra.mxu1 %v11597_v12  ;;  %v11654_v9 = vld [vmem:[#allocation118_spill] sm:$0xff] }
 0x777   :  { %8409 = vmatprep.subr.mxu0 %v11490_v60  ;;  %8448 = vmatprep.subr.mxu1 %v11490_v60 }
 0x77a   :  { %8410 = vmatpush3.xpose.msra.mxu0 %v11617_v21  ;;  %8449 = vmatpush3.xpose.msra.mxu1 %v11599_v62  ;;  %v11655_v21 = vld [vmem:[#allocation119_spill] sm:$0xff] }
 0x77b   :  { %8411 = vmatprep.subr.mxu0 %v11490_v60  ;;  %8450 = vmatprep.subr.mxu1 %v11490_v60 }
 0x77e   :  { %8412 = vmatpush3.xpose.msra.mxu0 %v11618_v1  ;;  %8451 = vmatpush3.xpose.msra.mxu1 %v11601_v36  ;;  %v11656_v1 = vld [vmem:[#allocation120_spill] sm:$0xff] }
 0x77f   :  { %8413 = vmatprep.subr.mxu0 %v11490_v60  ;;  %8452 = vmatprep.subr.mxu1 %v11490_v60 }
 0x782   :  { %8414 = vmatpush3.xpose.msra.mxu0 %v11619_v33  ;;  %8453 = vmatpush3.xpose.msra.mxu1 %v11603_v11 }
 0x783   :  { %8415 = vmatprep.subr.mxu0 %v11490_v60  ;;  %8454 = vmatprep.subr.mxu1 %v11490_v60 }
 0x786   :  { %8416 = vmatpush3.xpose.msra.mxu0 %v11620_v15  ;;  %8455 = vmatpush3.xpose.msra.mxu1 %v11605_v61 }
 0x787   :  { %8417 = vmatprep.subr.mxu0 %v11490_v60  ;;  %8456 = vmatprep.subr.mxu1 %v11490_v60 }
 0x78a   :  { %8418 = vmatpush3.xpose.msra.mxu0 %v11621_v22  ;;  %8457 = vmatpush3.xpose.msra.mxu1 %v11607_v6 }
 0x78b   :  { %8419 = vmatprep.subr.mxu0 %v11490_v60  ;;  %8458 = vmatprep.subr.mxu1 %v11490_v60 }
 0x78e   :  { %8420 = vmatpush3.xpose.msra.mxu0 %v11622_v37  ;;  %8459 = vmatpush3.xpose.msra.mxu1 %v11608_v20 }
 0x78f   :  { %8421 = vmatprep.subr.mxu0 %v11490_v60  ;;  %8498 = vmatprep.subr.mxu1 %v11490_v60 }
 0x791   :  { %8461 = vmatmul.mubr.f32.vlgmr.msra.gmra.mxu1 %v5454_v8  ;;  %v11643_v8 = vld [vmem:[#allocation89_spill] sm:$0xff] }
 0x792   :  { %8422 = vmatpush3.xpose.msra.mxu0 %v11623_v13  ;;  %8499 = vmatpush3.xpose.msra.mxu1 %v11579_v39  ;;  %v11626_v39 = vld [vmem:[#allocation28_spill] sm:$0xff] }
 0x793   :  { %8423 = vmatprep.subr.mxu0 %v11490_v60  ;;  %8500 = vmatprep.subr.mxu1 %v11490_v60 }
 0x794   :  { %8530 = vmatprep.mubr.msk.f32.mxu1 %vm8890_vm12, %v11490_v60 }
 0x796   :  { %8424 = vmatpush3.xpose.msra.mxu0 %v11624_v16  ;;  %8501 = vmatpush3.xpose.msra.mxu1 %v11581_v32  ;;  %v11627_v32 = vld [vmem:[#allocation30_spill] sm:$0xff] }
 0x797   :  { %8463 = vmatprep.subr.mxu0 %v11490_v60  ;;  %8502 = vmatprep.subr.mxu1 %v11490_v60 }
 0x799   :  { %8426 = vmatmul.mubr.f32.vlgmr.msra.gmra.mxu0 %v10814_v3  ;;  %v11640_v3 = vld [vmem:[#allocation85_spill] sm:$0xff] }
 0x79a   :  { %8464 = vmatpush3.xpose.msra.mxu0 %v11625_v57  ;;  %8503 = vmatpush3.xpose.msra.mxu1 %v11583_v27  ;;  %v11628_v27 = vld [vmem:[#allocation22_spill] sm:$0xff] }
 0x79b   :  { %8465 = vmatprep.subr.mxu0 %v11490_v60  ;;  %8504 = vmatprep.subr.mxu1 %v11490_v60 }
 0x79c   :  { %8495 = vmatprep.mubr.msk.f32.mxu0 %vm8890_vm12, %v11490_v60 }
 0x79e   :  { %8466 = vmatpush3.xpose.msra.mxu0 %v11626_v39  ;;  %8505 = vmatpush3.xpose.msra.mxu1 %v11585_v35  ;;  %v11629_v35 = vld [vmem:[#allocation23_spill] sm:$0xff] }
 0x79f   :  { %8467 = vmatprep.subr.mxu0 %v11490_v60  ;;  %8506 = vmatprep.subr.mxu1 %v11490_v60 }
 0x7a2   :  { %8468 = vmatpush3.xpose.msra.mxu0 %v11627_v32  ;;  %8507 = vmatpush3.xpose.msra.mxu1 %v11587_v52  ;;  %v11630_v52 = vld [vmem:[#allocation36_spill] sm:$0xff] }
 0x7a3   :  { %8469 = vmatprep.subr.mxu0 %v11490_v60  ;;  %8508 = vmatprep.subr.mxu1 %v11490_v60 }
 0x7a6   :  { %8470 = vmatpush3.xpose.msra.mxu0 %v11628_v27  ;;  %8509 = vmatpush3.xpose.msra.mxu1 %v11589_v30  ;;  %v11631_v30 = vld [vmem:[#allocation39_spill] sm:$0xff] }
 0x7a7   :  { %8471 = vmatprep.subr.mxu0 %v11490_v60  ;;  %8510 = vmatprep.subr.mxu1 %v11490_v60 }
 0x7aa   :  { %8472 = vmatpush3.xpose.msra.mxu0 %v11629_v35  ;;  %8511 = vmatpush3.xpose.msra.mxu1 %v11591_v59  ;;  %v11632_v59 = vld [vmem:[#allocation44_spill] sm:$0xff] }
 0x7ab   :  { %8473 = vmatprep.subr.mxu0 %v11490_v60  ;;  %8512 = vmatprep.subr.mxu1 %v11490_v60 }
 0x7ae   :  { %8474 = vmatpush3.xpose.msra.mxu0 %v11630_v52  ;;  %8513 = vmatpush3.xpose.msra.mxu1 %v11593_v28  ;;  %v11633_v28 = vld [vmem:[#allocation49_spill] sm:$0xff] }
 0x7af   :  { %8475 = vmatprep.subr.mxu0 %v11490_v60  ;;  %8514 = vmatprep.subr.mxu1 %v11490_v60 }
 0x7b2   :  { %8476 = vmatpush3.xpose.msra.mxu0 %v11631_v30  ;;  %8515 = vmatpush3.xpose.msra.mxu1 %v11595_v17  ;;  %v11634_v17 = vld [vmem:[#allocation51_spill] sm:$0xff] }
 0x7b3   :  { %8477 = vmatprep.subr.mxu0 %v11490_v60  ;;  %8516 = vmatprep.subr.mxu1 %v11490_v60 }
 0x7b6   :  { %8478 = vmatpush3.xpose.msra.mxu0 %v11632_v59  ;;  %8517 = vmatpush3.xpose.msra.mxu1 %v11597_v12  ;;  %v11635_v12 = vld [vmem:[#allocation56_spill] sm:$0xff] }
 0x7b7   :  { %8479 = vmatprep.subr.mxu0 %v11490_v60  ;;  %8518 = vmatprep.subr.mxu1 %v11490_v60 }
 0x7ba   :  { %8480 = vmatpush3.xpose.msra.mxu0 %v11633_v28  ;;  %8519 = vmatpush3.xpose.msra.mxu1 %v11599_v62  ;;  %v11636_v62 = vld [vmem:[#allocation60_spill] sm:$0xff] }
 0x7bb   :  { %8481 = vmatprep.subr.mxu0 %v11490_v60  ;;  %8520 = vmatprep.subr.mxu1 %v11490_v60 }
 0x7be   :  { %8482 = vmatpush3.xpose.msra.mxu0 %v11634_v17  ;;  %8521 = vmatpush3.xpose.msra.mxu1 %v11601_v36  ;;  %v11637_v36 = vld [vmem:[#allocation63_spill] sm:$0xff] }
 0x7bf   :  { %8483 = vmatprep.subr.mxu0 %v11490_v60  ;;  %8522 = vmatprep.subr.mxu1 %v11490_v60 }
 0x7c2   :  { %8484 = vmatpush3.xpose.msra.mxu0 %v11635_v12  ;;  %8523 = vmatpush3.xpose.msra.mxu1 %v11603_v11  ;;  %v11638_v11 = vld [vmem:[#allocation67_spill] sm:$0xff] }
 0x7c3   :  { %8485 = vmatprep.subr.mxu0 %v11490_v60  ;;  %8524 = vmatprep.subr.mxu1 %v11490_v60 }
 0x7c6   :  { %8486 = vmatpush3.xpose.msra.mxu0 %v11636_v62  ;;  %8525 = vmatpush3.xpose.msra.mxu1 %v11605_v61  ;;  %v11639_v61 = vld [vmem:[#allocation71_spill] sm:$0xff] }
 0x7c7   :  { %8487 = vmatprep.subr.mxu0 %v11490_v60  ;;  %8526 = vmatprep.subr.mxu1 %v11490_v60 }
 0x7ca   :  { %8488 = vmatpush3.xpose.msra.mxu0 %v11637_v36  ;;  %8527 = vmatpush3.xpose.msra.mxu1 %v11607_v6  ;;  %v11641_v6 = vld [vmem:[#allocation86_spill] sm:$0xff] }
 0x7cb   :  { %8489 = vmatprep.subr.mxu0 %v11490_v60  ;;  %8528 = vmatprep.subr.mxu1 %v11490_v60 }
 0x7ce   :  { %8490 = vmatpush3.xpose.msra.mxu0 %v11638_v11  ;;  %8529 = vmatpush3.xpose.msra.mxu1 %v11608_v20  ;;  %v11642_v20 = vld [vmem:[#allocation74_spill] sm:$0xff] }
 0x7cf   :  { %8491 = vmatprep.subr.mxu0 %v11490_v60  ;;  %8568 = vmatprep.subr.mxu1 %v11490_v60 }
 0x7d1   :  { %8531 = vmatmul.mubr.f32.vlgmr.msra.gmra.mxu1 %v10810_v5 }
 0x7d2   :  { %8492 = vmatpush3.xpose.msra.mxu0 %v11639_v61  ;;  %8569 = vmatpush3.msra.mxu1 %v11640_v3 }
 0x7d3   :  { %8570 = vmatprep.subr.mxu1 %v11490_v60  ;;  %8493 = vmatprep.subr.mxu0 %v11490_v60 }
 0x7d4   :  { %8571 = vmatpush3.msra.mxu1 %v11641_v6  ;;  %8600 = vmatprep.mubr.msk.f32.mxu1 %vm8890_vm12, %v11490_v60 }
 0x7d5   :  { %8572 = vmatprep.subr.mxu1 %v11490_v60 }
 0x7d6   :  { %8494 = vmatpush3.xpose.msra.mxu0 %v11642_v20  ;;  %8573 = vmatpush3.msra.mxu1 %v11643_v8 }
 0x7d7   :  { %8574 = vmatprep.subr.mxu1 %v11490_v60  ;;  %8533 = vmatprep.subr.mxu0 %v11490_v60 }
 0x7d8   :  { %8575 = vmatpush3.msra.mxu1 %v11644_v48 }
 0x7d9   :  { %8496 = vmatmul.mubr.f32.vlgmr.msra.gmra.mxu0 %v10810_v5  ;;  %8576 = vmatprep.subr.mxu1 %v11490_v60  ;;  %v11647_v5 = vld [vmem:[#allocation95_spill] sm:$0xff] }
 0x7da   :  { %8534 = vmatpush3.msra.mxu0 %v10271_v23  ;;  %8577 = vmatpush3.msra.mxu1 %v11645_v56 }
 0x7db   :  { %8535 = vmatprep.subr.mxu0 %v11490_v60  ;;  %8578 = vmatprep.subr.mxu1 %v11490_v60 }
 0x7dc   :  { %8536 = vmatpush3.msra.mxu0 %v10273_v14  ;;  %8579 = vmatpush3.msra.mxu1 %v11646_v41 }
 0x7dd   :  { %8537 = vmatprep.subr.mxu0 %v11490_v60  ;;  %8580 = vmatprep.subr.mxu1 %v11490_v60 }
 0x7de   :  { %8538 = vmatpush3.msra.mxu0 %v10289_v10  ;;  %8581 = vmatpush3.msra.mxu1 %v11647_v5 }
 0x7df   :  { %8539 = vmatprep.subr.mxu0 %v11490_v60  ;;  %8582 = vmatprep.subr.mxu1 %v11490_v60 }
 0x7e0   :  { %8540 = vmatpush3.msra.mxu0 %v10291_v25  ;;  %8583 = vmatpush3.msra.mxu1 %v11648_v18 }
 0x7e1   :  { %8541 = vmatprep.subr.mxu0 %v11490_v60  ;;  %8584 = vmatprep.subr.mxu1 %v11490_v60 }
 0x7e2   :  { %8542 = vmatpush3.msra.mxu0 %v10313_v47  ;;  %8585 = vmatpush3.msra.mxu1 %v11649_v46 }
 0x7e3   :  { %8543 = vmatprep.subr.mxu0 %v11490_v60  ;;  %8586 = vmatprep.subr.mxu1 %v11490_v60 }
 0x7e4   :  { %8544 = vmatpush3.msra.mxu0 %v10315_v2  ;;  %8587 = vmatpush3.msra.mxu1 %v11650_v43 }
 0x7e5   :  { %8545 = vmatprep.subr.mxu0 %v11490_v60  ;;  %8588 = vmatprep.subr.mxu1 %v11490_v60 }
 0x7e6   :  { %8546 = vmatpush3.msra.mxu0 %v10342_v42  ;;  %8589 = vmatpush3.msra.mxu1 %v11651_v55 }
 0x7e7   :  { %8547 = vmatprep.subr.mxu0 %v11490_v60  ;;  %8590 = vmatprep.subr.mxu1 %v11490_v60 }
 0x7e8   :  { %8548 = vmatpush3.msra.mxu0 %v10345_v24  ;;  %8591 = vmatpush3.msra.mxu1 %v11652_v51 }
 0x7e9   :  { %8549 = vmatprep.subr.mxu0 %v11490_v60  ;;  %8592 = vmatprep.subr.mxu1 %v11490_v60 }
 0x7ea   :  { %8550 = vmatpush3.msra.mxu0 %v10381_v50  ;;  %8593 = vmatpush3.msra.mxu1 %v11653_v54 }
 0x7eb   :  { %8551 = vmatprep.subr.mxu0 %v11490_v60  ;;  %8594 = vmatprep.subr.mxu1 %v11490_v60 }
 0x7ec   :  { %8552 = vmatpush3.msra.mxu0 %v10390_v0  ;;  %8595 = vmatpush3.msra.mxu1 %v11654_v9 }
 0x7ed   :  { %8553 = vmatprep.subr.mxu0 %v11490_v60  ;;  %8596 = vmatprep.subr.mxu1 %v11490_v60 }
 0x7ee   :  { %8554 = vmatpush3.msra.mxu0 %v10400_v44  ;;  %8597 = vmatpush3.msra.mxu1 %v11655_v21 }
 0x7ef   :  { %8555 = vmatprep.subr.mxu0 %v11490_v60  ;;  %8598 = vmatprep.subr.mxu1 %v11490_v60 }
 0x7f0   :  { %8556 = vmatpush3.msra.mxu0 %v10406_v34  ;;  %8599 = vmatpush3.msra.mxu1 %v11656_v1 }
 0x7f1   :  { %8557 = vmatprep.subr.mxu0 %v11490_v60  ;;  %8638 = vmatprep.subr.mxu1 %v11490_v60 }
 0x7f2   :  { %8558 = vmatpush3.msra.mxu0 %v10412_v29  ;;  %8565 = vmatprep.mubr.msk.f32.mxu0 %vm8890_vm12, %v11490_v60 }
 0x7f3   :  { %8559 = vmatprep.subr.mxu0 %v11490_v60 }
 0x7f4   :  { %8560 = vmatpush3.msra.mxu0 %v10417_v53 }
 0x7f5   :  { %8561 = vmatprep.subr.mxu0 %v11490_v60 }
 0x7f6   :  { %8562 = vmatpush3.msra.mxu0 %v10459_v19 }
 0x7f7   :  { %8563 = vmatprep.subr.mxu0 %v11490_v60 }
 0x7f8   :  { %8564 = vmatpush3.msra.mxu0 %v10475_v7 }
 0x7f9   :  { %8603 = vmatprep.subr.mxu0 %v11490_v60 }
 0x811   :  { %v5609_v33 = vpop.f32.mrf.mxu1 }
 0x813   :  { %v8392_v15 = vpop.f32.mrf.mxu1 }
 0x819   :  { %v5458_v22 = vpop.f32.mrf.mxu0 }
 0x81a   :  { %v5610_v37 = vadd.f32 %v5609_v33, %v5458_v22 }
 0x81b   :  { %v8357_v13 = vpop.f32.mrf.mxu0 }
 0x851   :  { %v5802_v16 = vpop.f32.mrf.mxu1 }
 0x853   :  { %v8462_v57 = vpop.f32.mrf.mxu1 }
 0x859   :  { %v5713_v39 = vpop.f32.mrf.mxu0 }
 0x85a   :  { %v5714_v32 = vadd.f32 %v5713_v39, %v5610_v37 }
 0x85b   :  { %v8427_v27 = vpop.f32.mrf.mxu0 }
 0x85c   :  { %v5803_v35 = vadd.f32 %v5802_v16, %v5714_v32 }
 0x891   :  { %v6008_v52 = vpop.f32.mrf.mxu1 }
 0x893   :  { %v8532_v30 = vpop.f32.mrf.mxu1 }
 0x899   :  { %v5921_v59 = vpop.f32.mrf.mxu0 }
 0x89a   :  { %v5922_v28 = vadd.f32 %v5921_v59, %v5803_v35 }
 0x89b   :  { %v8497_v17 = vpop.f32.mrf.mxu0 }
 0x89c   :  { %v6009_v12 = vadd.f32 %v6008_v52, %v5922_v28 }
 0x89e   :  { %v6012_v62 = vmul.f32 %v6009_v12, %v10807_v38 }
 0x8a0   :  { %v11026_v36 = vand.u32 4294901760, %v6012_v62 }
 0x8a2   :  { %v11029_v11 = vsub.f32 %v6012_v62, %v11026_v36  ;;  %8601 = vmatmul.mubr.f32.vlgmr.msra.gmra.mxu1 %v11026_v36 }
 0x8a3   :  { %8639 = vmatpush3.msra.mxu1 %v10271_v23  ;;  %8670 = vmatprep.mubr.msk.f32.mxu1 %vm8890_vm12, %v11490_v60 }
 0x8a4   :  { %8640 = vmatprep.subr.mxu1 %v11490_v60  ;;  %v6096_v61 = vand.u32 4294901760, %v11029_v11 }
 0x8a5   :  { %8641 = vmatpush3.msra.mxu1 %v10273_v14 }
 0x8a6   :  { %8642 = vmatprep.subr.mxu1 %v11490_v60  ;;  %v6097_v38 = vsub.f32 %v11029_v11, %v6096_v61 }
 0x8a7   :  { %8643 = vmatpush3.msra.mxu1 %v10289_v10 }
 0x8a8   :  { %8644 = vmatprep.subr.mxu1 %v11490_v60  ;;  %v6098_v3 = vand.u32 4294901760, %v6097_v38 }
 0x8a9   :  { %8645 = vmatpush3.msra.mxu1 %v10291_v25 }
 0x8aa   :  { %8646 = vmatprep.subr.mxu1 %v11490_v60  ;;  %8566 = vmatmul.mubr.f32.vlgmr.msra.gmra.mxu0 %v6098_v3 }
 0x8ab   :  { %8604 = vmatpush3.msra.mxu0 %v10276_v63  ;;  %8647 = vmatpush3.msra.mxu1 %v10313_v47  ;;  %v11661_v63 = vld [vmem:[#allocation105_spill] sm:$0xff] }
 0x8ac   :  { %8605 = vmatprep.subr.mxu0 %v11490_v60  ;;  %8648 = vmatprep.subr.mxu1 %v11490_v60 }
 0x8ad   :  { %8606 = vmatpush3.msra.mxu0 %v10279_v4  ;;  %8649 = vmatpush3.msra.mxu1 %v10315_v2  ;;  %v11662_v4 = vld [vmem:[#allocation106_spill] sm:$0xff] }
 0x8ae   :  { %8607 = vmatprep.subr.mxu0 %v11490_v60  ;;  %8650 = vmatprep.subr.mxu1 %v11490_v60 }
 0x8af   :  { %8608 = vmatpush3.msra.mxu0 %v10296_v45  ;;  %8651 = vmatpush3.msra.mxu1 %v10342_v42  ;;  %v11663_v45 = vld [vmem:[#allocation110_spill] sm:$0xff] }
 0x8b0   :  { %8609 = vmatprep.subr.mxu0 %v11490_v60  ;;  %8652 = vmatprep.subr.mxu1 %v11490_v60 }
 0x8b1   :  { %8610 = vmatpush3.msra.mxu0 %v10299_v40  ;;  %8653 = vmatpush3.msra.mxu1 %v10345_v24  ;;  %v11668_v40 = vld [vmem:[#allocation84_spill] sm:$0xff] }
 0x8b2   :  { %8611 = vmatprep.subr.mxu0 %v11490_v60  ;;  %8654 = vmatprep.subr.mxu1 %v11490_v60 }
 0x8b3   :  { %8612 = vmatpush3.msra.mxu0 %v10324_v26  ;;  %8655 = vmatpush3.msra.mxu1 %v10381_v50  ;;  %v11660_v26 = vld [vmem:[#allocation101_spill] sm:$0xff] }
 0x8b4   :  { %8613 = vmatprep.subr.mxu0 %v11490_v60  ;;  %8656 = vmatprep.subr.mxu1 %v11490_v60 }
 0x8b5   :  { %8614 = vmatpush3.msra.mxu0 %v10327_v58  ;;  %8657 = vmatpush3.msra.mxu1 %v10390_v0  ;;  %v11657_v58 = vld [vmem:[#allocation97_spill] sm:$0xff] }
 0x8b6   :  { %8615 = vmatprep.subr.mxu0 %v11490_v60  ;;  %8658 = vmatprep.subr.mxu1 %v11490_v60 }
 0x8b7   :  { %8616 = vmatpush3.msra.mxu0 %v10355_v49  ;;  %8659 = vmatpush3.msra.mxu1 %v10400_v44  ;;  %v11658_v49 = vld [vmem:[#allocation98_spill] sm:$0xff] }
 0x8b8   :  { %8617 = vmatprep.subr.mxu0 %v11490_v60  ;;  %8660 = vmatprep.subr.mxu1 %v11490_v60 }
 0x8b9   :  { %8618 = vmatpush3.msra.mxu0 %v10358_v31  ;;  %8661 = vmatpush3.msra.mxu1 %v10406_v34  ;;  %v11659_v31 = vld [vmem:[#allocation100_spill] sm:$0xff] }
 0x8ba   :  { %8619 = vmatprep.subr.mxu0 %v11490_v60  ;;  %8662 = vmatprep.subr.mxu1 %v11490_v60 }
 0x8bb   :  { %8620 = vmatpush3.msra.mxu0 %v11657_v58  ;;  %8663 = vmatpush3.msra.mxu1 %v10412_v29 }
 0x8bc   :  { %8621 = vmatprep.subr.mxu0 %v11490_v60  ;;  %8664 = vmatprep.subr.mxu1 %v11490_v60 }
 0x8bd   :  { %8622 = vmatpush3.msra.mxu0 %v11658_v49  ;;  %8665 = vmatpush3.msra.mxu1 %v10417_v53 }
 0x8be   :  { %8623 = vmatprep.subr.mxu0 %v11490_v60  ;;  %8666 = vmatprep.subr.mxu1 %v11490_v60 }
 0x8bf   :  { %8624 = vmatpush3.msra.mxu0 %v11659_v31  ;;  %8667 = vmatpush3.msra.mxu1 %v10459_v19 }
 0x8c0   :  { %8625 = vmatprep.subr.mxu0 %v11490_v60  ;;  %8668 = vmatprep.subr.mxu1 %v11490_v60 }
 0x8c1   :  { %8626 = vmatpush3.msra.mxu0 %v11660_v26  ;;  %8669 = vmatpush3.msra.mxu1 %v10475_v7 }
 0x8c2   :  { %8627 = vmatprep.subr.mxu0 %v11490_v60  ;;  %8671 = vmatmul.mubr.f32.vlgmr.msra.gmra.mxu1 %v6096_v61 }
 0x8c3   :  { %8708 = vmatprep.subr.mxu1 %v11490_v60  ;;  %8628 = vmatpush3.msra.mxu0 %v11661_v63 }
 0x8c4   :  { %8709 = vmatpush3.msra.mxu1 %v10271_v23  ;;  %8629 = vmatprep.subr.mxu0 %v11490_v60  ;;  %v11664_v23 = vld [vmem:[#allocation114_spill] sm:$0xff] }
 0x8c5   :  { %8710 = vmatprep.subr.mxu1 %v11490_v60  ;;  %8630 = vmatpush3.msra.mxu0 %v11662_v4 }
 0x8c6   :  { %8711 = vmatpush3.msra.mxu1 %v10273_v14  ;;  %8631 = vmatprep.subr.mxu0 %v11490_v60  ;;  %v11665_v14 = vld [vmem:[#allocation78_spill] sm:$0xff] }
 0x8c7   :  { %8712 = vmatprep.subr.mxu1 %v11490_v60  ;;  %8632 = vmatpush3.msra.mxu0 %v11663_v45 }
 0x8c8   :  { %8713 = vmatpush3.msra.mxu1 %v10289_v10  ;;  %8633 = vmatprep.subr.mxu0 %v11490_v60  ;;  %v11666_v10 = vld [vmem:[#allocation82_spill] sm:$0xff] }
 0x8c9   :  { %8714 = vmatprep.subr.mxu1 %v11490_v60  ;;  %8634 = vmatpush3.msra.mxu0 %v11664_v23 }
 0x8ca   :  { %8635 = vmatprep.mubr.msk.f32.mxu0 %vm8890_vm12, %v11490_v60  ;;  %8715 = vmatpush3.msra.mxu1 %v10291_v25  ;;  %v11667_v25 = vld [vmem:[#allocation83_spill] sm:$0xff] }
 0x8cb   :  { %8636 = vmatmul.mubr.f32.vlgmr.msra.gmra.mxu0 %v11029_v11  ;;  %8673 = vmatprep.subr.mxu0 %v11490_v60 }
 0x8cc   :  { %8716 = vmatprep.subr.mxu1 %v11490_v60  ;;  %8674 = vmatpush3.msra.mxu0 %v11665_v14 }
 0x8cd   :  { %8717 = vmatpush3.msra.mxu1 %v10313_v47  ;;  %8675 = vmatprep.subr.mxu0 %v11490_v60  ;;  %v11673_v47 = vld [vmem:[#allocation99_spill] sm:$0xff] }
 0x8ce   :  { %8718 = vmatprep.subr.mxu1 %v11490_v60  ;;  %8676 = vmatpush3.msra.mxu0 %v11666_v10 }
 0x8cf   :  { %8719 = vmatpush3.msra.mxu1 %v10315_v2  ;;  %8677 = vmatprep.subr.mxu0 %v11490_v60  ;;  %v11669_v2 = vld [vmem:[#allocation87_spill] sm:$0xff] }
 0x8d0   :  { %8720 = vmatprep.subr.mxu1 %v11490_v60  ;;  %8678 = vmatpush3.msra.mxu0 %v11667_v25 }
 0x8d1   :  { %8721 = vmatpush3.msra.mxu1 %v10342_v42  ;;  %8679 = vmatprep.subr.mxu0 %v11490_v60  ;;  %v11670_v42 = vld [vmem:[#allocation88_spill] sm:$0xff] }
 0x8d2   :  { %8722 = vmatprep.subr.mxu1 %v11490_v60  ;;  %8680 = vmatpush3.msra.mxu0 %v11668_v40 }
 0x8d3   :  { %8723 = vmatpush3.msra.mxu1 %v10345_v24  ;;  %8681 = vmatprep.subr.mxu0 %v11490_v60  ;;  %v11671_v24 = vld [vmem:[#allocation91_spill] sm:$0xff] }
 0x8d4   :  { %8724 = vmatprep.subr.mxu1 %v11490_v60  ;;  %8682 = vmatpush3.msra.mxu0 %v11669_v2 }
 0x8d5   :  { %8725 = vmatpush3.msra.mxu1 %v10381_v50  ;;  %8683 = vmatprep.subr.mxu0 %v11490_v60  ;;  %v11672_v50 = vld [vmem:[#allocation92_spill] sm:$0xff] }
 0x8d6   :  { %8726 = vmatprep.subr.mxu1 %v11490_v60  ;;  %8684 = vmatpush3.msra.mxu0 %v11670_v42 }
 0x8d7   :  { %8727 = vmatpush3.msra.mxu1 %v10390_v0  ;;  %8685 = vmatprep.subr.mxu0 %v11490_v60  ;;  %v11676_v0 = vld [vmem:[#allocation104_spill] sm:$0xff] }
 0x8d8   :  { %8728 = vmatprep.subr.mxu1 %v11490_v60  ;;  %8686 = vmatpush3.msra.mxu0 %v11671_v24 }
 0x8d9   :  { %8729 = vmatpush3.msra.mxu1 %v10400_v44  ;;  %8687 = vmatprep.subr.mxu0 %v11490_v60  ;;  %v11674_v44 = vld [vmem:[#allocation102_spill] sm:$0xff] }
 0x8da   :  { %8730 = vmatprep.subr.mxu1 %v11490_v60  ;;  %8688 = vmatpush3.msra.mxu0 %v11672_v50 }
 0x8db   :  { %8731 = vmatpush3.msra.mxu1 %v10406_v34  ;;  %8689 = vmatprep.subr.mxu0 %v11490_v60  ;;  %v11675_v34 = vld [vmem:[#allocation103_spill] sm:$0xff] }
 0x8dc   :  { %8732 = vmatprep.subr.mxu1 %v11490_v60  ;;  %8690 = vmatpush3.msra.mxu0 %v11673_v47 }
 0x8dd   :  { %8733 = vmatpush3.msra.mxu1 %v10412_v29  ;;  %8691 = vmatprep.subr.mxu0 %v11490_v60  ;;  %v11679_v29 = vld [vmem:[#allocation115_spill] sm:$0xff] }
 0x8de   :  { %8734 = vmatprep.subr.mxu1 %v11490_v60  ;;  %8692 = vmatpush3.msra.mxu0 %v11674_v44 }
 0x8df   :  { %8735 = vmatpush3.msra.mxu1 %v10417_v53  ;;  %8693 = vmatprep.subr.mxu0 %v11490_v60  ;;  %v11677_v53 = vld [vmem:[#allocation108_spill] sm:$0xff] }
 0x8e0   :  { %8736 = vmatprep.subr.mxu1 %v11490_v60  ;;  %8694 = vmatpush3.msra.mxu0 %v11675_v34 }
 0x8e1   :  { %8737 = vmatpush3.msra.mxu1 %v10459_v19  ;;  %8695 = vmatprep.subr.mxu0 %v11490_v60  ;;  %v11678_v19 = vld [vmem:[#allocation111_spill] sm:$0xff] }
 0x8e2   :  { %8738 = vmatprep.subr.mxu1 %v11490_v60  ;;  %8696 = vmatpush3.msra.mxu0 %v11676_v0 }
 0x8e3   :  { %8739 = vmatpush3.msra.mxu1 %v10475_v7  ;;  %8740 = vmatprep.mubr.msk.f32.mxu1 %vm8890_vm12, %v11490_v60  ;;  %v11680_v7 = vld [vmem:[#allocation116_spill] sm:$0xff] }
 0x8e4   :  { %8697 = vmatprep.subr.mxu0 %v11490_v60  ;;  %8741 = vmatmul.mubr.f32.vlgmr.msra.gmra.mxu1 %v11026_v36 }
 0x8e5   :  { %8698 = vmatpush3.msra.mxu0 %v11677_v53  ;;  %8705 = vmatprep.mubr.msk.f32.mxu0 %vm8890_vm12, %v11490_v60 }
 0x8e6   :  { %8699 = vmatprep.subr.mxu0 %v11490_v60 }
 0x8e7   :  { %8700 = vmatpush3.msra.mxu0 %v11678_v19 }
 0x8e8   :  { %8701 = vmatprep.subr.mxu0 %v11490_v60 }
 0x8e9   :  { %8702 = vmatpush3.msra.mxu0 %v11679_v29 }
 0x8ea   :  { %8703 = vmatprep.subr.mxu0 %v11490_v60 }
 0x8eb   :  { %8704 = vmatpush3.msra.mxu0 %v11680_v7 }
 0x8ec   :  { %8706 = vmatmul.mubr.f32.vlgmr.msra.gmra.mxu0 %v11026_v36 }
 0x962   :  { %v6251_v6 = vpop.f32.mrf.mxu1 }
 0x964   :  { %v8602_v20 = vpop.f32.mrf.mxu1 }
 0x96a   :  { %v6100_v8 = vpop.f32.mrf.mxu0 }
 0x96b   :  { %v6252_v43 = vadd.f32 %v6251_v6, %v6100_v8 }
 0x96c   :  { %v8567_v48 = vpop.f32.mrf.mxu0 }
 0x982   :  { %v6444_v56 = vpop.f32.mrf.mxu1 }
 0x984   :  { %v8672_v41 = vpop.f32.mrf.mxu1 }
 0x98b   :  { %v6355_v5 = vpop.f32.mrf.mxu0 }
 0x98c   :  { %v6356_v51 = vadd.f32 %v6355_v5, %v6252_v43 }
 0x98d   :  { %v8637_v18 = vpop.f32.mrf.mxu0 }
 0x98e   :  { %v6445_v54 = vadd.f32 %v6444_v56, %v6356_v51 }
 0x9a4   :  { %v6650_v46 = vpop.f32.mrf.mxu1 }
 0x9a6   :  { %v8742_v55 = vpop.f32.mrf.mxu1 }
 0x9ac   :  { %v6563_v9 = vpop.f32.mrf.mxu0 }
 0x9ad   :  { %v6564_v60 = vadd.f32 %v6563_v9, %v6445_v54 }
 0x9ae   :  { %v8707_v21 = vpop.f32.mrf.mxu0 }
 0x9af   :  { %v6651_v1 = vadd.f32 %v6650_v46, %v6564_v60 }
 0x9b1   :  { %6655 = vst.msk [vmem:[#allocation8 + $0x8] sm:$0xff] %vm66_vm0, %v6651_v1 }
 0x9b2   :  { %8866 = shalt.err (!%p8863_p5)
}
 0x9b3   :  { %6667 = dma.vmem_to_hbm [thread:$0]  %s6662_s4, 256, %s11181_s3, [#allocation4], %s8885_s22, %s8885_s22, %s8886_s23  }
 0x9b4   :  { %8879 = dma.done.wait [#allocation4], 256  }
 0x9b5   :  { %8880 = vsyncadd [#allocation4], 4294967040 }
 0x9b6   :  { %6671 = vsyncpa [#allocation3], 1 }
 0x9b7   :  { %6672 = vsyncpa [#allocation6], 1 }
 0x9b8   :  { %6673 = vsyncpa [#allocation4], 1 }

</bundles_post_ra>
